<compile_context>
chip_gen: v7x
topology: tpu7x:2x2x1
jax: 0.10.0
libtpu: 0.0.40
codegen_flags: <defaults>
</compile_context>

<pallas_src>
import numpy as np
import jax
import jax.numpy as jnp
from jax.experimental import pallas as pl
from jax.experimental.pallas import tpu as pltpu

# ----------------------------- hyper-parameters (small) -----------------------------
B = 2
SEQ_LEN = 8
NUM_FEATURES = 4
N_DIM_SELECTION = 16
N_DIM_MODEL = 32
N_HEADS = 4
N_LAYERS = 2           # TSMixer blocks
N_LAYERS_ENCODED = 2   # output "l" dim of the six GRNs
D_HEAD = N_DIM_MODEL // N_HEADS
EPS = 1e-5             # torch LayerNorm default

F, Hs, D, S, L = NUM_FEATURES, N_DIM_SELECTION, N_DIM_MODEL, SEQ_LEN, N_LAYERS_ENCODED
NB, H, DH = N_LAYERS, N_HEADS, D_HEAD
FH = F * Hs
BS = B * S
BHS = B * H * S
G6 = 6
OUT_ROWS = G6 * L          # 12 output rows (6 GRNs x n_layers_encoded)
OUT_COLS = B * D           # 64 lanes: both batch elements side by side
PACK_W = 128               # single packed parameter buffer, 128 lanes

# ----------------------------- canonical parameter table -----------------------------
PARAM_SHAPES = {
    # VariableSelection: prescalers (Linear(1, Hs) per feature)
    "vs_pre_w": (F, Hs), "vs_pre_b": (F, Hs),
    # VariableSelection: per-feature GRN (Hs -> D)
    "vs_w1": (F, Hs, Hs), "vs_b1": (F, Hs),
    "vs_w2": (F, Hs, D), "vs_b2": (F, D),
    "vs_wg": (F, D, 2 * D), "vs_bg": (F, 2 * D),
    "vs_wp": (F, Hs, D), "vs_bp": (F, D),
    "vs_g": (F, D), "vs_be": (F, D),
    # VariableSelection: flattened GRN (F*Hs -> F)
    "fl_w1": (FH, FH), "fl_b1": (FH,),
    "fl_w2": (FH, F), "fl_b2": (F,),
    "fl_wg": (F, 2 * F), "fl_bg": (2 * F,),
    "fl_wp": (FH, F), "fl_bp": (F,),
    "fl_g": (F,), "fl_be": (F,),
    # BasicTSMixerModel
    "mx_ln1_g": (NB, D), "mx_ln1_b": (NB, D),
    "mx_tw": (NB, S, S), "mx_tb": (NB, S),
    "mx_ln2_g": (NB, D), "mx_ln2_b": (NB, D),
    "mx_fw1": (NB, D, D), "mx_fb1": (NB, D),
    "mx_fw2": (NB, D, D), "mx_fb2": (NB, D),
    # InterpretableMultiHeadAttention
    "at_wq": (H, D, DH), "at_bq": (H, DH),
    "at_wk": (H, D, DH), "at_bk": (H, DH),
    "at_wv": (D, DH), "at_bv": (DH,),
    "at_wo": (DH, D), "at_bo": (D,),
    # GateAddNorm
    "gt_wg": (D, 2 * D), "gt_bg": (2 * D,),
    "gt_g": (D,), "gt_b": (D,),
    # six GRNs (seq_len -> n_layers_encoded): [grn1h, grn1o, grn2h, grn2o, grn3h, grn3o]
    "g6_w1": (G6, S, S), "g6_b1": (G6, S),
    "g6_w2": (G6, S, L), "g6_b2": (G6, L),
    "g6_wg": (G6, L, 2 * L), "g6_bg": (G6, 2 * L),
    "g6_wp": (G6, S, L), "g6_bp": (G6, L),
    "g6_g": (G6, L), "g6_be": (G6, L),
}

LN_GAMMA = {"vs_g", "fl_g", "mx_ln1_g", "mx_ln2_g", "gt_g", "g6_g"}
LN_BETA = {"vs_be", "fl_be", "mx_ln1_b", "mx_ln2_b", "gt_b", "g6_be"}


def init_params(seed: int = 42):
    key = jax.random.PRNGKey(seed)
    params = {}
    for name, shape in PARAM_SHAPES.items():
        if name in LN_GAMMA:
            params[name] = jnp.ones(shape, jnp.float32)
        elif name in LN_BETA:
            params[name] = jnp.zeros(shape, jnp.float32)
        else:
            key, sub = jax.random.split(key)
            params[name] = jax.random.normal(sub, shape, jnp.float32) * 0.1
    return params


# ----------------------------- host-side parameter packing (numpy, runs ONCE) -----------------------------
def _bd(blocks):
    blocks = [np.asarray(b, np.float32) for b in blocks]
    rs = sum(b.shape[0] for b in blocks)
    cs = sum(b.shape[1] for b in blocks)
    out = np.zeros((rs, cs), np.float32)
    r = c = 0
    for b in blocks:
        out[r:r + b.shape[0], c:c + b.shape[1]] = b
        r += b.shape[0]
        c += b.shape[1]
    return out


def _pack_np(entries, width=PACK_W):
    """Row-pack (name, 2-D array) blocks into one (R, width) f32 buffer.
    Each block starts at an 8-aligned row so in-kernel static loads stay sublane-aligned."""
    table = {}
    rows = []
    off = 0
    for name, arr in entries:
        a = np.asarray(arr, np.float32)
        if a.ndim == 1:
            a = a[None, :]
        r, c = a.shape
        assert c <= width, (name, a.shape, width)
        pad = (-off) % 8
        if pad:
            rows.append(np.zeros((pad, width), np.float32))
            off += pad
        blk = np.zeros((r, width), np.float32)
        blk[:, :c] = a
        table[name] = (off, r, c)
        rows.append(blk)
        off += r
    pad = (-off) % 8
    if pad:
        rows.append(np.zeros((pad, width), np.float32))
    return np.concatenate(rows, axis=0), table


def prepare_packed(params):
    p = {k: np.asarray(v, np.float32) for k, v in params.items()}
    e = []

    # ---- VariableSelection ----
    e += [
        ("vs_pre_w", _bd([p["vs_pre_w"][f][None, :] for f in range(F)])),     # (F, F*Hs)
        ("vs_pre_b", p["vs_pre_b"].reshape(-1)),
        ("fl_wp", p["fl_wp"]), ("fl_bp", p["fl_bp"]),
        ("fl_w1", p["fl_w1"]), ("fl_b1", p["fl_b1"]),
        ("fl_w2", p["fl_w2"]), ("fl_b2", p["fl_b2"]),
        ("fl_wga", p["fl_wg"][:, :F]), ("fl_bga", p["fl_bg"][:F]),
        ("fl_wgb", p["fl_wg"][:, F:]), ("fl_bgb", p["fl_bg"][F:]),
        ("fl_g", p["fl_g"]), ("fl_be", p["fl_be"]),
        ("vs_w1_bd", _bd([p["vs_w1"][f] for f in range(F)])),                 # (FH, FH)
        ("vs_b1", p["vs_b1"].reshape(-1)),
        ("vs_w2_bd", _bd([p["vs_w2"][f] for f in range(F)])),                 # (FH, F*D)
        ("vs_b2", p["vs_b2"].reshape(-1)),
        ("vs_wp_bd", _bd([p["vs_wp"][f] for f in range(F)])),
        ("vs_bp", p["vs_bp"].reshape(-1)),
        ("vs_wga_bd", _bd([p["vs_wg"][f][:, :D] for f in range(F)])),
        ("vs_bga", p["vs_bg"][:, :D].reshape(-1)),
        ("vs_wgb_bd", _bd([p["vs_wg"][f][:, D:] for f in range(F)])),
        ("vs_bgb", p["vs_bg"][:, D:].reshape(-1)),
        ("vs_ln_g", p["vs_g"].reshape(-1)),
        ("vs_ln_b", p["vs_be"].reshape(-1)),
        ("m_ind", np.kron(np.eye(F, dtype=np.float32), np.ones((1, D), np.float32))),   # (F, F*D)
        ("m_sum", np.kron(np.ones((F, 1), np.float32), np.eye(D, dtype=np.float32))),   # (F*D, D)
    ]

    # ---- BasicTSMixerModel (time-mix folded into one (BS,BS) block-diag left multiplier) ----
    for i in range(NB):
        e += [
            (f"mx{i}_ln1_g", p["mx_ln1_g"][i]), (f"mx{i}_ln1_b", p["mx_ln1_b"][i]),
            (f"mx{i}_tw_bd", _bd([p["mx_tw"][i].T] * B)),                     # (BS, BS)
            (f"mx{i}_tb", np.tile(p["mx_tb"][i][:, None], (B, 1))),           # (BS, 1)
            (f"mx{i}_ln2_g", p["mx_ln2_g"][i]), (f"mx{i}_ln2_b", p["mx_ln2_b"][i]),
            (f"mx{i}_fw1", p["mx_fw1"][i]), (f"mx{i}_fb1", p["mx_fb1"][i]),
            (f"mx{i}_fw2", p["mx_fw2"][i]), (f"mx{i}_fb2", p["mx_fb2"][i]),
        ]

    # ---- attention: host-precomputed permutation / replication / mask matrices ----
    prep = np.zeros((BHS, BS), np.float32)        # replicate rows per (batch, head)
    hmask = np.zeros((BHS, H * D), np.float32)    # keep only this row-block's head lanes
    bqc = np.zeros((BHS, DH), np.float32)
    bkc = np.zeros((BHS, DH), np.float32)
    for b in range(B):
        for h in range(H):
            base = (b * H + h) * S
            for s in range(S):
                prep[base + s, b * S + s] = 1.0
            hmask[base:base + S, h * D:(h + 1) * D] = 1.0
            bqc[base:base + S, :] = p["at_bq"][h]
            bkc[base:base + S, :] = p["at_bk"][h]
    rtile = np.tile(np.eye(D, dtype=np.float32), (1, H))                      # (D, H*D)
    wqr = np.concatenate([p["at_wq"][h] for h in range(H)], axis=0)           # (H*D, DH)
    wkr = np.concatenate([p["at_wk"][h] for h in range(H)], axis=0)
    blk = np.kron(np.eye(B * H, dtype=np.float32), np.ones((S, S), np.float32))
    smask = (1.0 - blk) * (-1e9)                                              # additive score mask
    pred = prep.T * (1.0 / H)                                                 # head-mean reducer
    e += [
        ("at_wv", p["at_wv"]), ("at_bv", p["at_bv"]),
        ("at_prep", prep), ("at_rtile", rtile), ("at_hmask", hmask),
        ("at_wqr", wqr), ("at_bqc", bqc),
        ("at_wkr", wkr), ("at_bkc", bkc),
        ("at_smask", smask), ("at_pred", pred),
        ("at_wo", p["at_wo"]), ("at_bo", p["at_bo"]),
    ]

    # ---- GateAddNorm (gate split into a/b halves -> no lane slicing in kernel) ----
    e += [
        ("gt_wga", p["gt_wg"][:, :D]), ("gt_bga", p["gt_bg"][:D]),
        ("gt_wgb", p["gt_wg"][:, D:]), ("gt_bgb", p["gt_bg"][D:]),
        ("gt_g", p["gt_g"]), ("gt_b", p["gt_b"]),
    ]

    # ---- six output GRNs (pre-transposed, block-diagonalised, both batches share weights) ----
    e += [
        ("g6_w1t", np.concatenate([p["g6_w1"][i].T for i in range(G6)], axis=0)),   # (6S, S)
        ("g6_b1c", p["g6_b1"].reshape(-1)[:, None]),                                 # (6S, 1)
        ("g6_w2t_bd", _bd([p["g6_w2"][i].T for i in range(G6)])),                    # (6L, 6S)
        ("g6_wpt", np.concatenate([p["g6_wp"][i].T for i in range(G6)], axis=0)),    # (6L, S)
        ("g6_wgat_bd", _bd([p["g6_wg"][i][:, :L].T for i in range(G6)])),            # (6L, 6L)
        ("g6_wgbt_bd", _bd([p["g6_wg"][i][:, L:].T for i in range(G6)])),            # (6L, 6L)
        ("g6_bias", np.stack([p["g6_b2"].reshape(-1), p["g6_bp"].reshape(-1),
                              p["g6_bg"][:, :L].reshape(-1), p["g6_bg"][:, L:].reshape(-1),
                              p["g6_g"].reshape(-1), p["g6_be"].reshape(-1)], axis=1)),  # (6L, 6)
        ("g6_mln", np.kron(np.eye(G6, dtype=np.float32),
                           np.full((L, L), 1.0 / L, np.float32))),                   # (6L, 6L)
    ]

    packed, table = _pack_np(e, PACK_W)
    return jnp.asarray(packed), table


# ----------------------------- the Pallas kernel -----------------------------
def make_kernel(table):
    f32 = jnp.float32
    scale = 1.0 / (float(DH) ** 0.5)

    def kernel(x_ref, p_ref, out_ref):
        def P(name):                              # point-of-use static slice of the packed params
            o, r, c = table[name]
            return p_ref[o:o + r, 0:c]

        def mm(a, b):
            return jnp.dot(a, b, preferred_element_type=f32)

        def mm_tb(a, b):                          # a @ b.T without materializing a transpose
            return jax.lax.dot_general(a, b, (((1,), (1,)), ((), ())),
                                       preferred_element_type=f32)

        def sigmoid(v):                           # exact (no approx reciprocal)
            return 1.0 / (1.0 + jnp.exp(-v))

        def elu(v):                               # exp branch is discarded by the select for v>0
            return jnp.where(v > 0, v, jnp.exp(v) - 1.0)

        def softmax(v):                           # exact divide
            e = jnp.exp(v - jnp.max(v, axis=-1, keepdims=True))
            return e / jnp.sum(e, axis=-1, keepdims=True)

        def layernorm(v, g, b):
            mu = jnp.mean(v, axis=-1, keepdims=True)
            c = v - mu
            var = jnp.mean(c * c, axis=-1, keepdims=True)
            return c * jax.lax.rsqrt(var + EPS) * g + b

        x = x_ref[...]                                          # (BS, F)

        # ---------------- VariableSelection (fully fused over features) ----------------
        flat = mm(x, P("vs_pre_w")) + P("vs_pre_b")             # (BS, F*Hs)

        # flattened GRN (F*Hs -> F) -> softmax selection weights
        res_w = mm(flat, P("fl_wp")) + P("fl_bp")
        hw = elu(mm(flat, P("fl_w1")) + P("fl_b1"))
        hw = mm(hw, P("fl_w2")) + P("fl_b2")
        gaw = mm(hw, P("fl_wga")) + P("fl_bga")
        gbw = mm(hw, P("fl_wgb")) + P("fl_bgb")
        wsel = softmax(layernorm(gaw * sigmoid(gbw) + res_w, P("fl_g"), P("fl_be")))   # (BS, F)

        # F per-feature GRNs (Hs -> D) as block-diagonal matmuls
        res = mm(flat, P("vs_wp_bd")) + P("vs_bp")              # (BS, F*D)
        h = elu(mm(flat, P("vs_w1_bd")) + P("vs_b1"))
        h = mm(h, P("vs_w2_bd")) + P("vs_b2")
        ga = mm(h, P("vs_wga_bd")) + P("vs_bga")
        gb = mm(h, P("vs_wgb_bd")) + P("vs_bgb")
        y = ga * sigmoid(gb) + res                              # (BS, F*D)

        # per-feature-block LayerNorm via indicator matmuls
        mind = P("m_ind")                                       # (F, F*D)
        mu = mm(mm_tb(y, mind) * (1.0 / D), mind)
        c = y - mu
        var = mm(mm_tb(c * c, mind) * (1.0 / D), mind)
        normed = c * jax.lax.rsqrt(var + EPS) * P("vs_ln_g") + P("vs_ln_b")

        # softmax-weighted sum over features
        wb = mm(wsel, mind)
        xk = mm(normed * wb, P("m_sum"))                        # (BS, D)

        # ---------------- BasicTSMixerModel (pre-norm, tanh) ----------------
        for i in range(NB):
            yn = layernorm(xk, P(f"mx{i}_ln1_g"), P(f"mx{i}_ln1_b"))
            # time-mix: single (BS,BS) block-diagonal left matmul (both batches at once)
            xk = xk + jnp.tanh(mm(P(f"mx{i}_tw_bd"), yn) + P(f"mx{i}_tb"))
            yn = layernorm(xk, P(f"mx{i}_ln2_g"), P(f"mx{i}_ln2_b"))
            yn = jnp.tanh(mm(yn, P(f"mx{i}_fw1")) + P(f"mx{i}_fb1"))
            yn = mm(yn, P(f"mx{i}_fw2")) + P(f"mx{i}_fb2")
            xk = xk + yn

        # ---------------- InterpretableMultiHeadAttention (fused over batch AND heads) ----------------
        v_all = mm(xk, P("at_wv")) + P("at_bv")                 # (BS, DH) shared V
        prep = P("at_prep")                                     # (BHS, BS) row replication
        xr = mm(prep, xk)                                       # (BHS, D)
        a = mm(xr, P("at_rtile")) * P("at_hmask")               # (BHS, H*D) head-block expansion
        qs = mm(a, P("at_wqr")) + P("at_bqc")                   # (BHS, DH)
        ks = mm(a, P("at_wkr")) + P("at_bkc")                   # (BHS, DH)
        sc = mm_tb(qs, ks) * scale + P("at_smask")              # (BHS, BHS), block-diag mask
        pr = softmax(sc)                                        # ONE softmax
        vs_ = mm(prep, v_all)                                   # (BHS, DH) replicated V
        os_ = mm(pr, vs_)                                       # (BHS, DH) ONE PV matmul
        hm = mm(P("at_pred"), os_)                              # (BS, DH), mean over heads folded in
        attn = mm(hm, P("at_wo")) + P("at_bo")                  # (BS, D)

        # ---------------- GateAddNorm ----------------
        za = mm(attn, P("gt_wga")) + P("gt_bga")
        zb = mm(attn, P("gt_wgb")) + P("gt_bgb")
        xk = layernorm(za * sigmoid(zb) + xk, P("gt_g"), P("gt_b"))   # (BS, D)

        # ---------------- six output GRNs: both batches lane-stacked, single chain ----------------
        xb = jnp.concatenate([xk[b * S:(b + 1) * S, :] for b in range(B)], axis=1)   # (S, B*D)
        bias = P("g6_bias")                                     # cols: b2, bp, bga, bgb, gamma, beta
        ht = elu(mm(P("g6_w1t"), xb) + P("g6_b1c"))             # (6S, B*D)
        h2 = mm(P("g6_w2t_bd"), ht) + bias[:, 0:1]              # (6L, B*D)
        rs = mm(P("g6_wpt"), xb) + bias[:, 1:2]
        gat = mm(P("g6_wgat_bd"), h2) + bias[:, 2:3]
        gbt = mm(P("g6_wgbt_bd"), h2) + bias[:, 3:4]
        yt = gat * sigmoid(gbt) + rs                            # (6L, B*D)
        mln = P("g6_mln")                                       # per-GRN mean over L (broadcast)
        mu_t = mm(mln, yt)
        ct = yt - mu_t
        var_t = mm(mln, ct * ct)
        out_ref[...] = ct * jax.lax.rsqrt(var_t + EPS) * bias[:, 4:5] + bias[:, 5:6]

    return kernel


# ----------------------------- wrapper (packing hoisted, forward jitted) -----------------------------
def build_pete_forward(params):
    packed, table = prepare_packed(params)        # runs ONCE (numpy on host, one transfer)

    call = pl.pallas_call(
        make_kernel(table),
        # no grid: single invocation, full-array VMEM blocks, no double-buffering/pipeline overhead
        in_specs=[pl.BlockSpec(memory_space=pltpu.MemorySpace.VMEM),
                  pl.BlockSpec(memory_space=pltpu.MemorySpace.VMEM)],
        out_specs=pl.BlockSpec(memory_space=pltpu.MemorySpace.VMEM),
        out_shape=jax.ShapeDtypeStruct((OUT_ROWS, OUT_COLS), jnp.float32),
    )

    @jax.jit
    def forward(x, packed_buf):
        x2 = x.reshape(BS, F).astype(jnp.float32)
        out = call(x2, packed_buf)                              # (6L, B*D) lane-dense slab
        out4 = out.reshape(G6, L, B, D)                         # free layout plumbing
        return {"hx": (out4[0], out4[1]),
                "hx2": (out4[2], out4[3]),
                "hx3": (out4[4], out4[5])}

    return forward, packed


# ----------------------------- main -----------------------------
if __name__ == "__main__":
    params = init_params(seed=42)
    forward, packed = build_pete_forward(params)   # parameter packing hoisted out of per-call path

    key = jax.random.PRNGKey(0)
    x = jax.random.normal(key, (B, SEQ_LEN, NUM_FEATURES), jnp.float32)

    state = forward(x, packed)
    leaves = jax.tree_util.tree_leaves(state)
    jax.block_until_ready(leaves)

    for leaf in leaves:
        assert leaf.shape == (N_LAYERS_ENCODED, B, N_DIM_MODEL), leaf.shape
        assert bool(jnp.all(jnp.isfinite(leaf)))
    assert set(state.keys()) == {"hx", "hx2", "hx3"}

    # TODO(synk): dropout layers are treated as identity (inference mode); training-time
    # stochastic dropout is not implemented in the kernel.
    print("KERNEL_OK")
</pallas_src>

<mosaic_0001>
module attributes {stable_mosaic.version = 11 : i64} {
  func.func @kernel(%arg0: memref<16x4xf32, #tpu.memory_space<vmem>>, %arg1: memref<2176x128xf32, #tpu.memory_space<vmem>>, %arg2: memref<12x64xf32, #tpu.memory_space<vmem>>) attributes {dimension_semantics = [], scalar_prefetch = 0 : i64, scratch_operands = 0 : i64, tpu.core_type = #tpu.core_type<tc>} {
    %c0 = arith.constant 0 : index
    %c0_0 = arith.constant 0 : index
    %0 = vector.load %arg0[%c0, %c0_0] : memref<16x4xf32, #tpu.memory_space<vmem>>, vector<16x4xf32>
    %c0_1 = arith.constant 0 : index
    %c0_2 = arith.constant 0 : index
    %1 = vector.load %arg1[%c0_1, %c0_2] : memref<2176x128xf32, #tpu.memory_space<vmem>>, vector<4x64xf32>
    %cst = arith.constant dense<0.000000e+00> : vector<16x64xf32>
    %2 = tpu.matmul %0, %1, %cst {dimension_numbers = #tpu.dot_dimension_numbers<[1], [0], [0], [1], [0, 0, 1, 1], [], []>} : vector<16x4xf32>, vector<4x64xf32>, vector<16x64xf32> -> vector<16x64xf32>
    %c8 = arith.constant 8 : index
    %c0_3 = arith.constant 0 : index
    %3 = vector.load %arg1[%c8, %c0_3] : memref<2176x128xf32, #tpu.memory_space<vmem>>, vector<1x64xf32>
    %4 = vector.broadcast %3 : vector<1x64xf32> to vector<16x64xf32>
    %5 = arith.addf %2, %4 : vector<16x64xf32>
    %c16 = arith.constant 16 : index
    %c0_4 = arith.constant 0 : index
    %6 = vector.load %arg1[%c16, %c0_4] : memref<2176x128xf32, #tpu.memory_space<vmem>>, vector<64x4xf32>
    %cst_5 = arith.constant dense<0.000000e+00> : vector<16x4xf32>
    %7 = tpu.matmul %5, %6, %cst_5 {dimension_numbers = #tpu.dot_dimension_numbers<[1], [0], [0], [1], [0, 0, 1, 1], [], []>} : vector<16x64xf32>, vector<64x4xf32>, vector<16x4xf32> -> vector<16x4xf32>
    %c80 = arith.constant 80 : index
    %c0_6 = arith.constant 0 : index
    %8 = vector.load %arg1[%c80, %c0_6] : memref<2176x128xf32, #tpu.memory_space<vmem>>, vector<1x4xf32>
    %9 = vector.broadcast %8 : vector<1x4xf32> to vector<16x4xf32>
    %10 = arith.addf %7, %9 : vector<16x4xf32>
    %c88 = arith.constant 88 : index
    %c0_7 = arith.constant 0 : index
    %11 = vector.load %arg1[%c88, %c0_7] : memref<2176x128xf32, #tpu.memory_space<vmem>>, vector<64x64xf32>
    %cst_8 = arith.constant dense<0.000000e+00> : vector<16x64xf32>
    %12 = tpu.matmul %5, %11, %cst_8 {dimension_numbers = #tpu.dot_dimension_numbers<[1], [0], [0], [1], [0, 0, 1, 1], [], []>} : vector<16x64xf32>, vector<64x64xf32>, vector<16x64xf32> -> vector<16x64xf32>
    %c152 = arith.constant 152 : index
    %c0_9 = arith.constant 0 : index
    %13 = vector.load %arg1[%c152, %c0_9] : memref<2176x128xf32, #tpu.memory_space<vmem>>, vector<1x64xf32>
    %14 = vector.broadcast %13 : vector<1x64xf32> to vector<16x64xf32>
    %15 = arith.addf %12, %14 : vector<16x64xf32>
    %cst_10 = arith.constant 0.000000e+00 : f32
    %16 = vector.broadcast %cst_10 : f32 to vector<16x64xf32>
    %17 = arith.cmpf ogt, %15, %16 : vector<16x64xf32>
    %18 = math.exp %15 : vector<16x64xf32>
    %cst_11 = arith.constant 1.000000e+00 : f32
    %19 = vector.broadcast %cst_11 : f32 to vector<16x64xf32>
    %20 = arith.subf %18, %19 : vector<16x64xf32>
    %21 = arith.select %17, %15, %20 : vector<16x64xi1>, vector<16x64xf32>
    %c160 = arith.constant 160 : index
    %c0_12 = arith.constant 0 : index
    %22 = vector.load %arg1[%c160, %c0_12] : memref<2176x128xf32, #tpu.memory_space<vmem>>, vector<64x4xf32>
    %cst_13 = arith.constant dense<0.000000e+00> : vector<16x4xf32>
    %23 = tpu.matmul %21, %22, %cst_13 {dimension_numbers = #tpu.dot_dimension_numbers<[1], [0], [0], [1], [0, 0, 1, 1], [], []>} : vector<16x64xf32>, vector<64x4xf32>, vector<16x4xf32> -> vector<16x4xf32>
    %c224 = arith.constant 224 : index
    %c0_14 = arith.constant 0 : index
    %24 = vector.load %arg1[%c224, %c0_14] : memref<2176x128xf32, #tpu.memory_space<vmem>>, vector<1x4xf32>
    %25 = vector.broadcast %24 : vector<1x4xf32> to vector<16x4xf32>
    %26 = arith.addf %23, %25 : vector<16x4xf32>
    %c232 = arith.constant 232 : index
    %c0_15 = arith.constant 0 : index
    %27 = vector.load %arg1[%c232, %c0_15] : memref<2176x128xf32, #tpu.memory_space<vmem>>, vector<4x4xf32>
    %cst_16 = arith.constant dense<0.000000e+00> : vector<16x4xf32>
    %28 = tpu.matmul %26, %27, %cst_16 {dimension_numbers = #tpu.dot_dimension_numbers<[1], [0], [0], [1], [0, 0, 1, 1], [], []>} : vector<16x4xf32>, vector<4x4xf32>, vector<16x4xf32> -> vector<16x4xf32>
    %c240 = arith.constant 240 : index
    %c0_17 = arith.constant 0 : index
    %29 = vector.load %arg1[%c240, %c0_17] : memref<2176x128xf32, #tpu.memory_space<vmem>>, vector<1x4xf32>
    %30 = vector.broadcast %29 : vector<1x4xf32> to vector<16x4xf32>
    %31 = arith.addf %28, %30 : vector<16x4xf32>
    %c248 = arith.constant 248 : index
    %c0_18 = arith.constant 0 : index
    %32 = vector.load %arg1[%c248, %c0_18] : memref<2176x128xf32, #tpu.memory_space<vmem>>, vector<4x4xf32>
    %cst_19 = arith.constant dense<0.000000e+00> : vector<16x4xf32>
    %33 = tpu.matmul %26, %32, %cst_19 {dimension_numbers = #tpu.dot_dimension_numbers<[1], [0], [0], [1], [0, 0, 1, 1], [], []>} : vector<16x4xf32>, vector<4x4xf32>, vector<16x4xf32> -> vector<16x4xf32>
    %c256 = arith.constant 256 : index
    %c0_20 = arith.constant 0 : index
    %34 = vector.load %arg1[%c256, %c0_20] : memref<2176x128xf32, #tpu.memory_space<vmem>>, vector<1x4xf32>
    %35 = vector.broadcast %34 : vector<1x4xf32> to vector<16x4xf32>
    %36 = arith.addf %33, %35 : vector<16x4xf32>
    %cst_21 = arith.constant 0.000000e+00 : f32
    %37 = vector.broadcast %cst_21 : f32 to vector<16x4xf32>
    %38 = arith.subf %37, %36 : vector<16x4xf32>
    %39 = math.exp %38 : vector<16x4xf32>
    %cst_22 = arith.constant 1.000000e+00 : f32
    %40 = vector.broadcast %cst_22 : f32 to vector<16x4xf32>
    %41 = arith.addf %40, %39 : vector<16x4xf32>
    %cst_23 = arith.constant 1.000000e+00 : f32
    %42 = vector.broadcast %cst_23 : f32 to vector<16x4xf32>
    %43 = arith.divf %42, %41 : vector<16x4xf32>
    %44 = arith.mulf %31, %43 : vector<16x4xf32>
    %45 = arith.addf %44, %10 : vector<16x4xf32>
    %c264 = arith.constant 264 : index
    %c0_24 = arith.constant 0 : index
    %46 = vector.load %arg1[%c264, %c0_24] : memref<2176x128xf32, #tpu.memory_space<vmem>>, vector<1x4xf32>
    %c272 = arith.constant 272 : index
    %c0_25 = arith.constant 0 : index
    %47 = vector.load %arg1[%c272, %c0_25] : memref<2176x128xf32, #tpu.memory_space<vmem>>, vector<1x4xf32>
    %cst_26 = arith.constant dense<0.000000e+00> : vector<16xf32>
    %48 = vector.multi_reduction <add>, %45, %cst_26 [1] : vector<16x4xf32> to vector<16xf32>
    %49 = vector.shape_cast %48 : vector<16xf32> to vector<16x1xf32>
    %cst_27 = arith.constant 4.000000e+00 : f32
    %50 = vector.broadcast %cst_27 : f32 to vector<16x1xf32>
    %51 = arith.divf %49, %50 : vector<16x1xf32>
    %52 = vector.broadcast %51 : vector<16x1xf32> to vector<16x4xf32>
    %53 = arith.subf %45, %52 : vector<16x4xf32>
    %54 = arith.mulf %53, %53 : vector<16x4xf32>
    %cst_28 = arith.constant dense<0.000000e+00> : vector<16xf32>
    %55 = vector.multi_reduction <add>, %54, %cst_28 [1] : vector<16x4xf32> to vector<16xf32>
    %56 = vector.shape_cast %55 : vector<16xf32> to vector<16x1xf32>
    %cst_29 = arith.constant 4.000000e+00 : f32
    %57 = vector.broadcast %cst_29 : f32 to vector<16x1xf32>
    %58 = arith.divf %56, %57 : vector<16x1xf32>
    %cst_30 = arith.constant 9.99999974E-6 : f32
    %59 = vector.broadcast %cst_30 : f32 to vector<16x1xf32>
    %60 = arith.addf %58, %59 : vector<16x1xf32>
    %61 = math.rsqrt %60 : vector<16x1xf32>
    %62 = vector.broadcast %61 : vector<16x1xf32> to vector<16x4xf32>
    %63 = arith.mulf %53, %62 : vector<16x4xf32>
    %64 = vector.broadcast %46 : vector<1x4xf32> to vector<16x4xf32>
    %65 = arith.mulf %63, %64 : vector<16x4xf32>
    %66 = vector.broadcast %47 : vector<1x4xf32> to vector<16x4xf32>
    %67 = arith.addf %65, %66 : vector<16x4xf32>
    %cst_31 = arith.constant dense<0xFF800000> : vector<16xf32>
    %68 = vector.multi_reduction <maximumf>, %67, %cst_31 [1] : vector<16x4xf32> to vector<16xf32>
    %69 = vector.shape_cast %68 : vector<16xf32> to vector<16x1xf32>
    %70 = vector.broadcast %69 : vector<16x1xf32> to vector<16x4xf32>
    %71 = arith.subf %67, %70 : vector<16x4xf32>
    %72 = math.exp %71 : vector<16x4xf32>
    %cst_32 = arith.constant dense<0.000000e+00> : vector<16xf32>
    %73 = vector.multi_reduction <add>, %72, %cst_32 [1] : vector<16x4xf32> to vector<16xf32>
    %74 = vector.shape_cast %73 : vector<16xf32> to vector<16x1xf32>
    %75 = vector.broadcast %74 : vector<16x1xf32> to vector<16x4xf32>
    %76 = arith.divf %72, %75 : vector<16x4xf32>
    %c424 = arith.constant 424 : index
    %c0_33 = arith.constant 0 : index
    %77 = vector.load %arg1[%c424, %c0_33] : memref<2176x128xf32, #tpu.memory_space<vmem>>, vector<64x128xf32>
    %cst_34 = arith.constant dense<0.000000e+00> : vector<16x128xf32>
    %78 = tpu.matmul %5, %77, %cst_34 {dimension_numbers = #tpu.dot_dimension_numbers<[1], [0], [0], [1], [0, 0, 1, 1], [], []>} : vector<16x64xf32>, vector<64x128xf32>, vector<16x128xf32> -> vector<16x128xf32>
    %c488 = arith.constant 488 : index
    %c0_35 = arith.constant 0 : index
    %79 = vector.load %arg1[%c488, %c0_35] : memref<2176x128xf32, #tpu.memory_space<vmem>>, vector<1x128xf32>
    %80 = vector.broadcast %79 : vector<1x128xf32> to vector<16x128xf32>
    %81 = arith.addf %78, %80 : vector<16x128xf32>
    %c280 = arith.constant 280 : index
    %c0_36 = arith.constant 0 : index
    %82 = vector.load %arg1[%c280, %c0_36] : memref<2176x128xf32, #tpu.memory_space<vmem>>, vector<64x64xf32>
    %cst_37 = arith.constant dense<0.000000e+00> : vector<16x64xf32>
    %83 = tpu.matmul %5, %82, %cst_37 {dimension_numbers = #tpu.dot_dimension_numbers<[1], [0], [0], [1], [0, 0, 1, 1], [], []>} : vector<16x64xf32>, vector<64x64xf32>, vector<16x64xf32> -> vector<16x64xf32>
    %c344 = arith.constant 344 : index
    %c0_38 = arith.constant 0 : index
    %84 = vector.load %arg1[%c344, %c0_38] : memref<2176x128xf32, #tpu.memory_space<vmem>>, vector<1x64xf32>
    %85 = vector.broadcast %84 : vector<1x64xf32> to vector<16x64xf32>
    %86 = arith.addf %83, %85 : vector<16x64xf32>
    %cst_39 = arith.constant 0.000000e+00 : f32
    %87 = vector.broadcast %cst_39 : f32 to vector<16x64xf32>
    %88 = arith.cmpf ogt, %86, %87 : vector<16x64xf32>
    %89 = math.exp %86 : vector<16x64xf32>
    %cst_40 = arith.constant 1.000000e+00 : f32
    %90 = vector.broadcast %cst_40 : f32 to vector<16x64xf32>
    %91 = arith.subf %89, %90 : vector<16x64xf32>
    %92 = arith.select %88, %86, %91 : vector<16x64xi1>, vector<16x64xf32>
    %c352 = arith.constant 352 : index
    %c0_41 = arith.constant 0 : index
    %93 = vector.load %arg1[%c352, %c0_41] : memref<2176x128xf32, #tpu.memory_space<vmem>>, vector<64x128xf32>
    %cst_42 = arith.constant dense<0.000000e+00> : vector<16x128xf32>
    %94 = tpu.matmul %92, %93, %cst_42 {dimension_numbers = #tpu.dot_dimension_numbers<[1], [0], [0], [1], [0, 0, 1, 1], [], []>} : vector<16x64xf32>, vector<64x128xf32>, vector<16x128xf32> -> vector<16x128xf32>
    %c416 = arith.constant 416 : index
    %c0_43 = arith.constant 0 : index
    %95 = vector.load %arg1[%c416, %c0_43] : memref<2176x128xf32, #tpu.memory_space<vmem>>, vector<1x128xf32>
    %96 = vector.broadcast %95 : vector<1x128xf32> to vector<16x128xf32>
    %97 = arith.addf %94, %96 : vector<16x128xf32>
    %c496 = arith.constant 496 : index
    %c0_44 = arith.constant 0 : index
    %98 = vector.load %arg1[%c496, %c0_44] : memref<2176x128xf32, #tpu.memory_space<vmem>>, vector<128x128xf32>
    %cst_45 = arith.constant dense<0.000000e+00> : vector<16x128xf32>
    %99 = tpu.matmul %97, %98, %cst_45 {dimension_numbers = #tpu.dot_dimension_numbers<[1], [0], [0], [1], [0, 0, 1, 1], [], []>} : vector<16x128xf32>, vector<128x128xf32>, vector<16x128xf32> -> vector<16x128xf32>
    %c624 = arith.constant 624 : index
    %c0_46 = arith.constant 0 : index
    %100 = vector.load %arg1[%c624, %c0_46] : memref<2176x128xf32, #tpu.memory_space<vmem>>, vector<1x128xf32>
    %101 = vector.broadcast %100 : vector<1x128xf32> to vector<16x128xf32>
    %102 = arith.addf %99, %101 : vector<16x128xf32>
    %c632 = arith.constant 632 : index
    %c0_47 = arith.constant 0 : index
    %103 = vector.load %arg1[%c632, %c0_47] : memref<2176x128xf32, #tpu.memory_space<vmem>>, vector<128x128xf32>
    %cst_48 = arith.constant dense<0.000000e+00> : vector<16x128xf32>
    %104 = tpu.matmul %97, %103, %cst_48 {dimension_numbers = #tpu.dot_dimension_numbers<[1], [0], [0], [1], [0, 0, 1, 1], [], []>} : vector<16x128xf32>, vector<128x128xf32>, vector<16x128xf32> -> vector<16x128xf32>
    %c760 = arith.constant 760 : index
    %c0_49 = arith.constant 0 : index
    %105 = vector.load %arg1[%c760, %c0_49] : memref<2176x128xf32, #tpu.memory_space<vmem>>, vector<1x128xf32>
    %106 = vector.broadcast %105 : vector<1x128xf32> to vector<16x128xf32>
    %107 = arith.addf %104, %106 : vector<16x128xf32>
    %cst_50 = arith.constant 0.000000e+00 : f32
    %108 = vector.broadcast %cst_50 : f32 to vector<16x128xf32>
    %109 = arith.subf %108, %107 : vector<16x128xf32>
    %110 = math.exp %109 : vector<16x128xf32>
    %cst_51 = arith.constant 1.000000e+00 : f32
    %111 = vector.broadcast %cst_51 : f32 to vector<16x128xf32>
    %112 = arith.addf %111, %110 : vector<16x128xf32>
    %cst_52 = arith.constant 1.000000e+00 : f32
    %113 = vector.broadcast %cst_52 : f32 to vector<16x128xf32>
    %114 = arith.divf %113, %112 : vector<16x128xf32>
    %115 = arith.mulf %102, %114 : vector<16x128xf32>
    %116 = arith.addf %115, %81 : vector<16x128xf32>
    %c784 = arith.constant 784 : index
    %c0_53 = arith.constant 0 : index
    %117 = vector.load %arg1[%c784, %c0_53] : memref<2176x128xf32, #tpu.memory_space<vmem>>, vector<4x128xf32>
    %cst_54 = arith.constant dense<0.000000e+00> : vector<16x4xf32>
    %118 = tpu.matmul %116, %117, %cst_54 {dimension_numbers = #tpu.dot_dimension_numbers<[1], [1], [0], [0], [0, 0, 1, 0], [], []>} : vector<16x128xf32>, vector<4x128xf32>, vector<16x4xf32> -> vector<16x4xf32>
    %cst_55 = arith.constant 3.125000e-02 : f32
    %119 = vector.broadcast %cst_55 : f32 to vector<16x4xf32>
    %120 = arith.mulf %118, %119 : vector<16x4xf32>
    %cst_56 = arith.constant dense<0.000000e+00> : vector<16x128xf32>
    %121 = tpu.matmul %120, %117, %cst_56 {dimension_numbers = #tpu.dot_dimension_numbers<[1], [0], [0], [1], [0, 0, 1, 1], [], []>} : vector<16x4xf32>, vector<4x128xf32>, vector<16x128xf32> -> vector<16x128xf32>
    %122 = arith.subf %116, %121 : vector<16x128xf32>
    %123 = arith.mulf %122, %122 : vector<16x128xf32>
    %cst_57 = arith.constant dense<0.000000e+00> : vector<16x4xf32>
    %124 = tpu.matmul %123, %117, %cst_57 {dimension_numbers = #tpu.dot_dimension_numbers<[1], [1], [0], [0], [0, 0, 1, 0], [], []>} : vector<16x128xf32>, vector<4x128xf32>, vector<16x4xf32> -> vector<16x4xf32>
    %cst_58 = arith.constant 3.125000e-02 : f32
    %125 = vector.broadcast %cst_58 : f32 to vector<16x4xf32>
    %126 = arith.mulf %124, %125 : vector<16x4xf32>
    %cst_59 = arith.constant dense<0.000000e+00> : vector<16x128xf32>
    %127 = tpu.matmul %126, %117, %cst_59 {dimension_numbers = #tpu.dot_dimension_numbers<[1], [0], [0], [1], [0, 0, 1, 1], [], []>} : vector<16x4xf32>, vector<4x128xf32>, vector<16x128xf32> -> vector<16x128xf32>
    %cst_60 = arith.constant 9.99999974E-6 : f32
    %128 = vector.broadcast %cst_60 : f32 to vector<16x128xf32>
    %129 = arith.addf %127, %128 : vector<16x128xf32>
    %130 = math.rsqrt %129 : vector<16x128xf32>
    %131 = arith.mulf %122, %130 : vector<16x128xf32>
    %c768 = arith.constant 768 : index
    %c0_61 = arith.constant 0 : index
    %132 = vector.load %arg1[%c768, %c0_61] : memref<2176x128xf32, #tpu.memory_space<vmem>>, vector<1x128xf32>
    %133 = vector.broadcast %132 : vector<1x128xf32> to vector<16x128xf32>
    %134 = arith.mulf %131, %133 : vector<16x128xf32>
    %c776 = arith.constant 776 : index
    %c0_62 = arith.constant 0 : index
    %135 = vector.load %arg1[%c776, %c0_62] : memref<2176x128xf32, #tpu.memory_space<vmem>>, vector<1x128xf32>
    %136 = vector.broadcast %135 : vector<1x128xf32> to vector<16x128xf32>
    %137 = arith.addf %134, %136 : vector<16x128xf32>
    %cst_63 = arith.constant dense<0.000000e+00> : vector<16x128xf32>
    %138 = tpu.matmul %76, %117, %cst_63 {dimension_numbers = #tpu.dot_dimension_numbers<[1], [0], [0], [1], [0, 0, 1, 1], [], []>} : vector<16x4xf32>, vector<4x128xf32>, vector<16x128xf32> -> vector<16x128xf32>
    %139 = arith.mulf %137, %138 : vector<16x128xf32>
    %c792 = arith.constant 792 : index
    %c0_64 = arith.constant 0 : index
    %140 = vector.load %arg1[%c792, %c0_64] : memref<2176x128xf32, #tpu.memory_space<vmem>>, vector<128x32xf32>
    %cst_65 = arith.constant dense<0.000000e+00> : vector<16x32xf32>
    %141 = tpu.matmul %139, %140, %cst_65 {dimension_numbers = #tpu.dot_dimension_numbers<[1], [0], [0], [1], [0, 0, 1, 1], [], []>} : vector<16x128xf32>, vector<128x32xf32>, vector<16x32xf32> -> vector<16x32xf32>
    %c920 = arith.constant 920 : index
    %c0_66 = arith.constant 0 : index
    %142 = vector.load %arg1[%c920, %c0_66] : memref<2176x128xf32, #tpu.memory_space<vmem>>, vector<1x32xf32>
    %c928 = arith.constant 928 : index
    %c0_67 = arith.constant 0 : index
    %143 = vector.load %arg1[%c928, %c0_67] : memref<2176x128xf32, #tpu.memory_space<vmem>>, vector<1x32xf32>
    %cst_68 = arith.constant dense<0.000000e+00> : vector<16xf32>
    %144 = vector.multi_reduction <add>, %141, %cst_68 [1] : vector<16x32xf32> to vector<16xf32>
    %145 = vector.shape_cast %144 : vector<16xf32> to vector<16x1xf32>
    %cst_69 = arith.constant 3.200000e+01 : f32
    %146 = vector.broadcast %cst_69 : f32 to vector<16x1xf32>
    %147 = arith.divf %145, %146 : vector<16x1xf32>
    %148 = vector.broadcast %147 : vector<16x1xf32> to vector<16x32xf32>
    %149 = arith.subf %141, %148 : vector<16x32xf32>
    %150 = arith.mulf %149, %149 : vector<16x32xf32>
    %cst_70 = arith.constant dense<0.000000e+00> : vector<16xf32>
    %151 = vector.multi_reduction <add>, %150, %cst_70 [1] : vector<16x32xf32> to vector<16xf32>
    %152 = vector.shape_cast %151 : vector<16xf32> to vector<16x1xf32>
    %cst_71 = arith.constant 3.200000e+01 : f32
    %153 = vector.broadcast %cst_71 : f32 to vector<16x1xf32>
    %154 = arith.divf %152, %153 : vector<16x1xf32>
    %cst_72 = arith.constant 9.99999974E-6 : f32
    %155 = vector.broadcast %cst_72 : f32 to vector<16x1xf32>
    %156 = arith.addf %154, %155 : vector<16x1xf32>
    %157 = math.rsqrt %156 : vector<16x1xf32>
    %158 = vector.broadcast %157 : vector<16x1xf32> to vector<16x32xf32>
    %159 = arith.mulf %149, %158 : vector<16x32xf32>
    %160 = vector.broadcast %142 : vector<1x32xf32> to vector<16x32xf32>
    %161 = arith.mulf %159, %160 : vector<16x32xf32>
    %162 = vector.broadcast %143 : vector<1x32xf32> to vector<16x32xf32>
    %163 = arith.addf %161, %162 : vector<16x32xf32>
    %c936 = arith.constant 936 : index
    %c0_73 = arith.constant 0 : index
    %164 = vector.load %arg1[%c936, %c0_73] : memref<2176x128xf32, #tpu.memory_space<vmem>>, vector<16x16xf32>
    %cst_74 = arith.constant dense<0.000000e+00> : vector<16x32xf32>
    %165 = tpu.matmul %164, %163, %cst_74 {dimension_numbers = #tpu.dot_dimension_numbers<[1], [0], [0], [1], [0, 0, 1, 1], [], []>} : vector<16x16xf32>, vector<16x32xf32>, vector<16x32xf32> -> vector<16x32xf32>
    %c952 = arith.constant 952 : index
    %c0_75 = arith.constant 0 : index
    %166 = vector.load %arg1[%c952, %c0_75] : memref<2176x128xf32, #tpu.memory_space<vmem>>, vector<16x1xf32>
    %167 = vector.broadcast %166 : vector<16x1xf32> to vector<16x32xf32>
    %168 = arith.addf %165, %167 : vector<16x32xf32>
    %169 = math.tanh %168 : vector<16x32xf32>
    %170 = arith.addf %141, %169 : vector<16x32xf32>
    %c968 = arith.constant 968 : index
    %c0_76 = arith.constant 0 : index
    %171 = vector.load %arg1[%c968, %c0_76] : memref<2176x128xf32, #tpu.memory_space<vmem>>, vector<1x32xf32>
    %c976 = arith.constant 976 : index
    %c0_77 = arith.constant 0 : index
    %172 = vector.load %arg1[%c976, %c0_77] : memref<2176x128xf32, #tpu.memory_space<vmem>>, vector<1x32xf32>
    %cst_78 = arith.constant dense<0.000000e+00> : vector<16xf32>
    %173 = vector.multi_reduction <add>, %170, %cst_78 [1] : vector<16x32xf32> to vector<16xf32>
    %174 = vector.shape_cast %173 : vector<16xf32> to vector<16x1xf32>
    %cst_79 = arith.constant 3.200000e+01 : f32
    %175 = vector.broadcast %cst_79 : f32 to vector<16x1xf32>
    %176 = arith.divf %174, %175 : vector<16x1xf32>
    %177 = vector.broadcast %176 : vector<16x1xf32> to vector<16x32xf32>
    %178 = arith.subf %170, %177 : vector<16x32xf32>
    %179 = arith.mulf %178, %178 : vector<16x32xf32>
    %cst_80 = arith.constant dense<0.000000e+00> : vector<16xf32>
    %180 = vector.multi_reduction <add>, %179, %cst_80 [1] : vector<16x32xf32> to vector<16xf32>
    %181 = vector.shape_cast %180 : vector<16xf32> to vector<16x1xf32>
    %cst_81 = arith.constant 3.200000e+01 : f32
    %182 = vector.broadcast %cst_81 : f32 to vector<16x1xf32>
    %183 = arith.divf %181, %182 : vector<16x1xf32>
    %cst_82 = arith.constant 9.99999974E-6 : f32
    %184 = vector.broadcast %cst_82 : f32 to vector<16x1xf32>
    %185 = arith.addf %183, %184 : vector<16x1xf32>
    %186 = math.rsqrt %185 : vector<16x1xf32>
    %187 = vector.broadcast %186 : vector<16x1xf32> to vector<16x32xf32>
    %188 = arith.mulf %178, %187 : vector<16x32xf32>
    %189 = vector.broadcast %171 : vector<1x32xf32> to vector<16x32xf32>
    %190 = arith.mulf %188, %189 : vector<16x32xf32>
    %191 = vector.broadcast %172 : vector<1x32xf32> to vector<16x32xf32>
    %192 = arith.addf %190, %191 : vector<16x32xf32>
    %c984 = arith.constant 984 : index
    %c0_83 = arith.constant 0 : index
    %193 = vector.load %arg1[%c984, %c0_83] : memref<2176x128xf32, #tpu.memory_space<vmem>>, vector<32x32xf32>
    %cst_84 = arith.constant dense<0.000000e+00> : vector<16x32xf32>
    %194 = tpu.matmul %192, %193, %cst_84 {dimension_numbers = #tpu.dot_dimension_numbers<[1], [0], [0], [1], [0, 0, 1, 1], [], []>} : vector<16x32xf32>, vector<32x32xf32>, vector<16x32xf32> -> vector<16x32xf32>
    %c1016 = arith.constant 1016 : index
    %c0_85 = arith.constant 0 : index
    %195 = vector.load %arg1[%c1016, %c0_85] : memref<2176x128xf32, #tpu.memory_space<vmem>>, vector<1x32xf32>
    %196 = vector.broadcast %195 : vector<1x32xf32> to vector<16x32xf32>
    %197 = arith.addf %194, %196 : vector<16x32xf32>
    %198 = math.tanh %197 : vector<16x32xf32>
    %c1024 = arith.constant 1024 : index
    %c0_86 = arith.constant 0 : index
    %199 = vector.load %arg1[%c1024, %c0_86] : memref<2176x128xf32, #tpu.memory_space<vmem>>, vector<32x32xf32>
    %cst_87 = arith.constant dense<0.000000e+00> : vector<16x32xf32>
    %200 = tpu.matmul %198, %199, %cst_87 {dimension_numbers = #tpu.dot_dimension_numbers<[1], [0], [0], [1], [0, 0, 1, 1], [], []>} : vector<16x32xf32>, vector<32x32xf32>, vector<16x32xf32> -> vector<16x32xf32>
    %c1056 = arith.constant 1056 : index
    %c0_88 = arith.constant 0 : index
    %201 = vector.load %arg1[%c1056, %c0_88] : memref<2176x128xf32, #tpu.memory_space<vmem>>, vector<1x32xf32>
    %202 = vector.broadcast %201 : vector<1x32xf32> to vector<16x32xf32>
    %203 = arith.addf %200, %202 : vector<16x32xf32>
    %204 = arith.addf %170, %203 : vector<16x32xf32>
    %c1064 = arith.constant 1064 : index
    %c0_89 = arith.constant 0 : index
    %205 = vector.load %arg1[%c1064, %c0_89] : memref<2176x128xf32, #tpu.memory_space<vmem>>, vector<1x32xf32>
    %c1072 = arith.constant 1072 : index
    %c0_90 = arith.constant 0 : index
    %206 = vector.load %arg1[%c1072, %c0_90] : memref<2176x128xf32, #tpu.memory_space<vmem>>, vector<1x32xf32>
    %cst_91 = arith.constant dense<0.000000e+00> : vector<16xf32>
    %207 = vector.multi_reduction <add>, %204, %cst_91 [1] : vector<16x32xf32> to vector<16xf32>
    %208 = vector.shape_cast %207 : vector<16xf32> to vector<16x1xf32>
    %cst_92 = arith.constant 3.200000e+01 : f32
    %209 = vector.broadcast %cst_92 : f32 to vector<16x1xf32>
    %210 = arith.divf %208, %209 : vector<16x1xf32>
    %211 = vector.broadcast %210 : vector<16x1xf32> to vector<16x32xf32>
    %212 = arith.subf %204, %211 : vector<16x32xf32>
    %213 = arith.mulf %212, %212 : vector<16x32xf32>
    %cst_93 = arith.constant dense<0.000000e+00> : vector<16xf32>
    %214 = vector.multi_reduction <add>, %213, %cst_93 [1] : vector<16x32xf32> to vector<16xf32>
    %215 = vector.shape_cast %214 : vector<16xf32> to vector<16x1xf32>
    %cst_94 = arith.constant 3.200000e+01 : f32
    %216 = vector.broadcast %cst_94 : f32 to vector<16x1xf32>
    %217 = arith.divf %215, %216 : vector<16x1xf32>
    %cst_95 = arith.constant 9.99999974E-6 : f32
    %218 = vector.broadcast %cst_95 : f32 to vector<16x1xf32>
    %219 = arith.addf %217, %218 : vector<16x1xf32>
    %220 = math.rsqrt %219 : vector<16x1xf32>
    %221 = vector.broadcast %220 : vector<16x1xf32> to vector<16x32xf32>
    %222 = arith.mulf %212, %221 : vector<16x32xf32>
    %223 = vector.broadcast %205 : vector<1x32xf32> to vector<16x32xf32>
    %224 = arith.mulf %222, %223 : vector<16x32xf32>
    %225 = vector.broadcast %206 : vector<1x32xf32> to vector<16x32xf32>
    %226 = arith.addf %224, %225 : vector<16x32xf32>
    %c1080 = arith.constant 1080 : index
    %c0_96 = arith.constant 0 : index
    %227 = vector.load %arg1[%c1080, %c0_96] : memref<2176x128xf32, #tpu.memory_space<vmem>>, vector<16x16xf32>
    %cst_97 = arith.constant dense<0.000000e+00> : vector<16x32xf32>
    %228 = tpu.matmul %227, %226, %cst_97 {dimension_numbers = #tpu.dot_dimension_numbers<[1], [0], [0], [1], [0, 0, 1, 1], [], []>} : vector<16x16xf32>, vector<16x32xf32>, vector<16x32xf32> -> vector<16x32xf32>
    %c1096 = arith.constant 1096 : index
    %c0_98 = arith.constant 0 : index
    %229 = vector.load %arg1[%c1096, %c0_98] : memref<2176x128xf32, #tpu.memory_space<vmem>>, vector<16x1xf32>
    %230 = vector.broadcast %229 : vector<16x1xf32> to vector<16x32xf32>
    %231 = arith.addf %228, %230 : vector<16x32xf32>
    %232 = math.tanh %231 : vector<16x32xf32>
    %233 = arith.addf %204, %232 : vector<16x32xf32>
    %c1112 = arith.constant 1112 : index
    %c0_99 = arith.constant 0 : index
    %234 = vector.load %arg1[%c1112, %c0_99] : memref<2176x128xf32, #tpu.memory_space<vmem>>, vector<1x32xf32>
    %c1120 = arith.constant 1120 : index
    %c0_100 = arith.constant 0 : index
    %235 = vector.load %arg1[%c1120, %c0_100] : memref<2176x128xf32, #tpu.memory_space<vmem>>, vector<1x32xf32>
    %cst_101 = arith.constant dense<0.000000e+00> : vector<16xf32>
    %236 = vector.multi_reduction <add>, %233, %cst_101 [1] : vector<16x32xf32> to vector<16xf32>
    %237 = vector.shape_cast %236 : vector<16xf32> to vector<16x1xf32>
    %cst_102 = arith.constant 3.200000e+01 : f32
    %238 = vector.broadcast %cst_102 : f32 to vector<16x1xf32>
    %239 = arith.divf %237, %238 : vector<16x1xf32>
    %240 = vector.broadcast %239 : vector<16x1xf32> to vector<16x32xf32>
    %241 = arith.subf %233, %240 : vector<16x32xf32>
    %242 = arith.mulf %241, %241 : vector<16x32xf32>
    %cst_103 = arith.constant dense<0.000000e+00> : vector<16xf32>
    %243 = vector.multi_reduction <add>, %242, %cst_103 [1] : vector<16x32xf32> to vector<16xf32>
    %244 = vector.shape_cast %243 : vector<16xf32> to vector<16x1xf32>
    %cst_104 = arith.constant 3.200000e+01 : f32
    %245 = vector.broadcast %cst_104 : f32 to vector<16x1xf32>
    %246 = arith.divf %244, %245 : vector<16x1xf32>
    %cst_105 = arith.constant 9.99999974E-6 : f32
    %247 = vector.broadcast %cst_105 : f32 to vector<16x1xf32>
    %248 = arith.addf %246, %247 : vector<16x1xf32>
    %249 = math.rsqrt %248 : vector<16x1xf32>
    %250 = vector.broadcast %249 : vector<16x1xf32> to vector<16x32xf32>
    %251 = arith.mulf %241, %250 : vector<16x32xf32>
    %252 = vector.broadcast %234 : vector<1x32xf32> to vector<16x32xf32>
    %253 = arith.mulf %251, %252 : vector<16x32xf32>
    %254 = vector.broadcast %235 : vector<1x32xf32> to vector<16x32xf32>
    %255 = arith.addf %253, %254 : vector<16x32xf32>
    %c1128 = arith.constant 1128 : index
    %c0_106 = arith.constant 0 : index
    %256 = vector.load %arg1[%c1128, %c0_106] : memref<2176x128xf32, #tpu.memory_space<vmem>>, vector<32x32xf32>
    %cst_107 = arith.constant dense<0.000000e+00> : vector<16x32xf32>
    %257 = tpu.matmul %255, %256, %cst_107 {dimension_numbers = #tpu.dot_dimension_numbers<[1], [0], [0], [1], [0, 0, 1, 1], [], []>} : vector<16x32xf32>, vector<32x32xf32>, vector<16x32xf32> -> vector<16x32xf32>
    %c1160 = arith.constant 1160 : index
    %c0_108 = arith.constant 0 : index
    %258 = vector.load %arg1[%c1160, %c0_108] : memref<2176x128xf32, #tpu.memory_space<vmem>>, vector<1x32xf32>
    %259 = vector.broadcast %258 : vector<1x32xf32> to vector<16x32xf32>
    %260 = arith.addf %257, %259 : vector<16x32xf32>
    %261 = math.tanh %260 : vector<16x32xf32>
    %c1168 = arith.constant 1168 : index
    %c0_109 = arith.constant 0 : index
    %262 = vector.load %arg1[%c1168, %c0_109] : memref<2176x128xf32, #tpu.memory_space<vmem>>, vector<32x32xf32>
    %cst_110 = arith.constant dense<0.000000e+00> : vector<16x32xf32>
    %263 = tpu.matmul %261, %262, %cst_110 {dimension_numbers = #tpu.dot_dimension_numbers<[1], [0], [0], [1], [0, 0, 1, 1], [], []>} : vector<16x32xf32>, vector<32x32xf32>, vector<16x32xf32> -> vector<16x32xf32>
    %c1200 = arith.constant 1200 : index
    %c0_111 = arith.constant 0 : index
    %264 = vector.load %arg1[%c1200, %c0_111] : memref<2176x128xf32, #tpu.memory_space<vmem>>, vector<1x32xf32>
    %265 = vector.broadcast %264 : vector<1x32xf32> to vector<16x32xf32>
    %266 = arith.addf %263, %265 : vector<16x32xf32>
    %267 = arith.addf %233, %266 : vector<16x32xf32>
    %c1208 = arith.constant 1208 : index
    %c0_112 = arith.constant 0 : index
    %268 = vector.load %arg1[%c1208, %c0_112] : memref<2176x128xf32, #tpu.memory_space<vmem>>, vector<32x8xf32>
    %cst_113 = arith.constant dense<0.000000e+00> : vector<16x8xf32>
    %269 = tpu.matmul %267, %268, %cst_113 {dimension_numbers = #tpu.dot_dimension_numbers<[1], [0], [0], [1], [0, 0, 1, 1], [], []>} : vector<16x32xf32>, vector<32x8xf32>, vector<16x8xf32> -> vector<16x8xf32>
    %c1240 = arith.constant 1240 : index
    %c0_114 = arith.constant 0 : index
    %270 = vector.load %arg1[%c1240, %c0_114] : memref<2176x128xf32, #tpu.memory_space<vmem>>, vector<1x8xf32>
    %271 = vector.broadcast %270 : vector<1x8xf32> to vector<16x8xf32>
    %272 = arith.addf %269, %271 : vector<16x8xf32>
    %c1248 = arith.constant 1248 : index
    %c0_115 = arith.constant 0 : index
    %273 = vector.load %arg1[%c1248, %c0_115] : memref<2176x128xf32, #tpu.memory_space<vmem>>, vector<64x16xf32>
    %cst_116 = arith.constant dense<0.000000e+00> : vector<64x32xf32>
    %274 = tpu.matmul %273, %267, %cst_116 {dimension_numbers = #tpu.dot_dimension_numbers<[1], [0], [0], [1], [0, 0, 1, 1], [], []>} : vector<64x16xf32>, vector<16x32xf32>, vector<64x32xf32> -> vector<64x32xf32>
    %c1312 = arith.constant 1312 : index
    %c0_117 = arith.constant 0 : index
    %275 = vector.load %arg1[%c1312, %c0_117] : memref<2176x128xf32, #tpu.memory_space<vmem>>, vector<32x128xf32>
    %cst_118 = arith.constant dense<0.000000e+00> : vector<64x128xf32>
    %276 = tpu.matmul %274, %275, %cst_118 {dimension_numbers = #tpu.dot_dimension_numbers<[1], [0], [0], [1], [0, 0, 1, 1], [], []>} : vector<64x32xf32>, vector<32x128xf32>, vector<64x128xf32> -> vector<64x128xf32>
    %c1344 = arith.constant 1344 : index
    %c0_119 = arith.constant 0 : index
    %277 = vector.load %arg1[%c1344, %c0_119] : memref<2176x128xf32, #tpu.memory_space<vmem>>, vector<64x128xf32>
    %278 = arith.mulf %276, %277 : vector<64x128xf32>
    %c1408 = arith.constant 1408 : index
    %c0_120 = arith.constant 0 : index
    %279 = vector.load %arg1[%c1408, %c0_120] : memref<2176x128xf32, #tpu.memory_space<vmem>>, vector<128x8xf32>
    %cst_121 = arith.constant dense<0.000000e+00> : vector<64x8xf32>
    %280 = tpu.matmul %278, %279, %cst_121 {dimension_numbers = #tpu.dot_dimension_numbers<[1], [0], [0], [1], [0, 0, 1, 1], [], []>} : vector<64x128xf32>, vector<128x8xf32>, vector<64x8xf32> -> vector<64x8xf32>
    %c1536 = arith.constant 1536 : index
    %c0_122 = arith.constant 0 : index
    %281 = vector.load %arg1[%c1536, %c0_122] : memref<2176x128xf32, #tpu.memory_space<vmem>>, vector<64x8xf32>
    %282 = arith.addf %280, %281 : vector<64x8xf32>
    %c1600 = arith.constant 1600 : index
    %c0_123 = arith.constant 0 : index
    %283 = vector.load %arg1[%c1600, %c0_123] : memref<2176x128xf32, #tpu.memory_space<vmem>>, vector<128x8xf32>
    %cst_124 = arith.constant dense<0.000000e+00> : vector<64x8xf32>
    %284 = tpu.matmul %278, %283, %cst_124 {dimension_numbers = #tpu.dot_dimension_numbers<[1], [0], [0], [1], [0, 0, 1, 1], [], []>} : vector<64x128xf32>, vector<128x8xf32>, vector<64x8xf32> -> vector<64x8xf32>
    %c1728 = arith.constant 1728 : index
    %c0_125 = arith.constant 0 : index
    %285 = vector.load %arg1[%c1728, %c0_125] : memref<2176x128xf32, #tpu.memory_space<vmem>>, vector<64x8xf32>
    %286 = arith.addf %284, %285 : vector<64x8xf32>
    %cst_126 = arith.constant dense<0.000000e+00> : vector<64x64xf32>
    %287 = tpu.matmul %282, %286, %cst_126 {dimension_numbers = #tpu.dot_dimension_numbers<[1], [1], [0], [0], [0, 0, 1, 0], [], []>} : vector<64x8xf32>, vector<64x8xf32>, vector<64x64xf32> -> vector<64x64xf32>
    %cst_127 = arith.constant 0.353553385 : f32
    %288 = vector.broadcast %cst_127 : f32 to vector<64x64xf32>
    %289 = arith.mulf %287, %288 : vector<64x64xf32>
    %c1792 = arith.constant 1792 : index
    %c0_128 = arith.constant 0 : index
    %290 = vector.load %arg1[%c1792, %c0_128] : memref<2176x128xf32, #tpu.memory_space<vmem>>, vector<64x64xf32>
    %291 = arith.addf %289, %290 : vector<64x64xf32>
    %cst_129 = arith.constant dense<0xFF800000> : vector<64xf32>
    %292 = vector.multi_reduction <maximumf>, %291, %cst_129 [1] : vector<64x64xf32> to vector<64xf32>
    %293 = vector.shape_cast %292 : vector<64xf32> to vector<64x1xf32>
    %294 = vector.broadcast %293 : vector<64x1xf32> to vector<64x64xf32>
    %295 = arith.subf %291, %294 : vector<64x64xf32>
    %296 = math.exp %295 : vector<64x64xf32>
    %cst_130 = arith.constant dense<0.000000e+00> : vector<64xf32>
    %297 = vector.multi_reduction <add>, %296, %cst_130 [1] : vector<64x64xf32> to vector<64xf32>
    %298 = vector.shape_cast %297 : vector<64xf32> to vector<64x1xf32>
    %299 = vector.broadcast %298 : vector<64x1xf32> to vector<64x64xf32>
    %300 = arith.divf %296, %299 : vector<64x64xf32>
    %cst_131 = arith.constant dense<0.000000e+00> : vector<64x8xf32>
    %301 = tpu.matmul %273, %272, %cst_131 {dimension_numbers = #tpu.dot_dimension_numbers<[1], [0], [0], [1], [0, 0, 1, 1], [], []>} : vector<64x16xf32>, vector<16x8xf32>, vector<64x8xf32> -> vector<64x8xf32>
    %cst_132 = arith.constant dense<0.000000e+00> : vector<64x8xf32>
    %302 = tpu.matmul %300, %301, %cst_132 {dimension_numbers = #tpu.dot_dimension_numbers<[1], [0], [0], [1], [0, 0, 1, 1], [], []>} : vector<64x64xf32>, vector<64x8xf32>, vector<64x8xf32> -> vector<64x8xf32>
    %c1856 = arith.constant 1856 : index
    %c0_133 = arith.constant 0 : index
    %303 = vector.load %arg1[%c1856, %c0_133] : memref<2176x128xf32, #tpu.memory_space<vmem>>, vector<16x64xf32>
    %cst_134 = arith.constant dense<0.000000e+00> : vector<16x8xf32>
    %304 = tpu.matmul %303, %302, %cst_134 {dimension_numbers = #tpu.dot_dimension_numbers<[1], [0], [0], [1], [0, 0, 1, 1], [], []>} : vector<16x64xf32>, vector<64x8xf32>, vector<16x8xf32> -> vector<16x8xf32>
    %c1872 = arith.constant 1872 : index
    %c0_135 = arith.constant 0 : index
    %305 = vector.load %arg1[%c1872, %c0_135] : memref<2176x128xf32, #tpu.memory_space<vmem>>, vector<8x32xf32>
    %cst_136 = arith.constant dense<0.000000e+00> : vector<16x32xf32>
    %306 = tpu.matmul %304, %305, %cst_136 {dimension_numbers = #tpu.dot_dimension_numbers<[1], [0], [0], [1], [0, 0, 1, 1], [], []>} : vector<16x8xf32>, vector<8x32xf32>, vector<16x32xf32> -> vector<16x32xf32>
    %c1880 = arith.constant 1880 : index
    %c0_137 = arith.constant 0 : index
    %307 = vector.load %arg1[%c1880, %c0_137] : memref<2176x128xf32, #tpu.memory_space<vmem>>, vector<1x32xf32>
    %308 = vector.broadcast %307 : vector<1x32xf32> to vector<16x32xf32>
    %309 = arith.addf %306, %308 : vector<16x32xf32>
    %c1888 = arith.constant 1888 : index
    %c0_138 = arith.constant 0 : index
    %310 = vector.load %arg1[%c1888, %c0_138] : memref<2176x128xf32, #tpu.memory_space<vmem>>, vector<32x32xf32>
    %cst_139 = arith.constant dense<0.000000e+00> : vector<16x32xf32>
    %311 = tpu.matmul %309, %310, %cst_139 {dimension_numbers = #tpu.dot_dimension_numbers<[1], [0], [0], [1], [0, 0, 1, 1], [], []>} : vector<16x32xf32>, vector<32x32xf32>, vector<16x32xf32> -> vector<16x32xf32>
    %c1920 = arith.constant 1920 : index
    %c0_140 = arith.constant 0 : index
    %312 = vector.load %arg1[%c1920, %c0_140] : memref<2176x128xf32, #tpu.memory_space<vmem>>, vector<1x32xf32>
    %313 = vector.broadcast %312 : vector<1x32xf32> to vector<16x32xf32>
    %314 = arith.addf %311, %313 : vector<16x32xf32>
    %c1928 = arith.constant 1928 : index
    %c0_141 = arith.constant 0 : index
    %315 = vector.load %arg1[%c1928, %c0_141] : memref<2176x128xf32, #tpu.memory_space<vmem>>, vector<32x32xf32>
    %cst_142 = arith.constant dense<0.000000e+00> : vector<16x32xf32>
    %316 = tpu.matmul %309, %315, %cst_142 {dimension_numbers = #tpu.dot_dimension_numbers<[1], [0], [0], [1], [0, 0, 1, 1], [], []>} : vector<16x32xf32>, vector<32x32xf32>, vector<16x32xf32> -> vector<16x32xf32>
    %c1960 = arith.constant 1960 : index
    %c0_143 = arith.constant 0 : index
    %317 = vector.load %arg1[%c1960, %c0_143] : memref<2176x128xf32, #tpu.memory_space<vmem>>, vector<1x32xf32>
    %318 = vector.broadcast %317 : vector<1x32xf32> to vector<16x32xf32>
    %319 = arith.addf %316, %318 : vector<16x32xf32>
    %cst_144 = arith.constant 0.000000e+00 : f32
    %320 = vector.broadcast %cst_144 : f32 to vector<16x32xf32>
    %321 = arith.subf %320, %319 : vector<16x32xf32>
    %322 = math.exp %321 : vector<16x32xf32>
    %cst_145 = arith.constant 1.000000e+00 : f32
    %323 = vector.broadcast %cst_145 : f32 to vector<16x32xf32>
    %324 = arith.addf %323, %322 : vector<16x32xf32>
    %cst_146 = arith.constant 1.000000e+00 : f32
    %325 = vector.broadcast %cst_146 : f32 to vector<16x32xf32>
    %326 = arith.divf %325, %324 : vector<16x32xf32>
    %327 = arith.mulf %314, %326 : vector<16x32xf32>
    %328 = arith.addf %327, %267 : vector<16x32xf32>
    %c1968 = arith.constant 1968 : index
    %c0_147 = arith.constant 0 : index
    %329 = vector.load %arg1[%c1968, %c0_147] : memref<2176x128xf32, #tpu.memory_space<vmem>>, vector<1x32xf32>
    %c1976 = arith.constant 1976 : index
    %c0_148 = arith.constant 0 : index
    %330 = vector.load %arg1[%c1976, %c0_148] : memref<2176x128xf32, #tpu.memory_space<vmem>>, vector<1x32xf32>
    %cst_149 = arith.constant dense<0.000000e+00> : vector<16xf32>
    %331 = vector.multi_reduction <add>, %328, %cst_149 [1] : vector<16x32xf32> to vector<16xf32>
    %332 = vector.shape_cast %331 : vector<16xf32> to vector<16x1xf32>
    %cst_150 = arith.constant 3.200000e+01 : f32
    %333 = vector.broadcast %cst_150 : f32 to vector<16x1xf32>
    %334 = arith.divf %332, %333 : vector<16x1xf32>
    %335 = vector.broadcast %334 : vector<16x1xf32> to vector<16x32xf32>
    %336 = arith.subf %328, %335 : vector<16x32xf32>
    %337 = arith.mulf %336, %336 : vector<16x32xf32>
    %cst_151 = arith.constant dense<0.000000e+00> : vector<16xf32>
    %338 = vector.multi_reduction <add>, %337, %cst_151 [1] : vector<16x32xf32> to vector<16xf32>
    %339 = vector.shape_cast %338 : vector<16xf32> to vector<16x1xf32>
    %cst_152 = arith.constant 3.200000e+01 : f32
    %340 = vector.broadcast %cst_152 : f32 to vector<16x1xf32>
    %341 = arith.divf %339, %340 : vector<16x1xf32>
    %cst_153 = arith.constant 9.99999974E-6 : f32
    %342 = vector.broadcast %cst_153 : f32 to vector<16x1xf32>
    %343 = arith.addf %341, %342 : vector<16x1xf32>
    %344 = math.rsqrt %343 : vector<16x1xf32>
    %345 = vector.broadcast %344 : vector<16x1xf32> to vector<16x32xf32>
    %346 = arith.mulf %336, %345 : vector<16x32xf32>
    %347 = vector.broadcast %329 : vector<1x32xf32> to vector<16x32xf32>
    %348 = arith.mulf %346, %347 : vector<16x32xf32>
    %349 = vector.broadcast %330 : vector<1x32xf32> to vector<16x32xf32>
    %350 = arith.addf %348, %349 : vector<16x32xf32>
    %351 = vector.extract_strided_slice %350 {offsets = [0, 0], sizes = [8, 32], strides = [1, 1]} : vector<16x32xf32> to vector<8x32xf32>
    %352 = vector.extract_strided_slice %350 {offsets = [8, 0], sizes = [8, 32], strides = [1, 1]} : vector<16x32xf32> to vector<8x32xf32>
    %353 = tpu.concatenate %351, %352 in 1 : vector<8x32xf32>, vector<8x32xf32> -> vector<8x64xf32>
    %c2144 = arith.constant 2144 : index
    %c0_154 = arith.constant 0 : index
    %354 = vector.load %arg1[%c2144, %c0_154] : memref<2176x128xf32, #tpu.memory_space<vmem>>, vector<12x6xf32>
    %c1984 = arith.constant 1984 : index
    %c0_155 = arith.constant 0 : index
    %355 = vector.load %arg1[%c1984, %c0_155] : memref<2176x128xf32, #tpu.memory_space<vmem>>, vector<48x8xf32>
    %cst_156 = arith.constant dense<0.000000e+00> : vector<48x64xf32>
    %356 = tpu.matmul %355, %353, %cst_156 {dimension_numbers = #tpu.dot_dimension_numbers<[1], [0], [0], [1], [0, 0, 1, 1], [], []>} : vector<48x8xf32>, vector<8x64xf32>, vector<48x64xf32> -> vector<48x64xf32>
    %c2032 = arith.constant 2032 : index
    %c0_157 = arith.constant 0 : index
    %357 = vector.load %arg1[%c2032, %c0_157] : memref<2176x128xf32, #tpu.memory_space<vmem>>, vector<48x1xf32>
    %358 = vector.broadcast %357 : vector<48x1xf32> to vector<48x64xf32>
    %359 = arith.addf %356, %358 : vector<48x64xf32>
    %cst_158 = arith.constant 0.000000e+00 : f32
    %360 = vector.broadcast %cst_158 : f32 to vector<48x64xf32>
    %361 = arith.cmpf ogt, %359, %360 : vector<48x64xf32>
    %362 = math.exp %359 : vector<48x64xf32>
    %cst_159 = arith.constant 1.000000e+00 : f32
    %363 = vector.broadcast %cst_159 : f32 to vector<48x64xf32>
    %364 = arith.subf %362, %363 : vector<48x64xf32>
    %365 = arith.select %361, %359, %364 : vector<48x64xi1>, vector<48x64xf32>
    %c2080 = arith.constant 2080 : index
    %c0_160 = arith.constant 0 : index
    %366 = vector.load %arg1[%c2080, %c0_160] : memref<2176x128xf32, #tpu.memory_space<vmem>>, vector<12x48xf32>
    %cst_161 = arith.constant dense<0.000000e+00> : vector<12x64xf32>
    %367 = tpu.matmul %366, %365, %cst_161 {dimension_numbers = #tpu.dot_dimension_numbers<[1], [0], [0], [1], [0, 0, 1, 1], [], []>} : vector<12x48xf32>, vector<48x64xf32>, vector<12x64xf32> -> vector<12x64xf32>
    %368 = vector.extract_strided_slice %354 {offsets = [0, 0], sizes = [12, 1], strides = [1, 1]} : vector<12x6xf32> to vector<12x1xf32>
    %369 = vector.broadcast %368 : vector<12x1xf32> to vector<12x64xf32>
    %370 = arith.addf %367, %369 : vector<12x64xf32>
    %c2096 = arith.constant 2096 : index
    %c0_162 = arith.constant 0 : index
    %371 = vector.load %arg1[%c2096, %c0_162] : memref<2176x128xf32, #tpu.memory_space<vmem>>, vector<12x8xf32>
    %cst_163 = arith.constant dense<0.000000e+00> : vector<12x64xf32>
    %372 = tpu.matmul %371, %353, %cst_163 {dimension_numbers = #tpu.dot_dimension_numbers<[1], [0], [0], [1], [0, 0, 1, 1], [], []>} : vector<12x8xf32>, vector<8x64xf32>, vector<12x64xf32> -> vector<12x64xf32>
    %373 = vector.extract_strided_slice %354 {offsets = [0, 1], sizes = [12, 1], strides = [1, 1]} : vector<12x6xf32> to vector<12x1xf32>
    %374 = vector.broadcast %373 : vector<12x1xf32> to vector<12x64xf32>
    %375 = arith.addf %372, %374 : vector<12x64xf32>
    %c2112 = arith.constant 2112 : index
    %c0_164 = arith.constant 0 : index
    %376 = vector.load %arg1[%c2112, %c0_164] : memref<2176x128xf32, #tpu.memory_space<vmem>>, vector<12x12xf32>
    %cst_165 = arith.constant dense<0.000000e+00> : vector<12x64xf32>
    %377 = tpu.matmul %376, %370, %cst_165 {dimension_numbers = #tpu.dot_dimension_numbers<[1], [0], [0], [1], [0, 0, 1, 1], [], []>} : vector<12x12xf32>, vector<12x64xf32>, vector<12x64xf32> -> vector<12x64xf32>
    %378 = vector.extract_strided_slice %354 {offsets = [0, 2], sizes = [12, 1], strides = [1, 1]} : vector<12x6xf32> to vector<12x1xf32>
    %379 = vector.broadcast %378 : vector<12x1xf32> to vector<12x64xf32>
    %380 = arith.addf %377, %379 : vector<12x64xf32>
    %c2128 = arith.constant 2128 : index
    %c0_166 = arith.constant 0 : index
    %381 = vector.load %arg1[%c2128, %c0_166] : memref<2176x128xf32, #tpu.memory_space<vmem>>, vector<12x12xf32>
    %cst_167 = arith.constant dense<0.000000e+00> : vector<12x64xf32>
    %382 = tpu.matmul %381, %370, %cst_167 {dimension_numbers = #tpu.dot_dimension_numbers<[1], [0], [0], [1], [0, 0, 1, 1], [], []>} : vector<12x12xf32>, vector<12x64xf32>, vector<12x64xf32> -> vector<12x64xf32>
    %383 = vector.extract_strided_slice %354 {offsets = [0, 3], sizes = [12, 1], strides = [1, 1]} : vector<12x6xf32> to vector<12x1xf32>
    %384 = vector.broadcast %383 : vector<12x1xf32> to vector<12x64xf32>
    %385 = arith.addf %382, %384 : vector<12x64xf32>
    %cst_168 = arith.constant 0.000000e+00 : f32
    %386 = vector.broadcast %cst_168 : f32 to vector<12x64xf32>
    %387 = arith.subf %386, %385 : vector<12x64xf32>
    %388 = math.exp %387 : vector<12x64xf32>
    %cst_169 = arith.constant 1.000000e+00 : f32
    %389 = vector.broadcast %cst_169 : f32 to vector<12x64xf32>
    %390 = arith.addf %389, %388 : vector<12x64xf32>
    %cst_170 = arith.constant 1.000000e+00 : f32
    %391 = vector.broadcast %cst_170 : f32 to vector<12x64xf32>
    %392 = arith.divf %391, %390 : vector<12x64xf32>
    %393 = arith.mulf %380, %392 : vector<12x64xf32>
    %394 = arith.addf %393, %375 : vector<12x64xf32>
    %c2160 = arith.constant 2160 : index
    %c0_171 = arith.constant 0 : index
    %395 = vector.load %arg1[%c2160, %c0_171] : memref<2176x128xf32, #tpu.memory_space<vmem>>, vector<12x12xf32>
    %cst_172 = arith.constant dense<0.000000e+00> : vector<12x64xf32>
    %396 = tpu.matmul %395, %394, %cst_172 {dimension_numbers = #tpu.dot_dimension_numbers<[1], [0], [0], [1], [0, 0, 1, 1], [], []>} : vector<12x12xf32>, vector<12x64xf32>, vector<12x64xf32> -> vector<12x64xf32>
    %397 = arith.subf %394, %396 : vector<12x64xf32>
    %398 = arith.mulf %397, %397 : vector<12x64xf32>
    %cst_173 = arith.constant dense<0.000000e+00> : vector<12x64xf32>
    %399 = tpu.matmul %395, %398, %cst_173 {dimension_numbers = #tpu.dot_dimension_numbers<[1], [0], [0], [1], [0, 0, 1, 1], [], []>} : vector<12x12xf32>, vector<12x64xf32>, vector<12x64xf32> -> vector<12x64xf32>
    %cst_174 = arith.constant 9.99999974E-6 : f32
    %400 = vector.broadcast %cst_174 : f32 to vector<12x64xf32>
    %401 = arith.addf %399, %400 : vector<12x64xf32>
    %402 = math.rsqrt %401 : vector<12x64xf32>
    %403 = arith.mulf %397, %402 : vector<12x64xf32>
    %404 = vector.extract_strided_slice %354 {offsets = [0, 4], sizes = [12, 1], strides = [1, 1]} : vector<12x6xf32> to vector<12x1xf32>
    %405 = vector.broadcast %404 : vector<12x1xf32> to vector<12x64xf32>
    %406 = arith.mulf %403, %405 : vector<12x64xf32>
    %407 = vector.extract_strided_slice %354 {offsets = [0, 5], sizes = [12, 1], strides = [1, 1]} : vector<12x6xf32> to vector<12x1xf32>
    %408 = vector.broadcast %407 : vector<12x1xf32> to vector<12x64xf32>
    %409 = arith.addf %406, %408 : vector<12x64xf32>
    %c0_175 = arith.constant 0 : index
    %c0_176 = arith.constant 0 : index
    %410 = vector.load %arg2[%c0_175, %c0_176] : memref<12x64xf32, #tpu.memory_space<vmem>>, vector<12x64xf32>
    tpu.vector_store %arg2[%c0_175, %c0_176], %409 {strides = array<i32>} : memref<12x64xf32, #tpu.memory_space<vmem>>, vector<12x64xf32>,
    return
  }
}

</mosaic_0001>

<bundles_post_ra>
// kernel: squeeze.6
= control target key start
LH: loop header
LB: loop body
LE: loop exit
PB: predicated region body
PF: predicated region fallthrough
CT: control target
= control target key end

     0   :  { %s90_s0 = inlined_call_operand.vmem [shape: f32[2,64], index: 0, kind: input, shape index: {}]   ;;  %s91_s1 = inlined_call_operand.hbm [shape: f32[2,2,32], index: 1, kind: output, shape index: {}]  }
   0x1   :  { %v5_v0 = vld [vmem:[%s90_s0] sm:$0x3] }
   0x2   :  { %2 = vsyncpa [#allocation1], 0  ;;  %6 = vst [vmem:[#allocation3] sm:$0x3] %v5_v0  ;;  %vm8_vm0 = vcmask 261120   ;;  %s63_s0 = smov 96  }
   0x3   :  { %s64_s8 = smov [#allocation0]  }
   0x4   :  { %s31_s9 = sshll.u32 %s64_s8, 4  ;;  %s32_s9 = int_to_ptr.vmem [resolvable:$true] %s31_s9 }
   0x5   :  { %s39_s10 = scalar_lea.vmem %s32_s9, 64  ;;  %p44_p1 = scmp.lt.s32.totalorder %s32_s9, %s32_s9 }
   0x6   :  { %p40_p0 = scmp.ne.s32.totalorder %s32_s9, %s39_s10  ;;  %p45_p2 = scmp.lt.s32.totalorder %s39_s10, %s39_s10 }
   0x8   :  { %p46_p3 = por %p45_p2, %p44_p1 }
   0x9   :  { %v10_v1 = vld [vmem:[#allocation3] sm:$0x3]  }
   0xa   :  { %v7_v2 = vld [vmem:[#allocation3] sm:$0x3]   ;;  %11 = vrot.lane.b32.xlu0 %v10_v1, %s63_s0  ;;  %p47_p4 = pnand %p46_p3, %p40_p0 }
   0xb   :  { %9 = vst.msk [vmem:[#allocation2] ss:$8 sm:$0x3] %vm8_vm0, %v7_v2  }
  0x7c   :  { %v12_v3 = vpop.permute.xlu0 %11  }
  0x7d   :  { %15 = vst.msk [vmem:[#allocation2 + $0x1] ss:$8 sm:$0x3] %vm8_vm0, %v12_v3  }
  0x84   :  { %v19_v4 = vld [vmem:[#allocation2] sm:$0x3]  ;;  %v23_v5 = vld [vmem:[#allocation2 + $0x8] sm:$0x3] }
  0x85   :  { %21 = vst [vmem:[#allocation0] sm:$0x3] %v19_v4  ;;  %26 = vst [vmem:[#allocation0 + $0x2] sm:$0x3] %v23_v5 }
  0x86   :  { %50 = shalt.err (!%p47_p4)
}
  0x87   :  { %s51_s13 = scalar_lea.hbm %s91_s1, 64 }
  0x88   :  { %p52_p5 = scmp.ne.s32.totalorder %s91_s1, %s51_s13  ;;  %p55_p6 = scmp.lt.u32.totalorder %s51_s13, %s91_s1 }
  0x8a   :  { %p57_p7 = pnand %p55_p6, %p52_p5 }
  0x8c   :  { %60 = shalt.err (!%p57_p7)
}
  0x8d   :  { %34 = dma.vmem_to_hbm [thread:$0]  %s32_s9, 64, %s91_s1, [#allocation1]  }
  0x8e   :  { %61 = dma.done.wait [#allocation1], 64  }
  0x8f   :  { %62 = vsyncadd [#allocation1], 4294967232 }
  0x90   :  { %36 = vsyncpa [#allocation1], 1 }

// kernel: forward.1
= control target key start
LH: loop header
LB: loop body
LE: loop exit
PB: predicated region body
PF: predicated region fallthrough
CT: control target
= control target key end

     0   :  { %7 = vsyncpa [#allocation3], 0  ;;  %s6460_s9 = smov [#allocation2]   ;;  %s6843_s0 = inlined_call_operand.vmem [shape: f32[16,4], index: 0, kind: input, shape index: {}]   ;;  %s6844_s1 = inlined_call_operand.hbm [shape: f32[2176,128], index: 1, kind: input, shape index: {}]   ;;  %s6845_s2 = inlined_call_operand.vmem [shape: f32[12,64], index: 2, kind: output, shape index: {}]  }
   0x1   :  { %s15_s10 = sshll.u32 %s6460_s9, 4  ;;  %s6436_s13 = scalar_lea.hbm %s6844_s1, 34816  ;;  %s16_s10 = int_to_ptr.vmem [resolvable:$true] %s15_s10 }
   0x2   :  { %p6437_p0 = scmp.ne.s32.totalorder %s6844_s1, %s6436_s13  ;;  %p6440_p1 = scmp.lt.u32.totalorder %s6436_s13, %s6844_s1 }
   0x4   :  { %p6442_p2 = pnand %p6440_p1, %p6437_p0 }
   0x6   :  { %6445 = shalt.err (!%p6442_p2)
}
   0x7   :  { %s6446_s18 = scalar_lea.vmem %s16_s10, 34816  ;;  %p6451_p4 = scmp.lt.s32.totalorder %s16_s10, %s16_s10 }
   0x8   :  { %p6447_p3 = scmp.ne.s32.totalorder %s16_s10, %s6446_s18  ;;  %p6452_p5 = scmp.lt.s32.totalorder %s6446_s18, %s6446_s18 }
   0xa   :  { %p6453_p6 = por %p6452_p5, %p6451_p4 }
   0xc   :  { %p6454_p7 = pnand %p6453_p6, %p6447_p3 }
   0xe   :  { %6457 = shalt.err (!%p6454_p7)
}
   0xf   :  { %s6461_s19 = smov 128   ;;  %s6462_s20 = smov 8  }
  0x10   :  { %21 = dma.hbm_to_vmem [thread:$0]  %s6844_s1, 34816, %s16_s10, [#allocation3], %s6461_s19, %s6461_s19, %s6462_s20  }
  0x11   :  { %6458 = dma.done.wait [#allocation3], 34816  }
  0x12   :  { %6459 = vsyncadd [#allocation3], 4294932480  ;;  %vm40_vm0 = vcmask 1043456   ;;  %vm33_vm1 = vcmask 31744   ;;  %v27_v0 = vld [vmem:[#allocation2] sm:$0xf] }
  0x13   :  { %v25_v1 = vld [vmem:[%s6843_s0] sm:$0xff]  ;;  %v26_v2 = vld [vmem:[%s6843_s0 + $0x8] sm:$0xff]  ;;  %5217 = vmatprep.subr.msk.mxu0 %vm40_vm0, %v27_v0  ;;  %v119_v3 = vld [vmem:[#allocation2 + $0x10] sm:$0xff]  ;;  %vm132_vm2 = vcmask 523264   ;;  %vm1665_vm7 = vcmask 261120   ;;  %vm1719_vm8 = vcmask 130048  }
  0x14   :  { %5219 = vmatprep.mubr.msk.f32.mxu0 %vm33_vm1, %v25_v1  ;;  %v120_v4 = vld [vmem:[#allocation2 + $0x18] sm:$0xff]  ;;  %5218 = vmatpush3.msk.msra.mxu0 %vm40_vm0, %v27_v0  ;;  %v215_v7 = vld [vmem:[#allocation2 + $0x60] sm:$0xff]  ;;  %v122_v9 = vld [vmem:[#allocation2 + $0x28] sm:$0xff]  ;;  %vm3026_vm9 = vcmask 64512   ;;  %s6464_s0 = smov 32   ;;  %vm4130_vm11 = vcmask 392192  }
  0x15   :  { %v214_v5 = vld [vmem:[#allocation2 + $0x58] sm:$0xff]  ;;  %v5846_v6 = vpack.c.bf16 %v120_v4, %v119_v3  ;;  %v121_v8 = vld [vmem:[#allocation2 + $0x20] sm:$0xff]  ;;  %5220 = vmatmul.mubr.msk.f32.vlgmr.msra.gmra.mrb[0].mxu0 %vm33_vm1, %v26_v2  ;;  %v216_v12 = vld [vmem:[#allocation2 + $0x68] sm:$0xff] }
  0x16   :  { %v5862_v10 = vpack.c.bf16 %v215_v7, %v214_v5  ;;  %v5850_v11 = vpack.c.bf16 %v122_v9, %v121_v8  ;;  %v217_v13 = vld [vmem:[#allocation2 + $0x70] sm:$0xff]  ;;  %v124_v16 = vld [vmem:[#allocation2 + $0x38] sm:$0xff]  ;;  %v219_v18 = vld [vmem:[#allocation2 + $0x80] sm:$0xff] }
  0x17   :  { %v123_v14 = vld [vmem:[#allocation2 + $0x30] sm:$0xff]  ;;  %5847 = vmatprep.subr.bf16.mxu1 %v5846_v6  ;;  %v5866_v15 = vpack.c.bf16 %v217_v13, %v216_v12  ;;  %v218_v17 = vld [vmem:[#allocation2 + $0x78] sm:$0xff]  ;;  %v125_v21 = vld [vmem:[#allocation2 + $0x40] sm:$0xff] }
  0x18   :  { %5863 = vmatprep.subr.bf16.mxu0 %v5862_v10  ;;  %5849 = vmatpush3.bf16.msra.mxu1 %v5846_v6  ;;  %v5854_v19 = vpack.c.bf16 %v124_v16, %v123_v14  ;;  %v5870_v20 = vpack.c.bf16 %v219_v18, %v218_v17  ;;  %v126_v22 = vld [vmem:[#allocation2 + $0x48] sm:$0xff]  ;;  %v221_v25 = vld [vmem:[#allocation2 + $0x90] sm:$0xff]  ;;  %v312_v32 = vld [vmem:[#allocation2 + $0xa0] sm:$0xff] }
  0x19   :  { %5865 = vmatpush3.bf16.msra.mxu0 %v5862_v10  ;;  %5851 = vmatprep.subr.bf16.mxu1 %v5850_v11  ;;  %v220_v23 = vld [vmem:[#allocation2 + $0x88] sm:$0xff]  ;;  %v5858_v24 = vpack.c.bf16 %v126_v22, %v125_v21  ;;  %v314_v35 = vld [vmem:[#allocation2 + $0xb0] sm:$0xff]  ;;  %v315_v36 = vld [vmem:[#allocation2 + $0xb8] sm:$0xff] }
  0x1a   :  { %5867 = vmatprep.subr.bf16.mxu0 %v5866_v15  ;;  %v5874_v26 = vpack.c.bf16 %v221_v25, %v220_v23  ;;  %v4705_v27 = vld [vmem:[#allocation2 + $0x8] ss:$0 sm:$0xff]  ;;  %v5882_v37 = vpack.c.bf16 %v315_v36, %v314_v35  ;;  %v316_v38 = vld [vmem:[#allocation2 + $0xc0] sm:$0xff]  ;;  %v318_v41 = vld [vmem:[#allocation2 + $0xd0] sm:$0xff] }
  0x1b   :  { %v313_v33 = vld [vmem:[#allocation2 + $0xa8] sm:$0xff]  ;;  %v319_v42 = vld [vmem:[#allocation2 + $0xd8] sm:$0xff]  ;;  %v748_v45 = vld [vmem:[#allocation2 + $0x120] sm:$0xff] }
  0x1c   :  { %5853 = vmatpush3.bf16.msra.mxu1 %v5850_v11  ;;  %v5878_v34 = vpack.c.bf16 %v313_v33, %v312_v32  ;;  %v317_v39 = vld [vmem:[#allocation2 + $0xc8] sm:$0xff]  ;;  %v5890_v43 = vpack.c.bf16 %v319_v42, %v318_v41  ;;  %v747_v44 = vld [vmem:[#allocation2 + $0x118] sm:$0xff]  ;;  %v750_v60 = vld [vmem:[#allocation2 + $0x130] sm:$0xff] }
  0x1d   :  { %5869 = vmatpush3.bf16.msra.mxu0 %v5866_v15  ;;  %5855 = vmatprep.subr.bf16.mxu1 %v5854_v19  ;;  %v5886_v40 = vpack.c.bf16 %v317_v39, %v316_v38  ;;  %v5910_v46 = vpack.c.bf16 %v748_v45, %v747_v44  ;;  %v4712_v47 = vld [vmem:[#allocation2 + $0x98] ss:$0 sm:$0xff]  ;;  %v749_v59 = vld [vmem:[#allocation2 + $0x128] sm:$0xff]  ;;  %v752_v2 = vld [vmem:[#allocation2 + $0x140] sm:$0xff] }
  0x1e   :  { %5871 = vmatprep.subr.bf16.mxu0 %v5870_v20  ;;  %v5914_v63 = vpack.c.bf16 %v750_v60, %v749_v59  ;;  %v751_v1 = vld [vmem:[#allocation2 + $0x138] sm:$0xff]  ;;  %v753_v4 = vld [vmem:[#allocation2 + $0x148] sm:$0xff]  ;;  %v754_v5 = vld [vmem:[#allocation2 + $0x150] sm:$0xff] }
  0x1f   :  { %v5918_v3 = vpack.c.bf16 %v752_v2, %v751_v1  ;;  %v5922_v6 = vpack.c.bf16 %v754_v5, %v753_v4  ;;  %v406_v7 = vld [vmem:[#allocation2 + $0xe8] sm:$0xf]  ;;  %v496_v8 = vld [vmem:[#allocation2 + $0xf8] sm:$0xf]  ;;  %v4717_v9 = vld [vmem:[#allocation2 + $0xe0] ss:$0 sm:$0xff] }
  0x20   :  { %5857 = vmatpush3.bf16.msra.mxu1 %v5854_v19  ;;  %v659_v11 = vld [vmem:[#allocation2 + $0x1a8] sm:$0xff]  ;;  %v660_v12 = vld [vmem:[#allocation2 + $0x1b0] sm:$0xff]  ;;  %v661_v17 = vld [vmem:[#allocation2 + $0x1b8] sm:$0xff] }
  0x21   :  { %5873 = vmatpush3.bf16.msra.mxu0 %v5870_v20  ;;  %5859 = vmatprep.subr.bf16.mxu1 %v5858_v24  ;;  %v5894_v16 = vpack.c.bf16 %v660_v12, %v659_v11  ;;  %v662_v18 = vld [vmem:[#allocation2 + $0x1c0] sm:$0xff]  ;;  %v663_v20 = vld [vmem:[#allocation2 + $0x1c8] sm:$0xff]  ;;  %v664_v21 = vld [vmem:[#allocation2 + $0x1d0] sm:$0xff] }
  0x22   :  { %5875 = vmatprep.subr.bf16.mxu0 %v5874_v26  ;;  %v5898_v19 = vpack.c.bf16 %v662_v18, %v661_v17  ;;  %v5902_v22 = vpack.c.bf16 %v664_v21, %v663_v20  ;;  %v665_v23 = vld [vmem:[#allocation2 + $0x1d8] sm:$0xff]  ;;  %v850_v41 = vld [vmem:[#allocation2 + $0x188] sm:$0xff]  ;;  %v941_v59 = vld [vmem:[#allocation2 + $0x200] sm:$0xff] }
  0x23   :  { %v4733_v25 = vld [vmem:[#allocation2 + $0x158] ss:$0 sm:$0xff]  ;;  %v942_v60 = vld [vmem:[#allocation2 + $0x208] sm:$0xff]  ;;  %v943_v1 = vld [vmem:[#allocation2 + $0x210] sm:$0xff] }
  0x24   :  { %5861 = vmatpush3.bf16.msra.mxu1 %v5858_v24  ;;  %v666_v24 = vld [vmem:[#allocation2 + $0x1e0] sm:$0xff]  ;;  %v848_v38 = vld [vmem:[#allocation2 + $0x178] sm:$0xff]  ;;  %v1042_v11 = vld [vmem:[#allocation2 + $0x2b0] sm:$0xff] }
  0x25   :  { %5877 = vmatpush3.bf16.msra.mxu0 %v5874_v26  ;;  %5879 = vmatprep.subr.bf16.mxu1 %v5878_v34  ;;  %v5906_v26 = vpack.c.bf16 %v666_v24, %v665_v23  ;;  %v852_v44 = vld [vmem:[#allocation2 + $0x198] sm:$0xff]  ;;  %v1040_v5 = vld [vmem:[#allocation2 + $0x2a0] sm:$0xff]  ;;  %v950_v20 = vld [vmem:[#allocation2 + $0x248] sm:$0xff] }
  0x26   :  { %5279 = vmatprep.subr.msk.mxu0 %vm40_vm0, %v406_v7  ;;  %v944_v2 = vld [vmem:[#allocation2 + $0x218] sm:$0xff]  ;;  %v1044_v17 = vld [vmem:[#allocation2 + $0x2c0] sm:$0xff]  ;;  %v1045_v21 = vld [vmem:[#allocation2 + $0x2c8] sm:$0xff] }
  0x27   :  { %v5950_v4 = vpack.c.bf16 %v944_v2, %v943_v1  ;;  %v1046_v23 = vld [vmem:[#allocation2 + $0x2d0] sm:$0xff]  ;;  %vm6714_vm10 = vmpackc.low %vm3026_vm9, %vm3026_vm9 }
  0x28   :  { %v951_v24 = vld [vmem:[#allocation2 + $0x250] sm:$0xff] }
  0xe8   :  { %v5221_v28 = vpop.f32.mrb[0].mxu0 }
  0xe9   :  { %v110_v29 = vpop.f32.mrb[1].mxu0  ;;  %v6510_v31 = vadd.f32 %v5221_v28, %v4705_v27  ;;  %v845_v28 = vld [vmem:[#allocation2 + $0x160] sm:$0xff] }
  0xea   :  { %v6508_v30 = vadd.f32 %v4705_v27, %v110_v29  ;;  %v846_v29 = vld [vmem:[#allocation2 + $0x168] sm:$0xff] }
  0xeb   :  { %v5926_v36 = vpack.c.bf16 %v846_v29, %v845_v28  ;;  %v1047_v28 = vld [vmem:[#allocation2 + $0x2d8] sm:$0xff]  ;;  %v1048_v29 = vld [vmem:[#allocation2 + $0x2e0] sm:$0xff] }
  0xec   :  { %5238 = vmatprep.mubr.msk.f32.mxu1 %vm132_vm2, %v6508_v30  ;;  %5257 = vmatprep.mubr.msk.f32.mxu0 %vm132_vm2, %v6508_v30 }
  0xed   :  { %5239 = vmatmul.mubr.msk.f32.vlgmr.msra.gmra.mrb[0].mxu1 %vm132_vm2, %v6510_v31  ;;  %5258 = vmatmul.mubr.msk.f32.vlgmr.msra.gmra.mrb[2].mxu0 %vm132_vm2, %v6510_v31 }
  0xee   :  { %5881 = vmatpush3.bf16.msra.mxu1 %v5878_v34  ;;  %5280 = vmatpush3.msk.msra.mxu0 %vm40_vm0, %v406_v7  ;;  %v945_v7 = vld [vmem:[#allocation2 + $0x220] sm:$0xff] }
  0xef   :  { %5883 = vmatprep.subr.bf16.mxu1 %v5882_v37  ;;  %5284 = vmatprep.subr.msk.mxu0 %vm40_vm0, %v496_v8 }
  0xf2   :  { %5885 = vmatpush3.bf16.msra.mxu1 %v5882_v37 }
  0xf3   :  { %5887 = vmatprep.subr.bf16.mxu1 %v5886_v40 }
  0xf6   :  { %5889 = vmatpush3.bf16.msra.mxu1 %v5886_v40  ;;  %v849_v40 = vld [vmem:[#allocation2 + $0x180] sm:$0xff] }
  0xf7   :  { %5891 = vmatprep.subr.bf16.mxu1 %v5890_v43  ;;  %v5934_v42 = vpack.c.bf16 %v850_v41, %v849_v40  ;;  %v4724_v40 = vld [vmem:[#allocation2 + $0x100] ss:$0 sm:$0xff] }
  0xfa   :  { %5893 = vmatpush3.bf16.msra.mxu1 %v5890_v43  ;;  %v851_v43 = vld [vmem:[#allocation2 + $0x190] sm:$0xff] }
  0xfb   :  { %5911 = vmatprep.subr.bf16.mxu1 %v5910_v46  ;;  %v5938_v45 = vpack.c.bf16 %v852_v44, %v851_v43 }
 0x1c0   :  { %v6520_v48 = vpop.f32.mrb[0].mxu1  ;;  %v5259_v49 = vpop.f32.mrb[2].mxu0 }
 0x1c1   :  { %v299_v50 = vadd.f32 %v5259_v49, %v4712_v47  ;;  %v6522_v51 = vpop.f32.mrb[1].mxu1  ;;  %v293_v52 = vpop.f32.mrb[3].mxu0 }
 0x1c2   :  { %v294_v53 = vadd.f32 %v4712_v47, %v293_v52 }
 0x1c3   :  { %v306_v54 = vmul.f32 1.442695, %v299_v50  ;;  %vm303_vm4 = vcmp.gt.f32.partialorder %v299_v50, 0.0 }
 0x1c4   :  { %v304_v55 = vmul.f32 1.442695, %v294_v53  ;;  %vm302_vm3 = vcmp.gt.f32.partialorder %v294_v53, 0.0 }
 0x1c5   :  { %6296 = vpow2.f32 %v306_v54  ;;  %v940_v54 = vld [vmem:[#allocation2 + $0x1f8] sm:$0xff] }
 0x1c6   :  { %6298 = vpow2.f32 %v304_v55  ;;  %v1035_v55 = vld [vmem:[#allocation2 + $0x278] sm:$0xff] }
 0x1cf   :  { %v6297_v56 = vpop.eup %6296 }
 0x1d0   :  { %v6299_v57 = vpop.eup %6298  ;;  %v4716_v58 = vadd.f32 -1.0, %v6297_v56 }
 0x1d1   :  { %v4715_v61 = vadd.f32 -1.0, %v6299_v57  ;;  %v1036_v57 = vld [vmem:[#allocation2 + $0x280] sm:$0xff] }
 0x1d2   :  { %v311_v0 = vsel %vm303_vm4, %v299_v50, %v4716_v58  ;;  %v5974_v58 = vpack.c.bf16 %v1036_v57, %v1035_v55  ;;  %v4709_v57 = vld [vmem:[#allocation2 + $0x50] ss:$0 sm:$0xff]  ;;  %vm4313_vm4 = vcmask 97280  }
 0x1d3   :  { %v310_v62 = vsel %vm302_vm3, %v294_v53, %v4715_v61  ;;  %v939_v53 = vld [vmem:[#allocation2 + $0x1f0] sm:$0xff]  ;;  %v1037_v61 = vld [vmem:[#allocation2 + $0x288] sm:$0xff]  ;;  %v206_v1 = vadd.f32 %v4709_v57, %v6522_v51 }
 0x1d4   :  { %5276 = vmatprep.mubr.msk.f32.mxu1 %vm132_vm2, %v310_v62  ;;  %v5942_v56 = vpack.c.bf16 %v940_v54, %v939_v53  ;;  %v5946_v62 = vpack.c.bf16 %v942_v60, %v941_v59 }
 0x1d5   :  { %5277 = vmatmul.mubr.msk.f32.vlgmr.msra.gmra.mrb[2].mxu1 %vm132_vm2, %v311_v0 }
 0x1d6   :  { %5913 = vmatpush3.bf16.msra.mxu1 %v5910_v46  ;;  %5324 = vmatprep.mubr.msk.f32.mxu1 %vm132_vm2, %v6508_v30 }
 0x1d7   :  { %5915 = vmatprep.subr.bf16.mxu1 %v5914_v63 }
 0x1da   :  { %5917 = vmatpush3.bf16.msra.mxu1 %v5914_v63  ;;  %v1038_v63 = vld [vmem:[#allocation2 + $0x290] sm:$0xff] }
 0x1db   :  { %5919 = vmatprep.subr.bf16.mxu1 %v5918_v3  ;;  %v5978_v0 = vpack.c.bf16 %v1038_v63, %v1037_v61  ;;  %v4738_v63 = vld [vmem:[#allocation2 + $0x1a0] ss:$0 sm:$0xff] }
 0x1de   :  { %5921 = vmatpush3.bf16.msra.mxu1 %v5918_v3  ;;  %v1039_v3 = vld [vmem:[#allocation2 + $0x298] sm:$0xff] }
 0x1df   :  { %5923 = vmatprep.subr.bf16.mxu1 %v5922_v6 }
 0x1e2   :  { %5925 = vmatpush3.bf16.msra.mxu1 %v5922_v6  ;;  %v5982_v6 = vpack.c.bf16 %v1040_v5, %v1039_v3 }
 0x1e3   :  { %5943 = vmatprep.subr.bf16.mxu1 %v5942_v56 }
 0x1e5   :  { %5325 = vmatmul.mubr.msk.f32.vlgmr.msra.gmra.mrb[4].mxu1 %vm132_vm2, %v6510_v31 }
 0x1e6   :  { %5945 = vmatpush3.bf16.msra.mxu1 %v5942_v56  ;;  %v4720_v56 = vld [vmem:[#allocation2 + $0xf0] ss:$0 sm:$0xff] }
 0x1e7   :  { %5947 = vmatprep.subr.bf16.mxu1 %v5946_v62 }
 0x1ea   :  { %5949 = vmatpush3.bf16.msra.mxu1 %v5946_v62  ;;  %v211_v62 = vadd.f32 %v6520_v48, %v4709_v57 }
 0x1eb   :  { %5951 = vmatprep.subr.bf16.mxu1 %v5950_v4 }
 0x1ee   :  { %5953 = vmatpush3.bf16.msra.mxu1 %v5950_v4 }
 0x2a8   :  { %v5278_v10 = vpop.f32.mrb[2].mxu1 }
 0x2a9   :  { %v397_v13 = vpop.f32.mrb[3].mxu1  ;;  %v403_v15 = vadd.f32 %v5278_v10, %v4717_v9 }
 0x2aa   :  { %v398_v14 = vadd.f32 %v4717_v9, %v397_v13  ;;  %v1041_v9 = vld [vmem:[#allocation2 + $0x2a8] sm:$0xff]  ;;  %v947_v13 = vld [vmem:[#allocation2 + $0x230] sm:$0xff] }
 0x2ab   :  { %v5986_v12 = vpack.c.bf16 %v1042_v11, %v1041_v9 }
 0x2ac   :  { %5281 = vmatprep.mubr.msk.f32.mxu0 %vm33_vm1, %v398_v14 }
 0x2ad   :  { %5282 = vmatmul.mubr.msk.f32.vlgmr.msra.gmra.mrb[4].mxu0 %vm33_vm1, %v403_v15 }
 0x2ae   :  { %5286 = vmatprep.mubr.msk.f32.mxu0 %vm33_vm1, %v398_v14  ;;  %5285 = vmatpush3.msk.msra.mxu0 %vm40_vm0, %v496_v8  ;;  %v946_v8 = vld [vmem:[#allocation2 + $0x228] sm:$0xff]  ;;  %v948_v14 = vld [vmem:[#allocation2 + $0x238] sm:$0xff] }
 0x2af   :  { %5895 = vmatprep.subr.bf16.mxu0 %v5894_v16  ;;  %v5954_v10 = vpack.c.bf16 %v946_v8, %v945_v7 }
 0x2b1   :  { %5287 = vmatmul.mubr.msk.f32.vlgmr.msra.gmra.mrb[6].mxu0 %vm33_vm1, %v403_v15  ;;  %5955 = vmatprep.subr.bf16.mxu1 %v5954_v10  ;;  %v1043_v15 = vld [vmem:[#allocation2 + $0x2b8] sm:$0xff] }
 0x2b2   :  { %5897 = vmatpush3.bf16.msra.mxu0 %v5894_v16  ;;  %5305 = vmatprep.mubr.msk.f32.mxu0 %vm132_vm2, %v6508_v30  ;;  %v847_v30 = vld [vmem:[#allocation2 + $0x170] sm:$0xff]  ;;  %v5958_v16 = vpack.c.bf16 %v948_v14, %v947_v13  ;;  %v5990_v18 = vpack.c.bf16 %v1044_v17, %v1043_v15 }
 0x2b3   :  { %5899 = vmatprep.subr.bf16.mxu0 %v5898_v19  ;;  %v5930_v39 = vpack.c.bf16 %v848_v38, %v847_v30  ;;  %5957 = vmatpush3.bf16.msra.mxu1 %v5954_v10  ;;  %v6552_v10 = vld [vmem:[#allocation2 + $0x310] sm:$0xf] }
 0x2b4   :  { %5959 = vmatprep.subr.bf16.mxu1 %v5958_v16 }
 0x2b6   :  { %5901 = vmatpush3.bf16.msra.mxu0 %v5898_v19  ;;  %v949_v19 = vld [vmem:[#allocation2 + $0x240] sm:$0xff] }
 0x2b7   :  { %5903 = vmatprep.subr.bf16.mxu0 %v5902_v22  ;;  %5961 = vmatpush3.bf16.msra.mxu1 %v5958_v16 }
 0x2b8   :  { %v5326_v27 = vpop.f32.mrb[4].mxu1 }
 0x2b9   :  { %v832_v32 = vadd.f32 %v5326_v27, %v4733_v25  ;;  %v826_v33 = vpop.f32.mrb[5].mxu1 }
 0x2ba   :  { %v827_v34 = vadd.f32 %v4733_v25, %v826_v33  ;;  %5905 = vmatpush3.bf16.msra.mxu0 %v5902_v22  ;;  %v5962_v22 = vpack.c.bf16 %v950_v20, %v949_v19  ;;  %v952_v25 = vld [vmem:[#allocation2 + $0x258] sm:$0xff]  ;;  %v953_v33 = vld [vmem:[#allocation2 + $0x260] sm:$0xff] }
 0x2bb   :  { %v839_v35 = vmul.f32 1.442695, %v832_v32  ;;  %5907 = vmatprep.subr.bf16.mxu0 %v5906_v26  ;;  %vm836_vm6 = vcmp.gt.f32.partialorder %v832_v32, 0.0  ;;  %v5966_v27 = vpack.c.bf16 %v952_v25, %v951_v24  ;;  %v4742_v20 = vld [vmem:[#allocation2 + $0x2f8] ss:$0 sm:$0xff] }
 0x2bc   :  { %v837_v37 = vmul.f32 1.442695, %v827_v34  ;;  %vm835_vm5 = vcmp.gt.f32.partialorder %v827_v34, 0.0  ;;  %5963 = vmatprep.subr.bf16.mxu1 %v5962_v22 }
 0x2bd   :  { %5965 = vmatpush3.bf16.msra.mxu1 %v5962_v22 }
 0x2be   :  { %6300 = vpow2.f32 %v837_v37  ;;  %5909 = vmatpush3.bf16.msra.mxu0 %v5906_v26  ;;  %v5994_v26 = vpack.c.bf16 %v1046_v23, %v1045_v21  ;;  %5967 = vmatprep.subr.bf16.mxu1 %v5966_v27  ;;  %v1050_v37 = vld [vmem:[#allocation2 + $0x2f0] sm:$0xff] }
 0x2bf   :  { %6302 = vpow2.f32 %v839_v35  ;;  %5927 = vmatprep.subr.bf16.mxu0 %v5926_v36  ;;  %v1049_v35 = vld [vmem:[#allocation2 + $0x2e8] sm:$0xff] }
 0x2c0   :  { %v6002_v30 = vpack.c.bf16 %v1050_v37, %v1049_v35  ;;  %v4741_v37 = vld [vmem:[#allocation2 + $0x270] ss:$0 sm:$0xff] }
 0x2c1   :  { %5306 = vmatmul.mubr.msk.f32.vlgmr.msra.gmra.mrb[8].mxu0 %vm132_vm2, %v6510_v31  ;;  %5969 = vmatpush3.bf16.msra.mxu1 %v5966_v27 }
 0x2c2   :  { %5929 = vmatpush3.bf16.msra.mxu0 %v5926_v36 }
 0x2c3   :  { %5931 = vmatprep.subr.bf16.mxu0 %v5930_v39 }
 0x2c6   :  { %5933 = vmatpush3.bf16.msra.mxu0 %v5930_v39 }
 0x2c7   :  { %5935 = vmatprep.subr.bf16.mxu0 %v5934_v42 }
 0x2c8   :  { %v6301_v46 = vpop.eup %6300 }
 0x2c9   :  { %v6303_v47 = vpop.eup %6302  ;;  %v4736_v49 = vadd.f32 -1.0, %v6301_v46 }
 0x2ca   :  { %5937 = vmatpush3.bf16.msra.mxu0 %v5934_v42  ;;  %v4737_v52 = vadd.f32 -1.0, %v6303_v47 }
 0x2cb   :  { %v843_v50 = vsel %vm835_vm5, %v827_v34, %v4736_v49  ;;  %5939 = vmatprep.subr.bf16.mxu0 %v5938_v45  ;;  %v954_v34 = vld [vmem:[#allocation2 + $0x268] sm:$0xff]  ;;  %vm6468_vm5 = vmmov 1  }
 0x2cc   :  { %5343 = vmatprep.mubr.msk.f32.mxu0 %vm132_vm2, %v843_v50  ;;  %v844_v31 = vsel %vm836_vm6, %v832_v32, %v4737_v52  ;;  %v5998_v32 = vpack.c.bf16 %v1048_v29, %v1047_v28  ;;  %v5970_v36 = vpack.c.bf16 %v954_v34, %v953_v33  ;;  %vm6805_vm6 = vmpackc.low %vm40_vm0, %vm6468_vm5 }
 0x2ce   :  { %5941 = vmatpush3.bf16.msra.mxu0 %v5938_v45  ;;  %5971 = vmatprep.subr.bf16.mxu1 %v5970_v36 }
 0x2cf   :  { %5975 = vmatprep.subr.bf16.mxu0 %v5974_v58  ;;  %5973 = vmatpush3.bf16.msra.mxu1 %v5970_v36 }
 0x2d0   :  { %5416 = vmatprep.subr.mxu1 %v6552_v10 }
 0x2d1   :  { %5344 = vmatmul.mubr.msk.f32.vlgmr.msra.gmra.mrb[10].mxu0 %vm132_vm2, %v844_v31 }
 0x2d2   :  { %5977 = vmatpush3.bf16.msra.mxu0 %v5974_v58 }
 0x2d3   :  { %5979 = vmatprep.subr.bf16.mxu0 %v5978_v0 }
 0x2d6   :  { %5981 = vmatpush3.bf16.msra.mxu0 %v5978_v0 }
 0x2d7   :  { %5983 = vmatprep.subr.bf16.mxu0 %v5982_v6 }
 0x2da   :  { %5985 = vmatpush3.bf16.msra.mxu0 %v5982_v6 }
 0x2db   :  { %5987 = vmatprep.subr.bf16.mxu0 %v5986_v12 }
 0x2de   :  { %5989 = vmatpush3.bf16.msra.mxu0 %v5986_v12 }
 0x2df   :  { %5991 = vmatprep.subr.bf16.mxu0 %v5990_v18 }
 0x2e2   :  { %5993 = vmatpush3.bf16.msra.mxu0 %v5990_v18 }
 0x2e3   :  { %5995 = vmatprep.subr.bf16.mxu0 %v5994_v26 }
 0x2e6   :  { %5997 = vmatpush3.bf16.msra.mxu0 %v5994_v26 }
 0x2e7   :  { %5999 = vmatprep.subr.bf16.mxu0 %v5998_v32 }
 0x2ea   :  { %6001 = vmatpush3.bf16.msra.mxu0 %v5998_v32 }
 0x2eb   :  { %6003 = vmatprep.subr.bf16.mxu0 %v6002_v30 }
 0x2ee   :  { %6005 = vmatpush3.bf16.msra.mxu0 %v6002_v30  ;;  %v4730_v30 = vld [vmem:[#allocation2 + $0x1e8] ss:$0 sm:$0xff] }
 0x2ef   :  { %5431 = vmatprep.subr.msk.mxu0 %vm40_vm0, %v6552_v10 }
 0x380   :  { %v5283_v38 = vpop.f32.mrb[4].mxu0 }
 0x381   :  { %v487_v39 = vpop.f32.mrb[5].mxu0  ;;  %v493_v58 = vadd.f32 %v5283_v38, %v4720_v56 }
 0x382   :  { %v488_v60 = vadd.f32 %v4720_v56, %v487_v39 }
 0x384   :  { %v5288_v41 = vpop.f32.mrb[6].mxu0 }
 0x385   :  { %v577_v42 = vadd.f32 %v5288_v41, %v4724_v40  ;;  %v571_v43 = vpop.f32.mrb[7].mxu0 }
 0x386   :  { %v572_v44 = vadd.f32 %v4724_v40, %v571_v43 }
 0x387   :  { %v581_v45 = vsub.f32 0.0, %v577_v42 }
 0x388   :  { %v580_v46 = vsub.f32 0.0, %v572_v44 }
 0x389   :  { %v584_v47 = vmul.f32 1.442695, %v581_v45 }
 0x38a   :  { %v582_v49 = vmul.f32 1.442695, %v580_v46 }
 0x38b   :  { %6304 = vpow2.f32 %v584_v47 }
 0x38c   :  { %6306 = vpow2.f32 %v582_v49 }
 0x394   :  { %v6544_v50 = vpop.f32.mrb[8].mxu0 }
 0x395   :  { %v6305_v52 = vpop.eup %6304  ;;  %v6546_v31 = vpop.f32.mrb[9].mxu0  ;;  %v744_v42 = vadd.f32 %v6544_v50, %v4730_v30 }
 0x396   :  { %v6307_v53 = vpop.eup %6306  ;;  %v587_v54 = vadd.f32 1.0, %v6305_v52  ;;  %v739_v44 = vadd.f32 %v4730_v30, %v6546_v31  ;;  %v4728_v31 = vld [vmem:[#allocation2 + $0x108] ss:$0 sm:$0xff] }
 0x397   :  { %v586_v55 = vadd.f32 1.0, %v6307_v53 }
 0x398   :  { %6308 = vrcp.f32 %v587_v54 }
 0x399   :  { %6310 = vrcp.f32 %v586_v55 }
 0x3a2   :  { %v6309_v59 = vpop.eup %6308 }
 0x3a3   :  { %v6311_v61 = vpop.eup %6310  ;;  %v593_v0 = vmul.f32 %v6309_v59, %v493_v58  ;;  %v4729_v58 = vld [vmem:[#allocation2 + $0x110] ss:$0 sm:$0xff] }
 0x3a4   :  { %v5345_v2 = vpop.f32.mrb[10].mxu0  ;;  %v592_v3 = vmul.f32 %v6311_v61, %v488_v60 }
 0x3a5   :  { %v930_v4 = vpop.f32.mrb[11].mxu0  ;;  %v595_v5 = vadd.f32 %v593_v0, %v211_v62  ;;  %v936_v8 = vadd.f32 %v5345_v2, %v4738_v63 }
 0x3a6   :  { %v931_v6 = vadd.f32 %v4738_v63, %v930_v4  ;;  %v594_v7 = vadd.f32 %v592_v3, %v206_v1 }
 0x3a7   :  { %v601_v48 = vsel %vm33_vm1, %v595_v5, 0.0 }
 0x3a8   :  { %5378 = vmatprep.mubr.f32.mxu1 %v931_v6  ;;  %5413 = vmatprep.mubr.f32.mxu0 %v931_v6  ;;  %v598_v9 = vsel %vm33_vm1, %v594_v7, 0.0 }
 0x3a9   :  { %5379 = vmatmul.mubr.f32.vlgmr.msra.gmra.mrb[6].mxu1 %v936_v8  ;;  %5414 = vmatmul.mubr.f32.vlgmr.msra.gmra.mrb[12].mxu0 %v936_v8 }
 0x3aa   :  { %599 = vadd.xlane.f32.xlu0 %v598_v9  ;;  %5417 = vmatpush3.xpose.msra.mxu1 %v6552_v10 }
 0x3ab   :  { %5432 = vmatpush3.msk.msra.mxu0 %vm40_vm0, %v6552_v10  ;;  %5421 = vmatprep.subr.msk.mxu1 %vm40_vm0, %v6552_v10 }
 0x3ae   :  { %602 = vadd.xlane.f32.xlu0 %v601_v48 }
 0x437   :  { %v600_v51 = vpop.xlane.xlu0 %599 }
 0x438   :  { %v605_v11 = vmul.f32 0.25, %v600_v51 }
 0x43a   :  { %v607_v12 = vsub.f32 %v594_v7, %v605_v11 }
 0x43b   :  { %v603_v13 = vpop.xlane.xlu0 %602 }
 0x43c   :  { %v606_v14 = vmul.f32 0.25, %v603_v13  ;;  %v609_v15 = vmul.f32 %v607_v12, %v607_v12 }
 0x43e   :  { %v608_v16 = vsub.f32 %v595_v5, %v606_v14  ;;  %v611_v17 = vsel %vm33_vm1, %v609_v15, 0.0 }
 0x43f   :  { %612 = vadd.xlane.f32.xlu1 %v611_v17 }
 0x440   :  { %v610_v18 = vmul.f32 %v608_v16, %v608_v16 }
 0x442   :  { %v614_v19 = vsel %vm33_vm1, %v610_v18, 0.0 }
 0x443   :  { %615 = vadd.xlane.f32.xlu1 %v614_v19 }
 0x47c   :  { %v5380_v21 = vpop.f32.mrb[6].mxu1  ;;  %v5415_v22 = vpop.f32.mrb[12].mxu0 }
 0x47d   :  { %v1128_v23 = vadd.f32 %v5415_v22, %v4742_v20  ;;  %v1026_v24 = vpop.f32.mrb[7].mxu1  ;;  %v1122_v25 = vpop.f32.mrb[13].mxu0  ;;  %v1032_v38 = vadd.f32 %v5380_v21, %v4741_v37 }
 0x47e   :  { %v1123_v26 = vadd.f32 %v4742_v20, %v1122_v25  ;;  %v1027_v40 = vadd.f32 %v4741_v37, %v1026_v24 }
 0x47f   :  { %v1132_v27 = vsub.f32 0.0, %v1128_v23 }
 0x480   :  { %v1131_v28 = vsub.f32 0.0, %v1123_v26 }
 0x481   :  { %v1135_v29 = vmul.f32 1.442695, %v1132_v27 }
 0x482   :  { %v1133_v32 = vmul.f32 1.442695, %v1131_v28  ;;  %v1572_v28 = vld [vmem:[#allocation2 + $0x318] sm:$0xff] }
 0x483   :  { %6312 = vpow2.f32 %v1135_v29  ;;  %v1573_v29 = vld [vmem:[#allocation2 + $0x320] sm:$0xff] }
 0x484   :  { %6314 = vpow2.f32 %v1133_v32  ;;  %v6006_v32 = vpack.c.bf16 %v1573_v29, %v1572_v28 }
 0x486   :  { %6007 = vmatprep.subr.bf16.mxu0 %v6006_v32 }
 0x48d   :  { %v6313_v33 = vpop.eup %6312 }
 0x48e   :  { %v6315_v34 = vpop.eup %6314  ;;  %v1138_v35 = vadd.f32 1.0, %v6313_v33 }
 0x48f   :  { %v1137_v36 = vadd.f32 1.0, %v6315_v34  ;;  %v1574_v34 = vld [vmem:[#allocation2 + $0x328] sm:$0xff] }
 0x490   :  { %6316 = vrcp.f32 %v1138_v35  ;;  %v1575_v35 = vld [vmem:[#allocation2 + $0x330] sm:$0xff] }
 0x491   :  { %6318 = vrcp.f32 %v1137_v36 }
 0x49a   :  { %v6317_v39 = vpop.eup %6316 }
 0x49b   :  { %v6319_v41 = vpop.eup %6318  ;;  %v1144_v43 = vmul.f32 %v6317_v39, %v1032_v38  ;;  %v6010_v38 = vpack.c.bf16 %v1575_v35, %v1574_v34 }
 0x49c   :  { %v1143_v45 = vmul.f32 %v6319_v41, %v1027_v40  ;;  %v1576_v40 = vld [vmem:[#allocation2 + $0x338] sm:$0xff]  ;;  %v1577_v41 = vld [vmem:[#allocation2 + $0x340] sm:$0xff] }
 0x49d   :  { %v1146_v46 = vadd.f32 %v1144_v43, %v744_v42  ;;  %v6014_v42 = vpack.c.bf16 %v1577_v41, %v1576_v40  ;;  %v1578_v43 = vld [vmem:[#allocation2 + $0x348] sm:$0xff] }
 0x49e   :  { %v1145_v47 = vadd.f32 %v1143_v45, %v739_v44  ;;  %v1579_v44 = vld [vmem:[#allocation2 + $0x350] sm:$0xff] }
 0x49f   :  { %v6018_v45 = vpack.c.bf16 %v1579_v44, %v1578_v43 }
 0x4a0   :  { %5418 = vmatprep.mubr.f32.mxu1 %v1145_v47 }
 0x4a1   :  { %5419 = vmatmul.mubr.f32.vlgmr.msra.gmra.mrb[8].mxu1 %v1146_v46 }
 0x4a2   :  { %5422 = vmatpush3.msk.msra.mxu1 %vm40_vm0, %v6552_v10 }
 0x4a3   :  { %5426 = vmatprep.subr.mxu1 %v6552_v10 }
 0x4cc   :  { %v613_v49 = vpop.xlane.xlu1 %612 }
 0x4cd   :  { %v617_v52 = vmul.f32 0.25, %v613_v49  ;;  %v1582_v49 = vld [vmem:[#allocation2 + $0x368] sm:$0xff] }
 0x4cf   :  { %v619_v53 = vadd.f32 1e-05, %v617_v52 }
 0x4d0   :  { %v616_v54 = vpop.xlane.xlu1 %615 }
 0x4d1   :  { %6320 = vrsqrt.f32 %v619_v53  ;;  %v618_v55 = vmul.f32 0.25, %v616_v54  ;;  %v1583_v53 = vld [vmem:[#allocation2 + $0x370] sm:$0xff] }
 0x4d2   :  { %v6026_v54 = vpack.c.bf16 %v1583_v53, %v1582_v49 }
 0x4d3   :  { %v620_v50 = vadd.f32 1e-05, %v618_v55  ;;  %v1584_v55 = vld [vmem:[#allocation2 + $0x378] sm:$0xff] }
 0x4d5   :  { %6322 = vrsqrt.f32 %v620_v50  ;;  %v1585_v50 = vld [vmem:[#allocation2 + $0x380] sm:$0xff] }
 0x4db   :  { %v6321_v56 = vpop.eup %6320 }
 0x4dc   :  { %v623_v57 = vmul.f32 %v6321_v56, %v607_v12  ;;  %v6030_v56 = vpack.c.bf16 %v1585_v50, %v1584_v55 }
 0x4de   :  { %v629_v59 = vmul.f32 %v4728_v31, %v623_v57  ;;  %v1587_v57 = vld [vmem:[#allocation2 + $0x390] sm:$0xff] }
 0x4df   :  { %v6323_v60 = vpop.eup %6322 }
 0x4e0   :  { %v635_v61 = vadd.f32 %v4729_v58, %v629_v59  ;;  %v624_v62 = vmul.f32 %v6323_v60, %v608_v16 }
 0x4e2   :  { %v637_v63 = vsel %vm33_vm1, %v635_v61, -inf  ;;  %v630_v0 = vmul.f32 %v4728_v31, %v624_v62  ;;  %v1586_v31 = vld [vmem:[#allocation2 + $0x388] sm:$0xff] }
 0x4e3   :  { %638 = vmax.xlane.f32.xlu0 %v637_v63 }
 0x4e4   :  { %v636_v1 = vadd.f32 %v4729_v58, %v630_v0  ;;  %v6034_v58 = vpack.c.bf16 %v1587_v57, %v1586_v31  ;;  %v4749_v0 = vld [vmem:[#allocation2 + $0x300] ss:$0 sm:$0xff] }
 0x4e6   :  { %v640_v2 = vsel %vm33_vm1, %v636_v1, -inf }
 0x4e7   :  { %641 = vmax.xlane.f32.xlu1 %v640_v2 }
 0x570   :  { %v639_v3 = vpop.xlane.xlu0 %638 }
 0x571   :  { %v643_v4 = vsub.f32 %v635_v61, %v639_v3 }
 0x573   :  { %v645_v5 = vmul.f32 1.442695, %v643_v4  ;;  %v4750_v4 = vld [vmem:[#allocation2 + $0x308] ss:$0 sm:$0xff] }
 0x574   :  { %v5420_v6 = vpop.f32.mrb[8].mxu1  ;;  %v642_v7 = vpop.xlane.xlu1 %641 }
 0x575   :  { %6324 = vpow2.f32 %v645_v5  ;;  %v644_v8 = vsub.f32 %v636_v1, %v642_v7  ;;  %v1214_v9 = vpop.f32.mrb[9].mxu1  ;;  %v1224_v51 = vmul.f32 0.03125, %v5420_v6 }
 0x576   :  { %v1223_v48 = vmul.f32 0.03125, %v1214_v9 }
 0x577   :  { %v647_v11 = vmul.f32 1.442695, %v644_v8 }
 0x578   :  { %5423 = vmatprep.mubr.msk.f32.mxu1 %vm33_vm1, %v1223_v48 }
 0x579   :  { %6326 = vpow2.f32 %v647_v11  ;;  %5424 = vmatmul.mubr.msk.f32.vlgmr.msra.gmra.mrb[10].mxu1 %vm33_vm1, %v1224_v51 }
 0x57a   :  { %5427 = vmatpush3.xpose.msra.mxu1 %v6552_v10 }
 0x57b   :  { %5436 = vmatprep.subr.msk.mxu1 %vm40_vm0, %v6552_v10 }
 0x57f   :  { %v6325_v12 = vpop.eup %6324 }
 0x580   :  { %v649_v13 = vsel %vm33_vm1, %v6325_v12, 0.0 }
 0x581   :  { %650 = vadd.xlane.f32.xlu0 %v649_v13 }
 0x583   :  { %v6327_v14 = vpop.eup %6326 }
 0x584   :  { %v652_v15 = vsel %vm33_vm1, %v6327_v14, 0.0 }
 0x585   :  { %653 = vadd.xlane.f32.xlu1 %v652_v15 }
 0x60e   :  { %v651_v16 = vpop.xlane.xlu0 %650 }
 0x60f   :  { %6328 = vrcp.f32 %v651_v16 }
 0x612   :  { %v654_v17 = vpop.xlane.xlu1 %653 }
 0x613   :  { %6330 = vrcp.f32 %v654_v17 }
 0x619   :  { %v6329_v22 = vpop.eup %6328 }
 0x61a   :  { %v656_v26 = vmul.f32 %v6329_v22, %v6325_v12 }
 0x61d   :  { %v6331_v25 = vpop.eup %6330 }
 0x61e   :  { %v658_v27 = vmul.f32 %v6331_v25, %v6327_v14  ;;  %v1708_v25 = vld [vmem:[#allocation2 + $0x3c0] sm:$0xff] }
 0x64c   :  { %v5425_v18 = vpop.f32.mrb[10].mxu1 }
 0x64d   :  { %v6578_v19 = vsub.f32 %v1146_v46, %v5425_v18  ;;  %v1300_v20 = vpop.f32.mrb[11].mxu1  ;;  %v1580_v46 = vld [vmem:[#allocation2 + $0x358] sm:$0xff] }
 0x64e   :  { %v6580_v21 = vsub.f32 %v1145_v47, %v1300_v20  ;;  %v1581_v47 = vld [vmem:[#allocation2 + $0x360] sm:$0xff] }
 0x64f   :  { %v1312_v24 = vmul.f32 %v6578_v19, %v6578_v19  ;;  %v6022_v52 = vpack.c.bf16 %v1581_v47, %v1580_v46 }
 0x650   :  { %v1311_v23 = vmul.f32 %v6580_v21, %v6580_v21 }
 0x652   :  { %5428 = vmatprep.mubr.f32.mxu1 %v1311_v23 }
 0x653   :  { %5429 = vmatmul.mubr.f32.vlgmr.msra.gmra.mrb[12].mxu1 %v1312_v24  ;;  %v1705_v24 = vld [vmem:[#allocation2 + $0x3a8] sm:$0xff] }
 0x654   :  { %5438 = vmatprep.mubr.msk.f32.mxu1 %vm33_vm1, %v656_v26  ;;  %5437 = vmatpush3.msk.msra.mxu1 %vm40_vm0, %v6552_v10  ;;  %v1707_v26 = vld [vmem:[#allocation2 + $0x3b8] sm:$0xff]  ;;  %vm4698_vm0 = vcmask 519168  }
 0x657   :  { %5439 = vmatmul.mubr.msk.f32.vlgmr.msra.gmra.mrb[14].mxu1 %vm33_vm1, %v658_v27  ;;  %v6463_v27 = vmov 0  }
 0x658   :  { %5480 = vmatprep.mubr.msk.f32.mxu1 %vm1719_vm8, %v1705_v24  ;;  %6286 = vset.pattern.permute.xlu1 %v6463_v27 }
 0x659   :  { %6285 = vset.pattern.permute.xlu0 %v6463_v27  ;;  %v1937_v27 = vld [vmem:[#allocation2 + $0x400] sm:$0xff] }
 0x726   :  { %v5430_v33 = vpop.f32.mrb[12].mxu1 }
 0x727   :  { %v1379_v36 = vpop.f32.mrb[13].mxu1  ;;  %v1389_v30 = vmul.f32 0.03125, %v5430_v33 }
 0x728   :  { %v1388_v37 = vmul.f32 0.03125, %v1379_v36 }
 0x72a   :  { %5433 = vmatprep.mubr.msk.f32.mxu0 %vm33_vm1, %v1388_v37  ;;  %v5440_v39 = vpop.f32.mrb[14].mxu1  ;;  %v4754_v37 = vld [vmem:[#allocation2 + $0x398] ss:$0 sm:$0xff] }
 0x72b   :  { %5434 = vmatmul.mubr.msk.f32.vlgmr.msra.gmra.mrb[14].mxu0 %vm33_vm1, %v1389_v30  ;;  %v1561_v10 = vpop.f32.mrb[15].mxu1 }
 0x72c   :  { %6009 = vmatpush3.bf16.msra.mxu0 %v6006_v32 }
 0x72d   :  { %6011 = vmatprep.subr.bf16.mxu0 %v6010_v38 }
 0x730   :  { %6013 = vmatpush3.bf16.msra.mxu0 %v6010_v38 }
 0x731   :  { %6015 = vmatprep.subr.bf16.mxu0 %v6014_v42 }
 0x734   :  { %6017 = vmatpush3.bf16.msra.mxu0 %v6014_v42 }
 0x735   :  { %6019 = vmatprep.subr.bf16.mxu0 %v6018_v45 }
 0x738   :  { %6021 = vmatpush3.bf16.msra.mxu0 %v6018_v45  ;;  %v1706_v45 = vld [vmem:[#allocation2 + $0x3b0] sm:$0xff] }
 0x739   :  { %6023 = vmatprep.subr.bf16.mxu0 %v6022_v52 }
 0x73c   :  { %6025 = vmatpush3.bf16.msra.mxu0 %v6022_v52 }
 0x73d   :  { %6027 = vmatprep.subr.bf16.mxu0 %v6026_v54 }
 0x740   :  { %6029 = vmatpush3.bf16.msra.mxu0 %v6026_v54 }
 0x741   :  { %6031 = vmatprep.subr.bf16.mxu0 %v6030_v56 }
 0x744   :  { %6033 = vmatpush3.bf16.msra.mxu0 %v6030_v56 }
 0x745   :  { %6035 = vmatprep.subr.bf16.mxu0 %v6034_v58 }
 0x748   :  { %6037 = vmatpush3.bf16.msra.mxu0 %v6034_v58 }
 0x7fe   :  { %v5435_v59 = vpop.f32.mrb[14].mxu0 }
 0x7ff   :  { %v1468_v60 = vadd.f32 1e-05, %v5435_v59  ;;  %v1462_v61 = vpop.f32.mrb[15].mxu0  ;;  %v2071_v59 = vld [vmem:[#allocation2 + $0x448] sm:$0xff] }
 0x800   :  { %v1463_v62 = vadd.f32 1e-05, %v1462_v61 }
 0x801   :  { %6332 = vrsqrt.f32 %v1468_v60 }
 0x802   :  { %6334 = vrsqrt.f32 %v1463_v62 }
 0x80b   :  { %v6333_v63 = vpop.eup %6332 }
 0x80c   :  { %v6335_v1 = vpop.eup %6334  ;;  %v1474_v2 = vmul.f32 %v6333_v63, %v6578_v19 }
 0x80d   :  { %v1473_v3 = vmul.f32 %v6335_v1, %v6580_v21 }
 0x80e   :  { %v1481_v5 = vmul.f32 %v4749_v0, %v1474_v2 }
 0x80f   :  { %v1480_v6 = vmul.f32 %v4749_v0, %v1473_v3 }
 0x810   :  { %v1488_v7 = vadd.f32 %v4750_v4, %v1481_v5 }
 0x811   :  { %v1487_v8 = vadd.f32 %v4750_v4, %v1480_v6  ;;  %v1845_v6 = vld [vmem:[#allocation2 + $0x3d8] sm:$0xff] }
 0x812   :  { %v1571_v9 = vmul.f32 %v5440_v39, %v1488_v7  ;;  %v4755_v39 = vld [vmem:[#allocation2 + $0x3a0] ss:$0 sm:$0xff] }
 0x813   :  { %v1570_v48 = vmul.f32 %v1561_v10, %v1487_v8  ;;  %v1846_v7 = vld [vmem:[#allocation2 + $0x3e0] sm:$0xff] }
 0x814   :  { %v6042_v8 = vpack.c.bf16 %v1846_v7, %v1845_v6  ;;  %v4766_v6 = vld [vmem:[#allocation2 + $0x428] ss:$0 sm:$0xff] }
 0x815   :  { %5473 = vmatprep.mubr.f32.mxu0 %v1570_v48  ;;  %v1848_v48 = vld [vmem:[#allocation2 + $0x3f0] sm:$0xff] }
 0x816   :  { %5474 = vmatmul.mubr.f32.vlgmr.msra.gmra.mrb[16].mxu0 %v1571_v9  ;;  %v1847_v9 = vld [vmem:[#allocation2 + $0x3e8] sm:$0xff] }
 0x8e9   :  { %v5475_v51 = vpop.f32.mrb[16].mxu0 }
 0x8ea   :  { %v1654_v11 = vpop.f32.mrb[17].mxu0  ;;  %v1669_v12 = vsel %vm1665_vm7, %v5475_v51, 0.0 }
 0x8eb   :  { %1670 = vadd.xlane.f32.xlu1 %v1669_v12  ;;  %v1666_v13 = vsel %vm1665_vm7, %v1654_v11, 0.0 }
 0x8ec   :  { %1667 = vadd.xlane.f32.xlu0 %v1666_v13 }
 0x978   :  { %v1671_v14 = vpop.xlane.xlu1 %1670 }
 0x979   :  { %v1674_v15 = vmul.f32 0.03125, %v1671_v14  ;;  %v1668_v16 = vpop.xlane.xlu0 %1667 }
 0x97a   :  { %v1673_v17 = vmul.f32 0.03125, %v1668_v16 }
 0x97b   :  { %v1676_v18 = vsub.f32 %v5475_v51, %v1674_v15 }
 0x97c   :  { %v1675_v19 = vsub.f32 %v1654_v11, %v1673_v17 }
 0x97d   :  { %v1678_v20 = vmul.f32 %v1676_v18, %v1676_v18 }
 0x97e   :  { %v1677_v21 = vmul.f32 %v1675_v19, %v1675_v19 }
 0x97f   :  { %v1682_v22 = vsel %vm1665_vm7, %v1678_v20, 0.0  ;;  %v4759_v20 = vld [vmem:[#allocation2 + $0x3d0] ss:$0 sm:$0xff] }
 0x980   :  { %1683 = vadd.xlane.f32.xlu1 %v1682_v22  ;;  %v1679_v23 = vsel %vm1665_vm7, %v1677_v21, 0.0 }
 0x981   :  { %1680 = vadd.xlane.f32.xlu0 %v1679_v23 }
 0x991   :  { %1716 = vperm.xlu1 %6286, %v1708_v25  }
 0x997   :  { %1711 = vperm.xlu0 %6285, %v1707_v26  }
 0xa0d   :  { %v1684_v28 = vpop.xlane.xlu1 %1683 }
 0xa0e   :  { %v1686_v29 = vmul.f32 0.03125, %v1684_v28  ;;  %v1681_v32 = vpop.xlane.xlu0 %1680  ;;  %v1938_v28 = vld [vmem:[#allocation2 + $0x408] sm:$0xff] }
 0xa0f   :  { %v1685_v33 = vmul.f32 0.03125, %v1681_v32  ;;  %v6050_v32 = vpack.c.bf16 %v1938_v28, %v1937_v27 }
 0xa10   :  { %v1688_v34 = vadd.f32 1e-05, %v1686_v29  ;;  %v1939_v29 = vld [vmem:[#allocation2 + $0x410] sm:$0xff] }
 0xa11   :  { %v1687_v35 = vadd.f32 1e-05, %v1685_v33  ;;  %v1717_v46 = vpop.permute.xlu1 %1716  ;;  %v1940_v33 = vld [vmem:[#allocation2 + $0x418] sm:$0xff] }
 0xa12   :  { %6336 = vrsqrt.f32 %v1688_v34  ;;  %v6054_v34 = vpack.c.bf16 %v1940_v33, %v1939_v29 }
 0xa13   :  { %6338 = vrsqrt.f32 %v1687_v35  ;;  %v4760_v35 = vld [vmem:[#allocation2 + $0x3f8] ss:$0 sm:$0xff] }
 0xa16   :  { %v1712_v47 = vpop.permute.xlu0 %1711 }
 0xa1c   :  { %v6337_v36 = vpop.eup %6336 }
 0xa1d   :  { %v6339_v30 = vpop.eup %6338  ;;  %v1692_v38 = vmul.f32 %v6337_v36, %v1676_v18  ;;  %v4758_v18 = vld [vmem:[#allocation2 + $0x3c8] ss:$0 sm:$0xff] }
 0xa1e   :  { %v1691_v10 = vmul.f32 %v6339_v30, %v1675_v19 }
 0xa1f   :  { %v1698_v40 = vmul.f32 %v4754_v37, %v1692_v38 }
 0xa20   :  { %v1697_v41 = vmul.f32 %v4754_v37, %v1691_v10 }
 0xa21   :  { %v1704_v42 = vadd.f32 %v4755_v39, %v1698_v40  ;;  %v4763_v40 = vld [vmem:[#allocation2 + $0x420] ss:$0 sm:$0xff] }
 0xa22   :  { %v1703_v43 = vadd.f32 %v4755_v39, %v1697_v41 }
 0xa24   :  { %v6038_v44 = vpack.c.bf16 %v1704_v42, %v1703_v43 }
 0xa26   :  { %6039 = vmatprep.subr.bf16.mxu1 %v6038_v44 }
 0xa27   :  { %6041 = vmatpush3.bf16.msra.mxu1 %v6038_v44 }
 0xa28   :  { %6043 = vmatprep.subr.bf16.mxu1 %v6042_v8 }
 0xa2a   :  { %5481 = vmatmul.mubr.msk.f32.vlgmr.msra.gmra.mrb[16].mxu1 %vm1719_vm8, %v1706_v45 }
 0xa2b   :  { %6045 = vmatpush3.bf16.msra.mxu1 %v6042_v8 }
 0xafd   :  { %v5482_v49 = vpop.f32.mrb[16].mxu1 }
 0xafe   :  { %v1798_v52 = vadd.f32 %v5482_v49, %v1717_v46  ;;  %v1792_v53 = vpop.f32.mrb[17].mxu1 }
 0xaff   :  { %v1793_v54 = vadd.f32 %v1792_v53, %v1712_v47 }
 0xb00   :  { %6340 = vtanh.f32 %v1798_v52 }
 0xb01   :  { %6342 = vtanh.f32 %v1793_v54 }
 0xb0a   :  { %v6341_v55 = vpop.eup %6340 }
 0xb0b   :  { %v6343_v50 = vpop.eup %6342  ;;  %v6600_v56 = vadd.f32 %v6341_v55, %v5475_v51  ;;  %v6046_v51 = vpack.c.bf16 %v1848_v48, %v1847_v9  ;;  %v4767_v48 = vld [vmem:[#allocation2 + $0x430] ss:$0 sm:$0xff] }
 0xb0c   :  { %v6602_v31 = vadd.f32 %v6343_v50, %v1654_v11 }
 0xb0d   :  { %v1810_v57 = vsel %vm1665_vm7, %v6600_v56, 0.0  ;;  %6047 = vmatprep.subr.bf16.mxu1 %v6046_v51 }
 0xb0e   :  { %1811 = vadd.xlane.f32.xlu0 %v1810_v57  ;;  %v1807_v58 = vsel %vm1665_vm7, %v6602_v31, 0.0  ;;  %6049 = vmatpush3.bf16.msra.mxu1 %v6046_v51 }
 0xb0f   :  { %1808 = vadd.xlane.f32.xlu1 %v1807_v58  ;;  %6051 = vmatprep.subr.bf16.mxu1 %v6050_v32 }
 0xb24   :  { %2075 = vperm.xlu0 %6285, %v2071_v59  }
 0xb9b   :  { %v1812_v60 = vpop.xlane.xlu0 %1811 }
 0xb9c   :  { %v1814_v61 = vmul.f32 0.03125, %v1812_v60  ;;  %v1809_v62 = vpop.xlane.xlu1 %1808 }
 0xb9d   :  { %v1813_v63 = vmul.f32 0.03125, %v1809_v62 }
 0xb9e   :  { %v1816_v0 = vsub.f32 %v6600_v56, %v1814_v61  ;;  %v2069_v61 = vld [vmem:[#allocation2 + $0x438] sm:$0xff] }
 0xb9f   :  { %v1815_v1 = vsub.f32 %v6602_v31, %v1813_v63 }
 0xba0   :  { %v1818_v4 = vmul.f32 %v1816_v0, %v1816_v0 }
 0xba1   :  { %v1817_v2 = vmul.f32 %v1815_v1, %v1815_v1 }
 0xba2   :  { %v1822_v5 = vsel %vm1665_vm7, %v1818_v4, 0.0 }
 0xba3   :  { %v1819_v3 = vsel %vm1665_vm7, %v1817_v2, 0.0 }
 0xba4   :  { %1820 = vadd.xlane.f32.xlu1 %v1819_v3 }
 0xba8   :  { %1823 = vadd.xlane.f32.xlu1 %v1822_v5 }
 0xc31   :  { %v1821_v11 = vpop.xlane.xlu1 %1820 }
 0xc32   :  { %v1825_v12 = vmul.f32 0.03125, %v1821_v11 }
 0xc34   :  { %v1827_v13 = vadd.f32 1e-05, %v1825_v12 }
 0xc35   :  { %v1824_v14 = vpop.xlane.xlu1 %1823 }
 0xc36   :  { %6344 = vrsqrt.f32 %v1827_v13  ;;  %v1826_v15 = vmul.f32 0.03125, %v1824_v14  ;;  %v2070_v14 = vld [vmem:[#allocation2 + $0x440] sm:$0xff] }
 0xc38   :  { %v1828_v16 = vadd.f32 1e-05, %v1826_v15 }
 0xc3a   :  { %6346 = vrsqrt.f32 %v1828_v16 }
 0xc40   :  { %v6345_v17 = vpop.eup %6344 }
 0xc41   :  { %v1831_v19 = vmul.f32 %v6345_v17, %v1815_v1  ;;  %v2076_v17 = vpop.permute.xlu0 %2075 }
 0xc43   :  { %v1837_v21 = vmul.f32 %v4758_v18, %v1831_v19 }
 0xc44   :  { %v6347_v22 = vpop.eup %6346 }
 0xc45   :  { %v1832_v23 = vmul.f32 %v6347_v22, %v1816_v0  ;;  %v1843_v24 = vadd.f32 %v4759_v20, %v1837_v21 }
 0xc47   :  { %v1838_v25 = vmul.f32 %v4758_v18, %v1832_v23  ;;  %5491 = vmatprep.mubr.msk.f32.mxu1 %vm1665_vm7, %v1843_v24 }
 0xc49   :  { %v1844_v26 = vadd.f32 %v4759_v20, %v1838_v25 }
 0xc4b   :  { %5492 = vmatmul.mubr.msk.f32.vlgmr.msra.gmra.mrb[18].mxu1 %vm1665_vm7, %v1844_v26 }
 0xc4c   :  { %6053 = vmatpush3.bf16.msra.mxu1 %v6050_v32 }
 0xc4d   :  { %6055 = vmatprep.subr.bf16.mxu1 %v6054_v34 }
 0xc50   :  { %6057 = vmatpush3.bf16.msra.mxu1 %v6054_v34 }
 0xd1e   :  { %v5493_v36 = vpop.f32.mrb[18].mxu1 }
 0xd1f   :  { %v1932_v37 = vadd.f32 %v5493_v36, %v4760_v35  ;;  %v1926_v30 = vpop.f32.mrb[19].mxu1 }
 0xd20   :  { %v1927_v38 = vadd.f32 %v4760_v35, %v1926_v30 }
 0xd22   :  { %6348 = vtanh.f32 %v1927_v38  ;;  %v2208_v38 = vld [vmem:[#allocation2 + $0x468] sm:$0xff] }
 0xd23   :  { %6350 = vtanh.f32 %v1932_v37 }
 0xd2c   :  { %v6349_v39 = vpop.eup %6348 }
 0xd2d   :  { %v6351_v10 = vpop.eup %6350  ;;  %5502 = vmatprep.mubr.msk.f32.mxu1 %vm1665_vm7, %v6349_v39  ;;  %v2209_v39 = vld [vmem:[#allocation2 + $0x470] sm:$0xff] }
 0xd2e   :  { %5503 = vmatmul.mubr.msk.f32.vlgmr.msra.gmra.mrb[20].mxu1 %vm1665_vm7, %v6351_v10  ;;  %v6062_v10 = vpack.c.bf16 %v2209_v39, %v2208_v38  ;;  %v2898_v38 = vld [vmem:[#allocation2 + $0x648] sm:$0xff] }
 0xd2f   :  { %5509 = vmatprep.mubr.msk.f32.mxu1 %vm1719_vm8, %v2069_v61  ;;  %v2301_v61 = vld [vmem:[#allocation2 + $0x498] sm:$0xff] }
 0xe01   :  { %v5504_v41 = vpop.f32.mrb[20].mxu1 }
 0xe02   :  { %v2018_v42 = vpop.f32.mrb[21].mxu1  ;;  %v2024_v43 = vadd.f32 %v5504_v41, %v4763_v40  ;;  %v2211_v41 = vld [vmem:[#allocation2 + $0x480] sm:$0xff] }
 0xe03   :  { %v2019_v44 = vadd.f32 %v4763_v40, %v2018_v42  ;;  %v2210_v40 = vld [vmem:[#allocation2 + $0x478] sm:$0xff] }
 0xe04   :  { %v2028_v46 = vadd.f32 %v2024_v43, %v6600_v56  ;;  %v2072_v56 = vld [vmem:[#allocation2 + $0x450] sm:$0xff]  ;;  %v6066_v42 = vpack.c.bf16 %v2211_v41, %v2210_v40  ;;  %v2769_v40 = vld [vmem:[#allocation2 + $0x588] sm:$0xff] }
 0xe05   :  { %v2027_v45 = vadd.f32 %v2019_v44, %v6602_v31  ;;  %v2770_v41 = vld [vmem:[#allocation2 + $0x590] sm:$0xff] }
 0xe06   :  { %v2034_v49 = vsel %vm1665_vm7, %v2028_v46, 0.0 }
 0xe07   :  { %v2031_v47 = vsel %vm1665_vm7, %v2027_v45, 0.0 }
 0xe08   :  { %2032 = vadd.xlane.f32.xlu1 %v2031_v47 }
 0xe0c   :  { %2035 = vadd.xlane.f32.xlu1 %v2034_v49 }
 0xe95   :  { %v2033_v52 = vpop.xlane.xlu1 %2032 }
 0xe96   :  { %v2037_v53 = vmul.f32 0.03125, %v2033_v52 }
 0xe98   :  { %v2039_v54 = vsub.f32 %v2027_v45, %v2037_v53  ;;  %v4770_v53 = vld [vmem:[#allocation2 + $0x458] ss:$0 sm:$0xff] }
 0xe99   :  { %v2036_v55 = vpop.xlane.xlu1 %2035 }
 0xe9a   :  { %v2038_v50 = vmul.f32 0.03125, %v2036_v55  ;;  %v2041_v57 = vmul.f32 %v2039_v54, %v2039_v54 }
 0xe9c   :  { %v2040_v58 = vsub.f32 %v2028_v46, %v2038_v50  ;;  %v2043_v59 = vsel %vm1665_vm7, %v2041_v57, 0.0  ;;  %v4771_v57 = vld [vmem:[#allocation2 + $0x460] ss:$0 sm:$0xff] }
 0xe9d   :  { %2044 = vadd.xlane.f32.xlu1 %v2043_v59 }
 0xe9e   :  { %v2042_v60 = vmul.f32 %v2040_v58, %v2040_v58 }
 0xea0   :  { %v2046_v31 = vsel %vm1665_vm7, %v2042_v60, 0.0 }
 0xea1   :  { %2047 = vadd.xlane.f32.xlu1 %v2046_v31 }
 0xeb2   :  { %2080 = vperm.xlu1 %6286, %v2072_v56   ;;  %v2300_v56 = vld [vmem:[#allocation2 + $0x490] sm:$0xff] }
 0xf2a   :  { %v2045_v62 = vpop.xlane.xlu1 %2044 }
 0xf2b   :  { %v2049_v63 = vmul.f32 0.03125, %v2045_v62  ;;  %v2302_v62 = vld [vmem:[#allocation2 + $0x4a0] sm:$0xff] }
 0xf2d   :  { %v2051_v0 = vadd.f32 1e-05, %v2049_v63  ;;  %v6070_v63 = vpack.c.bf16 %v2301_v61, %v2300_v56  ;;  %v4778_v61 = vld [vmem:[#allocation2 + $0x4d8] ss:$0 sm:$0xff] }
 0xf2e   :  { %v2048_v1 = vpop.xlane.xlu1 %2047 }
 0xf2f   :  { %6352 = vrsqrt.f32 %v2051_v0  ;;  %v2050_v2 = vmul.f32 0.03125, %v2048_v1  ;;  %v2303_v0 = vld [vmem:[#allocation2 + $0x4a8] sm:$0xff]  ;;  %6071 = vmatprep.subr.bf16.mxu0 %v6070_v63 }
 0xf30   :  { %v6074_v1 = vpack.c.bf16 %v2303_v0, %v2302_v62  ;;  %6073 = vmatpush3.bf16.msra.mxu0 %v6070_v63 }
 0xf31   :  { %v2052_v3 = vadd.f32 1e-05, %v2050_v2  ;;  %v2392_v2 = vld [vmem:[#allocation2 + $0x4b8] sm:$0xff] }
 0xf32   :  { %v2081_v15 = vpop.permute.xlu1 %2080  ;;  %6075 = vmatprep.subr.bf16.mxu0 %v6074_v1 }
 0xf33   :  { %6354 = vrsqrt.f32 %v2052_v3  ;;  %v2393_v3 = vld [vmem:[#allocation2 + $0x4c0] sm:$0xff] }
 0xf34   :  { %6077 = vmatpush3.bf16.msra.mxu0 %v6074_v1 }
 0xf39   :  { %v6353_v4 = vpop.eup %6352 }
 0xf3a   :  { %v2055_v5 = vmul.f32 %v6353_v4, %v2039_v54  ;;  %v6078_v4 = vpack.c.bf16 %v2393_v3, %v2392_v2  ;;  %v2899_v2 = vld [vmem:[#allocation2 + $0x650] sm:$0xff]  ;;  %v2900_v3 = vld [vmem:[#allocation2 + $0x658] sm:$0xff] }
 0xf3c   :  { %v2061_v9 = vmul.f32 %v4766_v6, %v2055_v5  ;;  %v4772_v5 = vld [vmem:[#allocation2 + $0x488] ss:$0 sm:$0xff] }
 0xf3d   :  { %v6355_v7 = vpop.eup %6354 }
 0xf3e   :  { %v2056_v8 = vmul.f32 %v6355_v7, %v2040_v58  ;;  %v2067_v11 = vadd.f32 %v4767_v48, %v2061_v9 }
 0xf40   :  { %v2062_v51 = vmul.f32 %v4766_v6, %v2056_v8 }
 0xf42   :  { %v2068_v12 = vadd.f32 %v4767_v48, %v2062_v51 }
 0xf44   :  { %v6058_v13 = vpack.c.bf16 %v2068_v12, %v2067_v11  ;;  %v2394_v11 = vld [vmem:[#allocation2 + $0x4c8] sm:$0xff]  ;;  %v2395_v12 = vld [vmem:[#allocation2 + $0x4d0] sm:$0xff] }
 0xf46   :  { %6059 = vmatprep.subr.bf16.mxu1 %v6058_v13 }
 0xf47   :  { %6061 = vmatpush3.bf16.msra.mxu1 %v6058_v13  ;;  %v6082_v13 = vpack.c.bf16 %v2395_v12, %v2394_v11  ;;  %v2903_v12 = vld [vmem:[#allocation2 + $0x670] sm:$0xff] }
 0xf48   :  { %6063 = vmatprep.subr.bf16.mxu1 %v6062_v10 }
 0xf4a   :  { %5510 = vmatmul.mubr.msk.f32.vlgmr.msra.gmra.mrb[22].mxu1 %vm1719_vm8, %v2070_v14  ;;  %v6640_v14 = vld [vmem:[#allocation2 + $0x4e0] sm:$0xff] }
 0xf4b   :  { %6065 = vmatpush3.bf16.msra.mxu1 %v6062_v10  ;;  %v2768_v10 = vld [vmem:[#allocation2 + $0x580] sm:$0xff] }
 0xf4c   :  { %6067 = vmatprep.subr.bf16.mxu1 %v6066_v42 }
 0xf4f   :  { %6069 = vmatpush3.bf16.msra.mxu1 %v6066_v42  ;;  %v6098_v42 = vpack.c.bf16 %v2769_v40, %v2768_v10  ;;  %v2912_v10 = vld [vmem:[#allocation2 + $0x6b8] sm:$0xff] }
 0xf50   :  { %6079 = vmatprep.subr.bf16.mxu1 %v6078_v4 }
0x101d   :  { %v5511_v16 = vpop.f32.mrb[22].mxu1 }
0x101e   :  { %v2161_v18 = vadd.f32 %v5511_v16, %v2081_v15  ;;  %v2155_v19 = vpop.f32.mrb[23].mxu1  ;;  %v2619_v15 = vld [vmem:[#allocation2 + $0x520] sm:$0xff]  ;;  %v2620_v16 = vld [vmem:[#allocation2 + $0x528] sm:$0xff] }
0x101f   :  { %v2156_v20 = vadd.f32 %v2155_v19, %v2076_v17  ;;  %v6090_v17 = vpack.c.bf16 %v2620_v16, %v2619_v15 }
0x1020   :  { %6356 = vtanh.f32 %v2161_v18  ;;  %v4775_v18 = vld [vmem:[#allocation2 + $0x4b0] ss:$0 sm:$0xff] }
0x1021   :  { %6358 = vtanh.f32 %v2156_v20 }
0x102a   :  { %v6357_v21 = vpop.eup %6356 }
0x102b   :  { %v6359_v22 = vpop.eup %6358  ;;  %v6624_v23 = vadd.f32 %v6357_v21, %v2028_v46 }
0x102c   :  { %v6626_v24 = vadd.f32 %v6359_v22, %v2027_v45 }
0x102d   :  { %v2173_v25 = vsel %vm1665_vm7, %v6624_v23, 0.0 }
0x102e   :  { %2174 = vadd.xlane.f32.xlu0 %v2173_v25  ;;  %v2170_v26 = vsel %vm1665_vm7, %v6626_v24, 0.0 }
0x102f   :  { %2171 = vadd.xlane.f32.xlu1 %v2170_v26 }
0x10bb   :  { %v2175_v27 = vpop.xlane.xlu0 %2174 }
0x10bc   :  { %v2177_v28 = vmul.f32 0.03125, %v2175_v27  ;;  %v2172_v29 = vpop.xlane.xlu1 %2171 }
0x10bd   :  { %v2176_v32 = vmul.f32 0.03125, %v2172_v29  ;;  %v6658_v29 = vld [vmem:[#allocation2 + $0x4f0] sm:$0xff] }
0x10be   :  { %v2179_v33 = vsub.f32 %v6624_v23, %v2177_v28  ;;  %v6656_v28 = vld [vmem:[#allocation2 + $0x4e8] sm:$0xff] }
0x10bf   :  { %v2178_v34 = vsub.f32 %v6626_v24, %v2176_v32  ;;  %v6672_v32 = vld [vmem:[#allocation2 + $0x508] sm:$0xff] }
0x10c0   :  { %v2181_v35 = vmul.f32 %v2179_v33, %v2179_v33 }
0x10c1   :  { %v2180_v36 = vmul.f32 %v2178_v34, %v2178_v34 }
0x10c2   :  { %v2185_v37 = vsel %vm1665_vm7, %v2181_v35, 0.0  ;;  %v2621_v35 = vld [vmem:[#allocation2 + $0x530] sm:$0xff] }
0x10c3   :  { %2186 = vadd.xlane.f32.xlu1 %v2185_v37  ;;  %v2182_v30 = vsel %vm1665_vm7, %v2180_v36, 0.0  ;;  %v2622_v36 = vld [vmem:[#allocation2 + $0x538] sm:$0xff] }
0x10c4   :  { %2183 = vadd.xlane.f32.xlu0 %v2182_v30  ;;  %v6094_v37 = vpack.c.bf16 %v2622_v36, %v2621_v35  ;;  %v2897_v30 = vld [vmem:[#allocation2 + $0x640] sm:$0xff]  ;;  %v2908_v35 = vld [vmem:[#allocation2 + $0x698] sm:$0xff] }
0x10c5   :  { %v6130_v39 = vpack.c.bf16 %v2898_v38, %v2897_v30  ;;  %v2910_v30 = vld [vmem:[#allocation2 + $0x6a8] sm:$0xff] }
0x1150   :  { %v2187_v43 = vpop.xlane.xlu1 %2186 }
0x1151   :  { %v2189_v44 = vmul.f32 0.03125, %v2187_v43  ;;  %v2184_v45 = vpop.xlane.xlu0 %2183  ;;  %v2771_v43 = vld [vmem:[#allocation2 + $0x598] sm:$0xff] }
0x1152   :  { %v2188_v46 = vmul.f32 0.03125, %v2184_v45  ;;  %v2772_v45 = vld [vmem:[#allocation2 + $0x5a0] sm:$0xff] }
0x1153   :  { %v2191_v47 = vadd.f32 1e-05, %v2189_v44  ;;  %v6102_v44 = vpack.c.bf16 %v2771_v43, %v2770_v41  ;;  %v2782_v41 = vld [vmem:[#allocation2 + $0x5f0] sm:$0xff] }
0x1154   :  { %v2190_v49 = vadd.f32 1e-05, %v2188_v46  ;;  %v2773_v46 = vld [vmem:[#allocation2 + $0x5a8] sm:$0xff] }
0x1155   :  { %6360 = vrsqrt.f32 %v2191_v47  ;;  %v6106_v47 = vpack.c.bf16 %v2773_v46, %v2772_v45  ;;  %v2753_v46 = vld [vmem:[#allocation2 + $0x548] sm:$0xff] }
0x1156   :  { %6362 = vrsqrt.f32 %v2190_v49  ;;  %v2774_v49 = vld [vmem:[#allocation2 + $0x5b0] sm:$0xff] }
0x115f   :  { %v6361_v52 = vpop.eup %6360 }
0x1160   :  { %v6363_v54 = vpop.eup %6362  ;;  %v2195_v55 = vmul.f32 %v6361_v52, %v2179_v33  ;;  %v6674_v33 = vld [vmem:[#allocation2 + $0x510] sm:$0xff]  ;;  %v2775_v52 = vld [vmem:[#allocation2 + $0x5b8] sm:$0xff] }
0x1161   :  { %v2194_v50 = vmul.f32 %v6363_v54, %v2178_v34  ;;  %v6680_v34 = vld [vmem:[#allocation2 + $0x518] sm:$0xff]  ;;  %v2776_v54 = vld [vmem:[#allocation2 + $0x5c0] sm:$0xff] }
0x1162   :  { %v2201_v58 = vmul.f32 %v4770_v53, %v2195_v55  ;;  %v2777_v55 = vld [vmem:[#allocation2 + $0x5c8] sm:$0xff] }
0x1163   :  { %v2200_v59 = vmul.f32 %v4770_v53, %v2194_v50  ;;  %v6110_v53 = vpack.c.bf16 %v2775_v52, %v2774_v49  ;;  %v6114_v50 = vpack.c.bf16 %v2777_v55, %v2776_v54  ;;  %v2755_v52 = vld [vmem:[#allocation2 + $0x558] sm:$0xff]  ;;  %v2754_v54 = vld [vmem:[#allocation2 + $0x550] sm:$0xff] }
0x1164   :  { %v2207_v31 = vadd.f32 %v4771_v57, %v2201_v58  ;;  %v2779_v58 = vld [vmem:[#allocation2 + $0x5d8] sm:$0xff] }
0x1165   :  { %v2206_v60 = vadd.f32 %v4771_v57, %v2200_v59  ;;  %v2778_v57 = vld [vmem:[#allocation2 + $0x5d0] sm:$0xff] }
0x1166   :  { %v6118_v59 = vpack.c.bf16 %v2779_v58, %v2778_v57 }
0x1167   :  { %5520 = vmatprep.mubr.msk.f32.mxu1 %vm1665_vm7, %v2206_v60  ;;  %v2780_v60 = vld [vmem:[#allocation2 + $0x5e0] sm:$0xff] }
0x1168   :  { %5521 = vmatmul.mubr.msk.f32.vlgmr.msra.gmra.mrb[24].mxu1 %vm1665_vm7, %v2207_v31  ;;  %v2781_v31 = vld [vmem:[#allocation2 + $0x5e8] sm:$0xff] }
0x1169   :  { %6081 = vmatpush3.bf16.msra.mxu1 %v6078_v4  ;;  %v6122_v56 = vpack.c.bf16 %v2781_v31, %v2780_v60  ;;  %v2756_v60 = vld [vmem:[#allocation2 + $0x560] sm:$0xff] }
0x116a   :  { %6083 = vmatprep.subr.bf16.mxu1 %v6082_v13 }
0x116d   :  { %6085 = vmatpush3.bf16.msra.mxu1 %v6082_v13  ;;  %v2904_v13 = vld [vmem:[#allocation2 + $0x678] sm:$0xff] }
0x116e   :  { %6091 = vmatprep.subr.bf16.mxu1 %v6090_v17 }
0x123b   :  { %v5522_v6 = vpop.f32.mrb[24].mxu1 }
0x123c   :  { %v2295_v7 = vadd.f32 %v5522_v6, %v4772_v5  ;;  %v2289_v8 = vpop.f32.mrb[25].mxu1 }
0x123d   :  { %v2290_v9 = vadd.f32 %v4772_v5, %v2289_v8  ;;  %v2901_v8 = vld [vmem:[#allocation2 + $0x660] sm:$0xff] }
0x123f   :  { %6364 = vtanh.f32 %v2290_v9  ;;  %v2902_v9 = vld [vmem:[#allocation2 + $0x668] sm:$0xff] }
0x1240   :  { %6366 = vtanh.f32 %v2295_v7  ;;  %v6134_v7 = vpack.c.bf16 %v2900_v3, %v2899_v2  ;;  %v6138_v11 = vpack.c.bf16 %v2902_v9, %v2901_v8 }
0x1249   :  { %v6365_v48 = vpop.eup %6364 }
0x124a   :  { %v6367_v51 = vpop.eup %6366  ;;  %5531 = vmatprep.mubr.msk.f32.mxu0 %vm1665_vm7, %v6365_v48 }
0x124b   :  { %5532 = vmatmul.mubr.msk.f32.vlgmr.msra.gmra.mrb[18].mxu0 %vm1665_vm7, %v6367_v51 }
0x124c   :  { %5549 = vmatprep.mubr.msk.f32.mxu0 %vm1719_vm8, %v6640_v14 }
0x131e   :  { %v5533_v19 = vpop.f32.mrb[18].mxu0 }
0x131f   :  { %v2387_v20 = vadd.f32 %v5533_v19, %v4775_v18  ;;  %v2381_v21 = vpop.f32.mrb[19].mxu0  ;;  %v2906_v19 = vld [vmem:[#allocation2 + $0x688] sm:$0xff] }
0x1320   :  { %v2382_v22 = vadd.f32 %v4775_v18, %v2381_v21  ;;  %v2905_v18 = vld [vmem:[#allocation2 + $0x680] sm:$0xff] }
0x1321   :  { %v6645_v25 = vadd.f32 %v2387_v20, %v6624_v23  ;;  %v6664_v23 = vld [vmem:[#allocation2 + $0x4f8] sm:$0xff]  ;;  %v6146_v21 = vpack.c.bf16 %v2906_v19, %v2905_v18  ;;  %v2917_v18 = vld [vmem:[#allocation2 + $0x6e0] sm:$0xff] }
0x1322   :  { %v6648_v26 = vadd.f32 %v2382_v22, %v6626_v24  ;;  %v6666_v24 = vld [vmem:[#allocation2 + $0x500] sm:$0xff] }
0x1324   :  { %5542 = vmatprep.mubr.msk.f32.mxu1 %vm1665_vm7, %v6648_v26  ;;  %v6086_v27 = vpack.c.bf16 %v6645_v25, %v6648_v26 }
0x1325   :  { %5543 = vmatmul.mubr.msk.f32.vlgmr.msra.gmra.mrb[26].mxu1 %vm1665_vm7, %v6645_v25 }
0x1326   :  { %6087 = vmatprep.subr.bf16.mxu0 %v6086_v27  ;;  %6093 = vmatpush3.bf16.msra.mxu1 %v6090_v17  ;;  %v6142_v17 = vpack.c.bf16 %v2904_v13, %v2903_v12 }
0x1327   :  { %6089 = vmatpush3.bf16.msra.mxu0 %v6086_v27  ;;  %6095 = vmatprep.subr.bf16.mxu1 %v6094_v37  ;;  %v2907_v27 = vld [vmem:[#allocation2 + $0x690] sm:$0xff] }
0x1328   :  { %6099 = vmatprep.subr.bf16.mxu0 %v6098_v42  ;;  %v6150_v36 = vpack.c.bf16 %v2908_v35, %v2907_v27 }
0x132a   :  { %5550 = vmatmul.mubr.msk.f32.vlgmr.msra.gmra.mrb[20].mxu0 %vm1719_vm8, %v6656_v28  ;;  %6097 = vmatpush3.bf16.msra.mxu1 %v6094_v37  ;;  %v2909_v37 = vld [vmem:[#allocation2 + $0x6a0] sm:$0xff] }
0x132b   :  { %5552 = vmatprep.mubr.msk.f32.mxu0 %vm1719_vm8, %v6658_v29  ;;  %6131 = vmatprep.subr.bf16.mxu1 %v6130_v39  ;;  %v6154_v38 = vpack.c.bf16 %v2910_v30, %v2909_v37  ;;  %v2920_v37 = vld [vmem:[#allocation2 + $0x6f8] sm:$0xff]  ;;  %v2919_v30 = vld [vmem:[#allocation2 + $0x6f0] sm:$0xff] }
0x132c   :  { %6101 = vmatpush3.bf16.msra.mxu0 %v6098_v42  ;;  %v2783_v42 = vld [vmem:[#allocation2 + $0x5f8] sm:$0xff] }
0x132d   :  { %6103 = vmatprep.subr.bf16.mxu0 %v6102_v44  ;;  %v6126_v43 = vpack.c.bf16 %v2783_v42, %v2782_v41 }
0x132e   :  { %5553 = vmatmul.mubr.msk.f32.gmra.mrb[22].mxu0 %vm1719_vm8, %v6664_v23 }
0x132f   :  { %5555 = vmatprep.mubr.msk.f32.mxu0 %vm1719_vm8, %v6666_v24 }
0x1330   :  { %6105 = vmatpush3.bf16.msra.mxu0 %v6102_v44  ;;  %v2752_v44 = vld [vmem:[#allocation2 + $0x540] sm:$0xff] }
0x1331   :  { %6107 = vmatprep.subr.bf16.mxu0 %v6106_v47 }
0x1332   :  { %5556 = vmatmul.mubr.msk.f32.gmra.mrb[24].mxu0 %vm1719_vm8, %v6672_v32 }
0x1333   :  { %5558 = vmatprep.mubr.msk.f32.mxu0 %vm1719_vm8, %v6674_v33 }
0x1334   :  { %6109 = vmatpush3.bf16.msra.mxu0 %v6106_v47 }
0x1335   :  { %6111 = vmatprep.subr.bf16.mxu0 %v6110_v53 }
0x1336   :  { %5559 = vmatmul.mubr.msk.f32.gmra.mrb[26].mxu0 %vm1719_vm8, %v6680_v34 }
0x1338   :  { %6113 = vmatpush3.bf16.msra.mxu0 %v6110_v53 }
0x1339   :  { %6115 = vmatprep.subr.bf16.mxu0 %v6114_v50 }
0x133c   :  { %6117 = vmatpush3.bf16.msra.mxu0 %v6114_v50 }
0x133d   :  { %6119 = vmatprep.subr.bf16.mxu0 %v6118_v59 }
0x1340   :  { %6121 = vmatpush3.bf16.msra.mxu0 %v6118_v59  ;;  %v2757_v59 = vld [vmem:[#allocation2 + $0x568] sm:$0xff] }
0x1341   :  { %6123 = vmatprep.subr.bf16.mxu0 %v6122_v56 }
0x1344   :  { %6125 = vmatpush3.bf16.msra.mxu0 %v6122_v56 }
0x1345   :  { %6127 = vmatprep.subr.bf16.mxu0 %v6126_v43 }
0x1348   :  { %6129 = vmatpush3.bf16.msra.mxu0 %v6126_v43 }
0x13f8   :  { %v5544_v62 = vpop.f32.mrb[26].mxu1 }
0x13f9   :  { %v2479_v63 = vadd.f32 %v5544_v62, %v4778_v61  ;;  %v2473_v0 = vpop.f32.mrb[27].mxu1 }
0x13fa   :  { %v2474_v1 = vadd.f32 %v4778_v61, %v2473_v0  ;;  %v2758_v0 = vld [vmem:[#allocation2 + $0x570] sm:$0xff] }
0x13fc   :  { %v6684_v4 = vpack.c.bf16 %v2479_v63, %v2474_v1  ;;  %v2759_v63 = vld [vmem:[#allocation2 + $0x578] sm:$0xff] }
0x13fd   :  { %v5551_v5 = vpop.f32.mrb[20].mxu0 }
0x13fe   :  { %v2580_v6 = vpop.f32.mrb[21].mxu0 }
0x13ff   :  { %5569 = vmatprep.mubr.msk.f32.mxu1 %vm1665_vm7, %v2580_v6 }
0x1400   :  { %5570 = vmatmul.mubr.msk.f32.vlgmr.msra.gmra.mrb[28].mxu1 %vm1665_vm7, %v5551_v5  ;;  %v2913_v5 = vld [vmem:[#allocation2 + $0x6c0] sm:$0xff] }
0x1401   :  { %6133 = vmatpush3.bf16.msra.mxu1 %v6130_v39  ;;  %v5554_v48 = vpop.f32.mrb[22].mxu0  ;;  %v2911_v39 = vld [vmem:[#allocation2 + $0x6b0] sm:$0xff] }
0x1402   :  { %v2590_v51 = vpop.f32.mrb[23].mxu0  ;;  %6135 = vmatprep.subr.bf16.mxu1 %v6134_v7  ;;  %v6158_v40 = vpack.c.bf16 %v2912_v10, %v2911_v39 }
0x1403   :  { %5572 = vmatprep.mubr.msk.f32.mxu1 %vm1665_vm7, %v2590_v51  ;;  %v2915_v51 = vld [vmem:[#allocation2 + $0x6d0] sm:$0xff] }
0x1404   :  { %5573 = vmatmul.mubr.msk.f32.gmra.mrb[30].mxu1 %vm1665_vm7, %v5554_v48  ;;  %v2916_v48 = vld [vmem:[#allocation2 + $0x6d8] sm:$0xff] }
0x1405   :  { %6137 = vmatpush3.bf16.msra.mxu1 %v6134_v7  ;;  %v5557_v15 = vpop.f32.mrb[24].mxu0 }
0x1406   :  { %6139 = vmatprep.subr.bf16.mxu1 %v6138_v11  ;;  %v2600_v16 = vpop.f32.mrb[25].mxu0 }
0x1407   :  { %5575 = vmatprep.mubr.msk.f32.mxu1 %vm1665_vm7, %v2600_v16 }
0x1408   :  { %5576 = vmatmul.mubr.msk.f32.gmra.mrb[32].mxu1 %vm1665_vm7, %v5557_v15 }
0x1409   :  { %6141 = vmatpush3.bf16.msra.mxu1 %v6138_v11  ;;  %v5560_v20 = vpop.f32.mrb[26].mxu0 }
0x140a   :  { %6143 = vmatprep.subr.bf16.mxu1 %v6142_v17  ;;  %v2610_v22 = vpop.f32.mrb[27].mxu0 }
0x140b   :  { %5578 = vmatprep.mubr.msk.f32.mxu1 %vm1665_vm7, %v2610_v22 }
0x140c   :  { %5579 = vmatmul.mubr.msk.f32.gmra.mrb[34].mxu1 %vm1665_vm7, %v5560_v20 }
0x140d   :  { %6145 = vmatpush3.bf16.msra.mxu1 %v6142_v17  ;;  %v2918_v17 = vld [vmem:[#allocation2 + $0x6e8] sm:$0xff] }
0x140e   :  { %6147 = vmatprep.subr.bf16.mxu1 %v6146_v21 }
0x1411   :  { %6149 = vmatpush3.bf16.msra.mxu1 %v6146_v21 }
0x1412   :  { %6151 = vmatprep.subr.bf16.mxu1 %v6150_v36 }
0x1415   :  { %6153 = vmatpush3.bf16.msra.mxu1 %v6150_v36 }
0x1416   :  { %6155 = vmatprep.subr.bf16.mxu1 %v6154_v38 }
0x1419   :  { %6157 = vmatpush3.bf16.msra.mxu1 %v6154_v38 }
0x141a   :  { %6159 = vmatprep.subr.bf16.mxu1 %v6158_v40 }
0x141d   :  { %6161 = vmatpush3.bf16.msra.mxu1 %v6158_v40 }
0x141e   :  { %6187 = vmatprep.subr.bf16.mxu1 %v6684_v4 }
0x14d3   :  { %v5571_v45 = vpop.f32.mrb[28].mxu1 }
0x14d4   :  { %v2713_v47 = vpop.f32.mrb[29].mxu1  ;;  %v2761_v53 = vmul.f32 %v5571_v45, %v2753_v46  ;;  %v2785_v45 = vld [vmem:[#allocation2 + $0x608] sm:$0xff]  ;;  %v2786_v46 = vld [vmem:[#allocation2 + $0x610] sm:$0xff] }
0x14d5   :  { %v2760_v49 = vmul.f32 %v2752_v44, %v2713_v47 }
0x14d7   :  { %v5574_v55 = vpop.f32.mrb[30].mxu1  ;;  %5613 = vmatprep.mubr.f32.mxu0 %v2760_v49  ;;  %5657 = vmatprep.mubr.f32.mxu1 %v2760_v49  ;;  %v2787_v49 = vld [vmem:[#allocation2 + $0x618] sm:$0xff] }
0x14d8   :  { %v2763_v50 = vmul.f32 %v5574_v55, %v2755_v52  ;;  %v2723_v57 = vpop.f32.mrb[31].mxu1  ;;  %5614 = vmatmul.mubr.f32.vlgmr.msra.gmra.mrb[28].mxu0 %v2761_v53  ;;  %5658 = vmatmul.mubr.f32.vlgmr.msra.gmra.mrb[36].mxu1 %v2761_v53  ;;  %v2788_v53 = vld [vmem:[#allocation2 + $0x620] sm:$0xff]  ;;  %v2789_v55 = vld [vmem:[#allocation2 + $0x628] sm:$0xff] }
0x14d9   :  { %v2762_v58 = vmul.f32 %v2754_v54, %v2723_v57  ;;  %6189 = vmatpush3.bf16.msra.mxu1 %v6684_v4  ;;  %v2790_v57 = vld [vmem:[#allocation2 + $0x630] sm:$0xff] }
0x14db   :  { %5616 = vmatprep.mubr.f32.mxu0 %v2762_v58  ;;  %5660 = vmatprep.mubr.f32.mxu1 %v2762_v58  ;;  %v5577_v31 = vpop.f32.mrb[32].mxu1 }
0x14dc   :  { %5617 = vmatmul.mubr.f32.gmra.mrb[30].mxu0 %v2763_v50  ;;  %5661 = vmatmul.mubr.f32.gmra.mrb[38].mxu1 %v2763_v50  ;;  %v2765_v56 = vmul.f32 %v5577_v31, %v2757_v59  ;;  %v2733_v61 = vpop.f32.mrb[33].mxu1  ;;  %v2791_v59 = vld [vmem:[#allocation2 + $0x638] sm:$0xff] }
0x14dd   :  { %v2764_v62 = vmul.f32 %v2756_v60, %v2733_v61  ;;  %v3189_v61 = vld [vmem:[#allocation2 + $0x708] sm:$0xff] }
0x14df   :  { %5619 = vmatprep.mubr.f32.mxu0 %v2764_v62  ;;  %5663 = vmatprep.mubr.f32.mxu1 %v2764_v62  ;;  %v5580_v1 = vpop.f32.mrb[34].mxu1 }
0x14e0   :  { %5620 = vmatmul.mubr.f32.gmra.mrb[32].mxu0 %v2765_v56  ;;  %5664 = vmatmul.mubr.f32.gmra.mrb[40].mxu1 %v2765_v56  ;;  %v2767_v2 = vmul.f32 %v5580_v1, %v2759_v63  ;;  %v2743_v3 = vpop.f32.mrb[35].mxu1 }
0x14e1   :  { %v2766_v4 = vmul.f32 %v2758_v0, %v2743_v3  ;;  %v3188_v0 = vld [vmem:[#allocation2 + $0x700] sm:$0xff] }
0x14e3   :  { %5622 = vmatprep.mubr.f32.mxu0 %v2766_v4  ;;  %5666 = vmatprep.mubr.f32.mxu1 %v2766_v4 }
0x14e4   :  { %5623 = vmatmul.mubr.f32.gmra.mrb[34].mxu0 %v2767_v2  ;;  %5667 = vmatmul.mubr.f32.gmra.mrb[42].mxu1 %v2767_v2 }
0x14e5   :  { %5701 = vmatprep.mubr.msk.f32.mxu1 %vm1719_vm8, %v6640_v14  ;;  %v2914_v14 = vld [vmem:[#allocation2 + $0x6c8] sm:$0xff] }
0x14e8   :  { %5702 = vmatmul.mubr.msk.f32.vlgmr.msra.gmra.mrb[44].mxu1 %vm1719_vm8, %v6656_v28  ;;  %v2784_v28 = vld [vmem:[#allocation2 + $0x600] sm:$0xff] }
0x14e9   :  { %5704 = vmatprep.mubr.msk.f32.mxu1 %vm1719_vm8, %v6658_v29 }
0x14ec   :  { %5705 = vmatmul.mubr.msk.f32.gmra.mrb[46].mxu1 %vm1719_vm8, %v6664_v23 }
0x14ed   :  { %5707 = vmatprep.mubr.msk.f32.mxu1 %vm1719_vm8, %v6666_v24 }
0x14f0   :  { %5708 = vmatmul.mubr.msk.f32.gmra.mrb[48].mxu1 %vm1719_vm8, %v6672_v32 }
0x14f1   :  { %5710 = vmatprep.mubr.msk.f32.mxu1 %vm1719_vm8, %v6674_v33 }
0x14f4   :  { %5711 = vmatmul.mubr.msk.f32.gmra.mrb[50].mxu1 %vm1719_vm8, %v6680_v34 }
0x15ab   :  { %v5615_v6 = vpop.f32.mrb[28].mxu0  ;;  %v5659_v29 = vpop.f32.mrb[36].mxu1 }
0x15ac   :  { %v2993_v7 = vadd.f32 %v5659_v29, %v2914_v14  ;;  %v2858_v23 = vpop.f32.mrb[29].mxu0  ;;  %v2987_v8 = vpop.f32.mrb[37].mxu1  ;;  %v2864_v47 = vadd.f32 %v5615_v6, %v2785_v45  ;;  %v3191_v14 = vld [vmem:[#allocation2 + $0x718] sm:$0xff]  ;;  %v3190_v29 = vld [vmem:[#allocation2 + $0x710] sm:$0xff] }
0x15ad   :  { %v2859_v9 = vadd.f32 %v2858_v23, %v2784_v28  ;;  %v2988_v24 = vadd.f32 %v2987_v8, %v2913_v5 }
0x15af   :  { %v6162_v33 = vpack.c.bf16 %v2993_v7, %v2988_v24  ;;  %v5618_v34 = vpop.f32.mrb[30].mxu0  ;;  %v5662_v11 = vpop.f32.mrb[38].mxu1  ;;  %5685 = vmatprep.mubr.msk.f32.mxu0 %vm3026_vm9, %v2859_v9 }
0x15b0   :  { %v3003_v12 = vadd.f32 %v5662_v11, %v2916_v48  ;;  %v2868_v13 = vpop.f32.mrb[31].mxu0  ;;  %v2997_v15 = vpop.f32.mrb[39].mxu1  ;;  %v2874_v54 = vadd.f32 %v5618_v34, %v2787_v49  ;;  %v3193_v48 = vld [vmem:[#allocation2 + $0x728] sm:$0xff]  ;;  %v3192_v34 = vld [vmem:[#allocation2 + $0x720] sm:$0xff] }
0x15b1   :  { %v2998_v16 = vadd.f32 %v2997_v15, %v2915_v51  ;;  %6164 = vmatprep.subr.msk.bf16.mxu0 %vm6714_vm10, %v6162_v33  ;;  %v2869_v52 = vadd.f32 %v2868_v13, %v2786_v46 }
0x15b2   :  { %6167 = vmatpush3.bf16.xpose.msk.msra.mxu0 %vm6714_vm10, %v6162_v33 }
0x15b3   :  { %v6168_v19 = vpack.c.bf16 %v3003_v12, %v2998_v16  ;;  %v5621_v20 = vpop.f32.mrb[32].mxu0  ;;  %v5665_v21 = vpop.f32.mrb[40].mxu1 }
0x15b4   :  { %v3013_v22 = vadd.f32 %v5665_v21, %v2918_v17  ;;  %v2878_v27 = vpop.f32.mrb[33].mxu0  ;;  %v3007_v35 = vpop.f32.mrb[41].mxu1  ;;  %v2884_v58 = vadd.f32 %v5621_v20, %v2789_v55  ;;  %v3195_v17 = vld [vmem:[#allocation2 + $0x738] sm:$0xff]  ;;  %v3194_v21 = vld [vmem:[#allocation2 + $0x730] sm:$0xff] }
0x15b5   :  { %6170 = vmatprep.subr.msk.bf16.mxu0 %vm6714_vm10, %v6168_v19  ;;  %v3008_v36 = vadd.f32 %v3007_v35, %v2917_v18  ;;  %v2879_v50 = vadd.f32 %v2878_v27, %v2788_v53 }
0x15b7   :  { %v6174_v38 = vpack.c.bf16 %v3013_v22, %v3008_v36  ;;  %v5624_v39 = vpop.f32.mrb[34].mxu0  ;;  %v5668_v10 = vpop.f32.mrb[42].mxu1 }
0x15b8   :  { %v3023_v40 = vadd.f32 %v5668_v10, %v2920_v37  ;;  %v2888_v41 = vpop.f32.mrb[35].mxu0  ;;  %v3017_v42 = vpop.f32.mrb[43].mxu1  ;;  %v2894_v31 = vadd.f32 %v5624_v39, %v2791_v59 }
0x15b9   :  { %v3018_v43 = vadd.f32 %v3017_v42, %v2919_v30  ;;  %v2889_v60 = vadd.f32 %v2888_v41, %v2790_v57 }
0x15ba   :  { %6173 = vmatpush3.bf16.xpose.msk.msra.mxu0 %vm6714_vm10, %v6168_v19 }
0x15bb   :  { %6176 = vmatprep.subr.msk.bf16.mxu0 %vm6714_vm10, %v6174_v38  ;;  %v6180_v44 = vpack.c.bf16 %v3023_v40, %v3018_v43 }
0x15c2   :  { %6179 = vmatpush3.bf16.xpose.msk.msra.mxu0 %vm6714_vm10, %v6174_v38  ;;  %v5703_v38 = vpop.f32.mrb[44].mxu1 }
0x15c3   :  { %6182 = vmatprep.subr.msk.bf16.mxu0 %vm6714_vm10, %v6180_v44  ;;  %v3358_v39 = vpop.f32.mrb[45].mxu1 }
0x15c4   :  { %v6190_v10 = vpack.c.bf16 %v5703_v38, %v3358_v39  ;;  %v5706_v40 = vpop.f32.mrb[46].mxu1 }
0x15c5   :  { %v3368_v41 = vpop.f32.mrb[47].mxu1 }
0x15c6   :  { %6191 = vmatprep.subr.bf16.mxu1 %v6190_v10  ;;  %v6194_v42 = vpack.c.bf16 %v5706_v40, %v3368_v41 }
0x15c7   :  { %6193 = vmatpush3.bf16.msra.mxu1 %v6190_v10 }
0x15c8   :  { %6195 = vmatprep.subr.bf16.mxu1 %v6194_v42 }
0x15ca   :  { %6185 = vmatpush3.bf16.xpose.msk.msra.mxu0 %vm6714_vm10, %v6180_v44 }
0x15cb   :  { %6197 = vmatpush3.bf16.msra.mxu1 %v6194_v42 }
0x15d1   :  { %5686 = vmatmul.mubr.msk.f32.vlgmr.msra.gmra.mrb[36].mxu0 %vm3026_vm9, %v2864_v47 }
0x15d2   :  { %5688 = vmatprep.mubr.msk.f32.mxu0 %vm3026_vm9, %v2869_v52 }
0x15d5   :  { %5689 = vmatmul.mubr.msk.f32.gmra.mrb[38].mxu0 %vm3026_vm9, %v2874_v54 }
0x15d6   :  { %5691 = vmatprep.mubr.msk.f32.mxu0 %vm3026_vm9, %v2879_v50 }
0x15d9   :  { %5692 = vmatmul.mubr.msk.f32.gmra.mrb[40].mxu0 %vm3026_vm9, %v2884_v58 }
0x15da   :  { %5694 = vmatprep.mubr.msk.f32.mxu0 %vm3026_vm9, %v2889_v60 }
0x15dd   :  { %5695 = vmatmul.mubr.msk.f32.gmra.mrb[42].mxu0 %vm3026_vm9, %v2894_v31 }
0x16a4   :  { %v5687_v56 = vpop.f32.mrb[36].mxu0 }
0x16a5   :  { %v3181_v62 = vmul.f32 0.35355338, %v5687_v56  ;;  %v3141_v63 = vpop.f32.mrb[37].mxu0 }
0x16a6   :  { %v3180_v1 = vmul.f32 0.35355338, %v3141_v63 }
0x16a7   :  { %v3197_v2 = vadd.f32 %v3189_v61, %v3181_v62 }
0x16a8   :  { %v5690_v3 = vpop.f32.mrb[38].mxu0  ;;  %v3196_v4 = vadd.f32 %v3188_v0, %v3180_v1 }
0x16a9   :  { %v3183_v28 = vmul.f32 0.35355338, %v5690_v3  ;;  %v3151_v5 = vpop.f32.mrb[39].mxu0  ;;  %v3207_v6 = vsel %vm132_vm2, %v3197_v2, -inf }
0x16aa   :  { %v3182_v7 = vmul.f32 0.35355338, %v3151_v5  ;;  %3208 = vmax.xlane.f32.xlu1 %v3207_v6  ;;  %v3204_v23 = vsel %vm132_vm2, %v3196_v4, -inf }
0x16ab   :  { %3205 = vmax.xlane.f32.xlu0 %v3204_v23  ;;  %v3199_v8 = vadd.f32 %v3191_v14, %v3183_v28 }
0x16ac   :  { %v5693_v9 = vpop.f32.mrb[40].mxu0  ;;  %v3198_v24 = vadd.f32 %v3190_v29, %v3182_v7 }
0x16ad   :  { %v3185_v51 = vmul.f32 0.35355338, %v5693_v9  ;;  %v3161_v32 = vpop.f32.mrb[41].mxu0  ;;  %v3213_v33 = vsel %vm132_vm2, %v3199_v8, -inf }
0x16ae   :  { %v3184_v11 = vmul.f32 0.35355338, %v3161_v32  ;;  %3214 = vmax.xlane.f32.xlu1 %v3213_v33  ;;  %v3210_v12 = vsel %vm132_vm2, %v3198_v24, -inf }
0x16af   :  { %3211 = vmax.xlane.f32.xlu0 %v3210_v12  ;;  %v3201_v13 = vadd.f32 %v3193_v48, %v3185_v51 }
0x16b0   :  { %v5696_v15 = vpop.f32.mrb[42].mxu0  ;;  %v3200_v16 = vadd.f32 %v3192_v34, %v3184_v11  ;;  %v5709_v11 = vpop.f32.mrb[48].mxu1 }
0x16b1   :  { %v3187_v18 = vmul.f32 0.35355338, %v5696_v15  ;;  %v3171_v19 = vpop.f32.mrb[43].mxu0  ;;  %v3219_v20 = vsel %vm132_vm2, %v3201_v13, -inf  ;;  %v3378_v12 = vpop.f32.mrb[49].mxu1 }
0x16b2   :  { %v3186_v22 = vmul.f32 0.35355338, %v3171_v19  ;;  %3220 = vmax.xlane.f32.xlu1 %v3219_v20  ;;  %v3216_v27 = vsel %vm132_vm2, %v3200_v16, -inf  ;;  %v5712_v15 = vpop.f32.mrb[50].mxu1 }
0x16b3   :  { %3217 = vmax.xlane.f32.xlu0 %v3216_v27  ;;  %v3203_v35 = vadd.f32 %v3195_v17, %v3187_v18 }
0x16b4   :  { %v3202_v36 = vadd.f32 %v3194_v21, %v3186_v22 }
0x16b5   :  { %v3225_v37 = vsel %vm132_vm2, %v3203_v35, -inf }
0x16b6   :  { %3226 = vmax.xlane.f32.xlu1 %v3225_v37  ;;  %v3222_v30 = vsel %vm132_vm2, %v3202_v36, -inf }
0x16b7   :  { %3223 = vmax.xlane.f32.xlu0 %v3222_v30 }
0x1737   :  { %v3209_v43 = vpop.xlane.xlu1 %3208 }
0x1738   :  { %v3229_v44 = vsub.f32 %v3197_v2, %v3209_v43  ;;  %v3206_v45 = vpop.xlane.xlu0 %3205 }
0x1739   :  { %v3228_v46 = vsub.f32 %v3196_v4, %v3206_v45 }
0x173a   :  { %v3238_v47 = vmul.f32 1.442695, %v3229_v44 }
0x173b   :  { %v3236_v49 = vmul.f32 1.442695, %v3228_v46  ;;  %v3215_v52 = vpop.xlane.xlu1 %3214 }
0x173c   :  { %6368 = vpow2.f32 %v3238_v47  ;;  %v3231_v53 = vsub.f32 %v3199_v8, %v3215_v52  ;;  %v3212_v54 = vpop.xlane.xlu0 %3211 }
0x173d   :  { %6370 = vpow2.f32 %v3236_v49  ;;  %v3230_v55 = vsub.f32 %v3198_v24, %v3212_v54  ;;  %v3526_v54 = vld [vmem:[#allocation2 + $0x740] sm:$0xff] }
0x173e   :  { %v3242_v50 = vmul.f32 1.442695, %v3231_v53  ;;  %5757 = vmatprep.mubr.msk.f32.mxu0 %vm132_vm2, %v3526_v54 }
0x173f   :  { %v3240_v57 = vmul.f32 1.442695, %v3230_v55  ;;  %v3221_v58 = vpop.xlane.xlu1 %3220 }
0x1740   :  { %6372 = vpow2.f32 %v3242_v50  ;;  %v3233_v59 = vsub.f32 %v3201_v13, %v3221_v58  ;;  %v3218_v60 = vpop.xlane.xlu0 %3217  ;;  %v6198_v13 = vpack.c.bf16 %v5709_v11, %v3378_v12 }
0x1741   :  { %6374 = vpow2.f32 %v3240_v57  ;;  %v3232_v31 = vsub.f32 %v3200_v16, %v3218_v60  ;;  %v3388_v16 = vpop.f32.mrb[51].mxu1 }
0x1742   :  { %v3246_v56 = vmul.f32 1.442695, %v3233_v59  ;;  %6199 = vmatprep.subr.bf16.mxu1 %v6198_v13  ;;  %v6202_v17 = vpack.c.bf16 %v5712_v15, %v3388_v16 }
0x1743   :  { %v3244_v61 = vmul.f32 1.442695, %v3232_v31  ;;  %v3227_v62 = vpop.xlane.xlu1 %3226  ;;  %6201 = vmatpush3.bf16.msra.mxu1 %v6198_v13  ;;  %v4837_v13 = vld [vmem:[#allocation2 + $0x7a8] ss:$0 sm:$0xff] }
0x1744   :  { %6376 = vpow2.f32 %v3246_v56  ;;  %v3235_v63 = vsub.f32 %v3203_v35, %v3227_v62  ;;  %v3224_v0 = vpop.xlane.xlu0 %3223  ;;  %6203 = vmatprep.subr.bf16.mxu1 %v6202_v17 }
0x1745   :  { %6378 = vpow2.f32 %v3244_v61  ;;  %v3234_v1 = vsub.f32 %v3202_v36, %v3224_v0 }
0x1746   :  { %v6369_v2 = vpop.eup %6368  ;;  %v3250_v3 = vmul.f32 1.442695, %v3235_v63 }
0x1747   :  { %v6371_v4 = vpop.eup %6370  ;;  %v3248_v14 = vmul.f32 1.442695, %v3234_v1  ;;  %v3255_v28 = vsel %vm132_vm2, %v6369_v2, 0.0  ;;  %6205 = vmatpush3.bf16.msra.mxu1 %v6202_v17  ;;  %v3527_v1 = vld [vmem:[#allocation2 + $0x748] sm:$0xff] }
0x1748   :  { %6380 = vpow2.f32 %v3250_v3  ;;  %3256 = vadd.xlane.f32.xlu1 %v3255_v28  ;;  %v3252_v5 = vsel %vm132_vm2, %v6371_v4, 0.0  ;;  %v3696_v3 = vld [vmem:[#allocation2 + $0x760] sm:$0xff] }
0x1749   :  { %6382 = vpow2.f32 %v3248_v14  ;;  %3253 = vadd.xlane.f32.xlu0 %v3252_v5  ;;  %v3786_v14 = vld [vmem:[#allocation2 + $0x788] sm:$0xff]  ;;  %v3787_v5 = vld [vmem:[#allocation2 + $0x790] sm:$0xff] }
0x174a   :  { %v6373_v6 = vpop.eup %6372 }
0x174b   :  { %v6375_v29 = vpop.eup %6374  ;;  %v3261_v7 = vsel %vm132_vm2, %v6373_v6, 0.0 }
0x174c   :  { %3262 = vadd.xlane.f32.xlu1 %v3261_v7  ;;  %v3258_v23 = vsel %vm132_vm2, %v6375_v29, 0.0 }
0x174d   :  { %3259 = vadd.xlane.f32.xlu0 %v3258_v23  ;;  %v3698_v23 = vld [vmem:[#allocation2 + $0x770] sm:$0xff] }
0x174e   :  { %v6377_v8 = vpop.eup %6376 }
0x174f   :  { %v6379_v9 = vpop.eup %6378  ;;  %v3267_v24 = vsel %vm132_vm2, %v6377_v8, 0.0 }
0x1750   :  { %3268 = vadd.xlane.f32.xlu1 %v3267_v24  ;;  %v3264_v48 = vsel %vm132_vm2, %v6379_v9, 0.0 }
0x1751   :  { %3265 = vadd.xlane.f32.xlu0 %v3264_v48  ;;  %v3789_v48 = vld [vmem:[#allocation2 + $0x7a0] sm:$0xff] }
0x1752   :  { %v6381_v51 = vpop.eup %6380 }
0x1753   :  { %v6383_v32 = vpop.eup %6382  ;;  %v3273_v33 = vsel %vm132_vm2, %v6381_v51, 0.0 }
0x1754   :  { %3274 = vadd.xlane.f32.xlu1 %v3273_v33  ;;  %v3270_v34 = vsel %vm132_vm2, %v6383_v32, 0.0 }
0x1755   :  { %3271 = vadd.xlane.f32.xlu0 %v3270_v34 }
0x17d5   :  { %v3257_v18 = vpop.xlane.xlu1 %3256 }
0x17d6   :  { %6384 = vrcp.f32 %v3257_v18  ;;  %v3254_v19 = vpop.xlane.xlu0 %3253 }
0x17d7   :  { %6386 = vrcp.f32 %v3254_v19 }
0x17d9   :  { %v3263_v20 = vpop.xlane.xlu1 %3262 }
0x17da   :  { %6388 = vrcp.f32 %v3263_v20  ;;  %v3260_v21 = vpop.xlane.xlu0 %3259 }
0x17db   :  { %6390 = vrcp.f32 %v3260_v21 }
0x17dd   :  { %v3269_v22 = vpop.xlane.xlu1 %3268 }
0x17de   :  { %6392 = vrcp.f32 %v3269_v22  ;;  %v3266_v27 = vpop.xlane.xlu0 %3265 }
0x17df   :  { %6394 = vrcp.f32 %v3266_v27 }
0x17e0   :  { %v6385_v35 = vpop.eup %6384 }
0x17e1   :  { %v6387_v36 = vpop.eup %6386  ;;  %v3275_v37 = vpop.xlane.xlu1 %3274  ;;  %v3279_v39 = vmul.f32 %v6385_v35, %v6369_v2  ;;  %v3609_v2 = vld [vmem:[#allocation2 + $0x750] sm:$0xff] }
0x17e2   :  { %6396 = vrcp.f32 %v3275_v37  ;;  %v3272_v30 = vpop.xlane.xlu0 %3271  ;;  %v3277_v38 = vmul.f32 %v6387_v36, %v6371_v4  ;;  %v3697_v4 = vld [vmem:[#allocation2 + $0x768] sm:$0xff] }
0x17e3   :  { %6398 = vrcp.f32 %v3272_v30  ;;  %v6222_v28 = vpack.c.bf16 %v3697_v4, %v3696_v3 }
0x17e4   :  { %v6389_v10 = vpop.eup %6388  ;;  %5729 = vmatprep.mubr.msk.f32.mxu1 %vm132_vm2, %v3277_v38 }
0x17e5   :  { %v6391_v40 = vpop.eup %6390  ;;  %5730 = vmatmul.mubr.msk.f32.vlgmr.msra.gmra.mrb[52].mxu1 %vm132_vm2, %v3279_v39  ;;  %v3283_v42 = vmul.f32 %v6389_v10, %v6373_v6  ;;  %v6230_v6 = vpack.c.bf16 %v3787_v5, %v3786_v14  ;;  %6223 = vmatprep.subr.bf16.mxu1 %v6222_v28  ;;  %v4834_v39 = vld [vmem:[#allocation2 + $0x780] ss:$0 sm:$0xff]  ;;  %v4840_v5 = vld [vmem:[#allocation2 + $0x7b0] ss:$0 sm:$0xff] }
0x17e6   :  { %v3281_v41 = vmul.f32 %v6391_v40, %v6375_v29  ;;  %6225 = vmatpush3.bf16.msra.mxu1 %v6222_v28  ;;  %v3933_v14 = vld [vmem:[#allocation2 + $0x7c0] sm:$0xff] }
0x17e8   :  { %v6393_v43 = vpop.eup %6392  ;;  %5732 = vmatprep.mubr.msk.f32.mxu1 %vm132_vm2, %v3281_v41 }
0x17e9   :  { %v6395_v44 = vpop.eup %6394  ;;  %5733 = vmatmul.mubr.msk.f32.gmra.mrb[54].mxu1 %vm132_vm2, %v3283_v42  ;;  %v3287_v46 = vmul.f32 %v6393_v43, %v6377_v8  ;;  %v3699_v8 = vld [vmem:[#allocation2 + $0x778] sm:$0xff] }
0x17ea   :  { %v3285_v45 = vmul.f32 %v6395_v44, %v6379_v9  ;;  %v3788_v9 = vld [vmem:[#allocation2 + $0x798] sm:$0xff]  ;;  %v6226_v24 = vpack.c.bf16 %v3699_v8, %v3698_v23 }
0x17ec   :  { %v6397_v47 = vpop.eup %6396  ;;  %5735 = vmatprep.mubr.msk.f32.mxu1 %vm132_vm2, %v3285_v45  ;;  %6227 = vmatprep.subr.bf16.mxu1 %v6226_v24 }
0x17ed   :  { %v6399_v49 = vpop.eup %6398  ;;  %5736 = vmatmul.mubr.msk.f32.gmra.mrb[56].mxu1 %vm132_vm2, %v3287_v46  ;;  %v3291_v53 = vmul.f32 %v6397_v47, %v6381_v51  ;;  %v6234_v51 = vpack.c.bf16 %v3789_v48, %v3788_v9 }
0x17ee   :  { %v3289_v52 = vmul.f32 %v6399_v49, %v6383_v32  ;;  %6229 = vmatpush3.bf16.msra.mxu1 %v6226_v24  ;;  %v4831_v32 = vld [vmem:[#allocation2 + $0x758] ss:$0 sm:$0xff] }
0x17f0   :  { %5738 = vmatprep.mubr.msk.f32.mxu1 %vm132_vm2, %v3289_v52 }
0x17f1   :  { %5739 = vmatmul.mubr.msk.f32.gmra.mrb[58].mxu1 %vm132_vm2, %v3291_v53 }
0x18b8   :  { %v5731_v55 = vpop.f32.mrb[52].mxu1 }
0x18b9   :  { %v3487_v50 = vpop.f32.mrb[53].mxu1 }
0x18ba   :  { %v6206_v57 = vpack.c.bf16 %v5731_v55, %v3487_v50 }
0x18bc   :  { %v5734_v58 = vpop.f32.mrb[54].mxu1  ;;  %6207 = vmatprep.subr.bf16.mxu0 %v6206_v57 }
0x18bd   :  { %v3497_v59 = vpop.f32.mrb[55].mxu1  ;;  %6209 = vmatpush3.bf16.msra.mxu0 %v6206_v57 }
0x18be   :  { %v6210_v60 = vpack.c.bf16 %v5734_v58, %v3497_v59 }
0x18c0   :  { %v5737_v31 = vpop.f32.mrb[56].mxu1  ;;  %6211 = vmatprep.subr.bf16.mxu0 %v6210_v60 }
0x18c1   :  { %v3507_v56 = vpop.f32.mrb[57].mxu1  ;;  %6213 = vmatpush3.bf16.msra.mxu0 %v6210_v60 }
0x18c2   :  { %v6214_v61 = vpack.c.bf16 %v5737_v31, %v3507_v56  ;;  %v3940_v31 = vld [vmem:[#allocation2 + $0x7f8] sm:$0xff]  ;;  %v3942_v56 = vld [vmem:[#allocation2 + $0x808] sm:$0xff] }
0x18c4   :  { %v5740_v62 = vpop.f32.mrb[58].mxu1  ;;  %6215 = vmatprep.subr.bf16.mxu0 %v6214_v61 }
0x18c5   :  { %v3517_v63 = vpop.f32.mrb[59].mxu1  ;;  %6217 = vmatpush3.bf16.msra.mxu0 %v6214_v61  ;;  %v3944_v61 = vld [vmem:[#allocation2 + $0x818] sm:$0xff] }
0x18c6   :  { %v6218_v0 = vpack.c.bf16 %v5740_v62, %v3517_v63  ;;  %v6780_v62 = vld [vmem:[#allocation2 + $0x868] sm:$0xf] }
0x18c8   :  { %6219 = vmatprep.subr.bf16.mxu0 %v6218_v0 }
0x18c9   :  { %6221 = vmatpush3.bf16.msra.mxu0 %v6218_v0 }
0x18ca   :  { %5760 = vmatprep.subr.mxu0 %v3609_v2 }
0x18cc   :  { %5758 = vmatmul.mubr.msk.f32.vlgmr.msra.gmra.mrb[44].mxu0 %vm132_vm2, %v3527_v1 }
0x18cd   :  { %5761 = vmatpush3.msra.mxu0 %v3609_v2 }
0x18ce   :  { %6231 = vmatprep.subr.bf16.mxu0 %v6230_v6 }
0x199f   :  { %v5759_v29 = vpop.f32.mrb[44].mxu0 }
0x19a0   :  { %v3600_v7 = vpop.f32.mrb[45].mxu0 }
0x19a1   :  { %5762 = vmatprep.mubr.msk.f32.mxu0 %vm3026_vm9, %v3600_v7  ;;  %v4841_v7 = vld [vmem:[#allocation2 + $0x7b8] ss:$0 sm:$0xff] }
0x19a2   :  { %5763 = vmatmul.mubr.msk.f32.vlgmr.msra.gmra.mrb[46].mxu0 %vm3026_vm9, %v5759_v29 }
0x19a3   :  { %6233 = vmatpush3.bf16.msra.mxu0 %v6230_v6 }
0x19a4   :  { %6235 = vmatprep.subr.bf16.mxu0 %v6234_v51 }
0x19a7   :  { %6237 = vmatpush3.bf16.msra.mxu0 %v6234_v51  ;;  %v3941_v51 = vld [vmem:[#allocation2 + $0x800] sm:$0xff] }
0x1a75   :  { %v5764_v33 = vpop.f32.mrb[46].mxu0 }
0x1a76   :  { %v3687_v34 = vpop.f32.mrb[47].mxu0  ;;  %v3693_v12 = vadd.f32 %v5764_v33, %v4831_v32  ;;  %v6784_v33 = vld [vmem:[#allocation2 + $0x860] sm:$0xff] }
0x1a77   :  { %v3688_v11 = vadd.f32 %v4831_v32, %v3687_v34  ;;  %v3943_v32 = vld [vmem:[#allocation2 + $0x810] sm:$0xff] }
0x1a79   :  { %5773 = vmatprep.mubr.msk.f32.mxu1 %vm1665_vm7, %v3688_v11  ;;  %5784 = vmatprep.mubr.msk.f32.mxu0 %vm1665_vm7, %v3688_v11 }
0x1a7a   :  { %5774 = vmatmul.mubr.msk.f32.vlgmr.msra.gmra.mrb[60].mxu1 %vm1665_vm7, %v3693_v12  ;;  %5785 = vmatmul.mubr.msk.f32.vlgmr.msra.gmra.mrb[48].mxu0 %vm1665_vm7, %v3693_v12  ;;  %v3934_v12 = vld [vmem:[#allocation2 + $0x7c8] sm:$0xff] }
0x1a7b   :  { %5789 = vmatprep.mubr.msk.f32.mxu1 %vm3026_vm9, %v3933_v14 }
0x1b4d   :  { %v5775_v15 = vpop.f32.mrb[60].mxu1  ;;  %v5786_v16 = vpop.f32.mrb[48].mxu0 }
0x1b4e   :  { %v3867_v17 = vadd.f32 %v5786_v16, %v4837_v13  ;;  %v3777_v18 = vpop.f32.mrb[61].mxu1  ;;  %v3861_v19 = vpop.f32.mrb[49].mxu0  ;;  %v3783_v10 = vadd.f32 %v5775_v15, %v4834_v39  ;;  %v3936_v15 = vld [vmem:[#allocation2 + $0x7d8] sm:$0xff]  ;;  %v3937_v16 = vld [vmem:[#allocation2 + $0x7e0] sm:$0xff] }
0x1b4f   :  { %v3862_v20 = vadd.f32 %v4837_v13, %v3861_v19  ;;  %v3778_v41 = vadd.f32 %v4834_v39, %v3777_v18  ;;  %v3935_v13 = vld [vmem:[#allocation2 + $0x7d0] sm:$0xff]  ;;  %v4118_v18 = vld [vmem:[#allocation2 + $0x820] sm:$0xff] }
0x1b50   :  { %v3871_v21 = vsub.f32 0.0, %v3867_v17  ;;  %v3938_v17 = vld [vmem:[#allocation2 + $0x7e8] sm:$0xff] }
0x1b51   :  { %v3870_v22 = vsub.f32 0.0, %v3862_v20 }
0x1b52   :  { %v3874_v27 = vmul.f32 1.442695, %v3871_v21 }
0x1b53   :  { %v3872_v35 = vmul.f32 1.442695, %v3870_v22 }
0x1b54   :  { %6400 = vpow2.f32 %v3874_v27 }
0x1b55   :  { %6402 = vpow2.f32 %v3872_v35 }
0x1b5e   :  { %v6401_v36 = vpop.eup %6400 }
0x1b5f   :  { %v6403_v37 = vpop.eup %6402  ;;  %v3877_v30 = vadd.f32 1.0, %v6401_v36 }
0x1b60   :  { %v3876_v38 = vadd.f32 1.0, %v6403_v37 }
0x1b61   :  { %6404 = vrcp.f32 %v3877_v30 }
0x1b62   :  { %6406 = vrcp.f32 %v3876_v38 }
0x1b6b   :  { %v6405_v40 = vpop.eup %6404 }
0x1b6c   :  { %v6407_v42 = vpop.eup %6406  ;;  %v3883_v43 = vmul.f32 %v6405_v40, %v3783_v10 }
0x1b6d   :  { %v3882_v44 = vmul.f32 %v6407_v42, %v3778_v41 }
0x1b6e   :  { %v3885_v45 = vadd.f32 %v3883_v43, %v6645_v25 }
0x1b6f   :  { %v3884_v46 = vadd.f32 %v3882_v44, %v6648_v26  ;;  %v3939_v26 = vld [vmem:[#allocation2 + $0x7f0] sm:$0xff] }
0x1b70   :  { %v3891_v47 = vsel %vm1665_vm7, %v3885_v45, 0.0 }
0x1b71   :  { %3892 = vadd.xlane.f32.xlu0 %v3891_v47  ;;  %v3888_v49 = vsel %vm1665_vm7, %v3884_v46, 0.0 }
0x1b72   :  { %3889 = vadd.xlane.f32.xlu1 %v3888_v49 }
0x1bfe   :  { %v3893_v52 = vpop.xlane.xlu0 %3892 }
0x1bff   :  { %v3895_v53 = vmul.f32 0.03125, %v3893_v52  ;;  %v3890_v54 = vpop.xlane.xlu1 %3889 }
0x1c00   :  { %v3894_v55 = vmul.f32 0.03125, %v3890_v54 }
0x1c01   :  { %v3897_v50 = vsub.f32 %v3885_v45, %v3895_v53 }
0x1c02   :  { %v3896_v57 = vsub.f32 %v3884_v46, %v3894_v55 }
0x1c03   :  { %v3899_v58 = vmul.f32 %v3897_v50, %v3897_v50 }
0x1c04   :  { %v3898_v59 = vmul.f32 %v3896_v57, %v3896_v57 }
0x1c05   :  { %v3903_v60 = vsel %vm1665_vm7, %v3899_v58, 0.0 }
0x1c06   :  { %3904 = vadd.xlane.f32.xlu0 %v3903_v60  ;;  %v3900_v25 = vsel %vm1665_vm7, %v3898_v59, 0.0 }
0x1c07   :  { %3901 = vadd.xlane.f32.xlu1 %v3900_v25 }
0x1c18   :  { %3947 = vperm.xlu1 %6286, %v3939_v26  }
0x1c1c   :  { %3952 = vperm.xlu1 %6286, %v3940_v31  }
0x1c20   :  { %3962 = vperm.xlu1 %6286, %v3942_v56  }
0x1c24   :  { %3972 = vperm.xlu1 %6286, %v3944_v61  }
0x1c28   :  { %4127 = vperm.xlu1 %6286, %v6780_v62  }
0x1c93   :  { %v3905_v63 = vpop.xlane.xlu0 %3904 }
0x1c94   :  { %v3907_v0 = vmul.f32 0.03125, %v3905_v63  ;;  %v3902_v1 = vpop.xlane.xlu1 %3901 }
0x1c95   :  { %v3906_v2 = vmul.f32 0.03125, %v3902_v1 }
0x1c96   :  { %v3909_v3 = vadd.f32 1e-05, %v3907_v0 }
0x1c97   :  { %v3908_v4 = vadd.f32 1e-05, %v3906_v2 }
0x1c98   :  { %6408 = vrsqrt.f32 %v3909_v3  ;;  %v3948_v19 = vpop.permute.xlu1 %3947 }
0x1c99   :  { %6410 = vrsqrt.f32 %v3908_v4 }
0x1c9c   :  { %v3953_v20 = vpop.permute.xlu1 %3952 }
0x1ca0   :  { %v3963_v35 = vpop.permute.xlu1 %3962 }
0x1ca2   :  { %v6409_v28 = vpop.eup %6408 }
0x1ca3   :  { %v6411_v6 = vpop.eup %6410  ;;  %v3913_v29 = vmul.f32 %v6409_v28, %v3897_v50 }
0x1ca4   :  { %v3912_v23 = vmul.f32 %v6411_v6, %v3896_v57  ;;  %v3973_v43 = vpop.permute.xlu1 %3972 }
0x1ca5   :  { %v3919_v8 = vmul.f32 %v4840_v5, %v3913_v29  ;;  %v4119_v29 = vld [vmem:[#allocation2 + $0x828] sm:$0xf] }
0x1ca6   :  { %v3918_v9 = vmul.f32 %v4840_v5, %v3912_v23  ;;  %v4213_v23 = vld [vmem:[#allocation2 + $0x838] sm:$0xf] }
0x1ca7   :  { %v3925_v24 = vadd.f32 %v4841_v7, %v3919_v8  ;;  %v4303_v8 = vld [vmem:[#allocation2 + $0x840] sm:$0xff] }
0x1ca8   :  { %v3924_v48 = vadd.f32 %v4841_v7, %v3918_v9  ;;  %v4212_v7 = vld [vmem:[#allocation2 + $0x830] sm:$0xff]  ;;  %v6465_v9 = vmov 3  }
0x1ca9   :  { %3927 = vrot.lane.b32.xlu0 %v3925_v24, %s6464_s0  ;;  %5815 = vmatprep.mubr.msk.f32.mxu0 %vm3026_vm9, %v4212_v7  ;;  %v6466_v24 = vmov 2  }
0x1caa   :  { %6288 = vset.pattern.permute.xlu1 %v6465_v9 }
0x1cab   :  { %4405 = vperm.xlu1 %6288, %v6780_v62  }
0x1cad   :  { %3957 = vperm.xlu0 %6285, %v3941_v51   ;;  %v4128_v51 = vpop.permute.xlu1 %4127 }
0x1caf   :  { %6289 = vset.pattern.permute.xlu1 %v6466_v24 }
0x1cb0   :  { %4306 = vperm.xlu1 %6289, %v6784_v33  }
0x1cb1   :  { %3967 = vperm.xlu0 %6285, %v3943_v32  }
0x1cb5   :  { %4122 = vperm.xlu0 %6285, %v6784_v33  }
0x1cb9   :  { %6287 = vset.pattern.permute.xlu0 %v6465_v9 }
0x1cba   :  { %4401 = vperm.xlu0 %6287, %v6784_v33  }
0x1cbe   :  { %6290 = vset.pattern.permute.xlu0 %v6466_v24 }
0x1cbf   :  { %4310 = vperm.xlu0 %6290, %v6780_v62  }
0x1d1b   :  { %v3928_v34 = vpop.permute.xlu0 %3927 }
0x1d1c   :  { %v3930_v11 = vsel %vm1665_vm7, %v3924_v48, %v3928_v34  ;;  %v6467_v48 = vmov 1  }
0x1d1d   :  { %5787 = vmatprep.subr.mxu1 %v3930_v11  ;;  %5813 = vmatprep.subr.mxu0 %v3930_v11 }
0x1d1e   :  { %5788 = vmatpush3.msra.mxu1 %v3930_v11  ;;  %5814 = vmatpush3.msra.mxu0 %v3930_v11 }
0x1d1f   :  { %5790 = vmatmul.mubr.msk.f32.vlgmr.msra.gmra.mrb[62].mxu1 %vm3026_vm9, %v3934_v12  ;;  %5816 = vmatmul.mubr.msk.f32.vlgmr.msra.gmra.mrb[50].mxu0 %vm3026_vm9, %v4213_v23 }
0x1d20   :  { %5792 = vmatprep.mubr.msk.f32.mxu1 %vm3026_vm9, %v3935_v13  ;;  %5822 = vmatprep.mubr.msk.f32.mxu0 %vm4313_vm4, %v4303_v8 }
0x1d21   :  { %6291 = vset.pattern.permute.xlu1 %v6467_v48 }
0x1d22   :  { %4215 = vperm.xlu1 %6291, %v6784_v33  }
0x1d23   :  { %5793 = vmatmul.mubr.msk.f32.gmra.mrb[64].mxu1 %vm3026_vm9, %v3936_v15 }
0x1d24   :  { %5795 = vmatprep.mubr.msk.f32.mxu1 %vm3026_vm9, %v3937_v16 }
0x1d26   :  { %4219 = vperm.xlu1 %6291, %v6780_v62  }
0x1d27   :  { %5796 = vmatmul.mubr.msk.f32.gmra.mrb[66].mxu1 %vm3026_vm9, %v3938_v17  ;;  %v4304_v17 = vld [vmem:[#allocation2 + $0x848] sm:$0xf] }
0x1d28   :  { %5810 = vmatprep.mubr.msk.f32.mxu1 %vm4130_vm11, %v4118_v18  ;;  %v4398_v18 = vld [vmem:[#allocation2 + $0x850] sm:$0xff] }
0x1d2c   :  { %v3958_v37 = vpop.permute.xlu0 %3957 }
0x1d30   :  { %v3968_v46 = vpop.permute.xlu0 %3967 }
0x1d34   :  { %v4123_v34 = vpop.permute.xlu0 %4122 }
0x1df2   :  { %v5791_v21 = vpop.f32.mrb[62].mxu1 }
0x1df3   :  { %v4065_v22 = vadd.f32 %v5791_v21, %v3953_v20  ;;  %v4059_v27 = vpop.f32.mrb[63].mxu1  ;;  %v5817_v20 = vpop.f32.mrb[50].mxu0 }
0x1df4   :  { %v4060_v36 = vadd.f32 %v4059_v27, %v3948_v19  ;;  %v4399_v19 = vld [vmem:[#allocation2 + $0x858] sm:$0xf]  ;;  %v4294_v21 = vpop.f32.mrb[51].mxu0 }
0x1df5   :  { %v4096_v30 = vmul.f32 1.442695, %v4065_v22  ;;  %vm4089_vm12 = vcmp.gt.f32.partialorder %v4065_v22, 0.0 }
0x1df6   :  { %v4094_v38 = vmul.f32 1.442695, %v4060_v36  ;;  %v5794_v39 = vpop.f32.mrb[64].mxu1  ;;  %vm4088_vm13 = vcmp.gt.f32.partialorder %v4060_v36, 0.0 }
0x1df7   :  { %6412 = vpow2.f32 %v4096_v30  ;;  %v4075_v10 = vadd.f32 %v5794_v39, %v3963_v35  ;;  %v4069_v40 = vpop.f32.mrb[65].mxu1  ;;  %v4402_v30 = vpop.permute.xlu0 %4401 }
0x1df8   :  { %6414 = vpow2.f32 %v4094_v38  ;;  %v4070_v41 = vadd.f32 %v4069_v40, %v3958_v37 }
0x1df9   :  { %v4100_v42 = vmul.f32 1.442695, %v4075_v10  ;;  %vm4091_vm14 = vcmp.gt.f32.partialorder %v4075_v10, 0.0 }
0x1dfa   :  { %v4098_v44 = vmul.f32 1.442695, %v4070_v41  ;;  %v5797_v45 = vpop.f32.mrb[66].mxu1  ;;  %vm4090_vm15 = vcmp.gt.f32.partialorder %v4070_v41, 0.0 }
0x1dfb   :  { %6416 = vpow2.f32 %v4100_v42  ;;  %v4085_v47 = vadd.f32 %v5797_v45, %v3973_v43  ;;  %v4079_v49 = vpop.f32.mrb[67].mxu1 }
0x1dfc   :  { %6418 = vpow2.f32 %v4098_v44  ;;  %v4080_v52 = vadd.f32 %v4079_v49, %v3968_v46 }
0x1dfd   :  { %v4104_v53 = vmul.f32 1.442695, %v4085_v47  ;;  %vm4093_vm1 = vcmp.gt.f32.partialorder %v4085_v47, 0.0 }
0x1dfe   :  { %v4102_v54 = vmul.f32 1.442695, %v4080_v52  ;;  %vm4092_vm3 = vcmp.gt.f32.partialorder %v4080_v52, 0.0 }
0x1dff   :  { %6420 = vpow2.f32 %v4104_v53  ;;  %v4311_v53 = vpop.permute.xlu0 %4310 }
0x1e00   :  { %6422 = vpow2.f32 %v4102_v54 }
0x1e01   :  { %v6413_v55 = vpop.eup %6412 }
0x1e02   :  { %v6415_v50 = vpop.eup %6414  ;;  %v4849_v57 = vadd.f32 -1.0, %v6413_v55 }
0x1e03   :  { %v4848_v58 = vadd.f32 -1.0, %v6415_v50 }
0x1e04   :  { %v4113_v59 = vsel %vm4089_vm12, %v4065_v22, %v4849_v57  ;;  %v4505_v22 = vld [vmem:[#allocation2 + $0x870] sm:$0xff] }
0x1e05   :  { %v6417_v60 = vpop.eup %6416  ;;  %v4112_v25 = vsel %vm4088_vm13, %v4060_v36, %v4848_v58  ;;  %v4406_v36 = vpop.permute.xlu1 %4405 }
0x1e06   :  { %v6419_v26 = vpop.eup %6418  ;;  %v4851_v31 = vadd.f32 -1.0, %v6417_v60  ;;  %v6238_v56 = vpack.c.bf16 %v4113_v59, %v4112_v25 }
0x1e07   :  { %v4850_v61 = vadd.f32 -1.0, %v6419_v26 }
0x1e08   :  { %6239 = vmatprep.subr.bf16.mxu1 %v6238_v56  ;;  %v4115_v63 = vsel %vm4091_vm14, %v4075_v10, %v4851_v31 }
0x1e09   :  { %v6421_v0 = vpop.eup %6420  ;;  %6241 = vmatpush3.bf16.msra.mxu1 %v6238_v56  ;;  %v4114_v1 = vsel %vm4090_vm15, %v4070_v41, %v4850_v61  ;;  %v4307_v44 = vpop.permute.xlu1 %4306 }
0x1e0a   :  { %v6423_v2 = vpop.eup %6422  ;;  %v4853_v3 = vadd.f32 -1.0, %v6421_v0  ;;  %v6242_v4 = vpack.c.bf16 %v4115_v63, %v4114_v1  ;;  %v4506_v63 = vld [vmem:[#allocation2 + $0x878] sm:$0xf]  ;;  %v6469_v0 = vmov 4   ;;  %v6470_v1 = vmov 5  }
0x1e0b   :  { %v4852_v14 = vadd.f32 -1.0, %v6423_v2  ;;  %6292 = vset.pattern.permute.xlu0 %v6469_v0  ;;  %6293 = vset.pattern.permute.xlu1 %v6469_v0 }
0x1e0c   :  { %6243 = vmatprep.subr.bf16.mxu1 %v6242_v4  ;;  %v4117_v28 = vsel %vm4093_vm1, %v4085_v47, %v4853_v3  ;;  %4678 = vperm.xlu0 %6292, %v6784_v33  }
0x1e0d   :  { %6245 = vmatpush3.bf16.msra.mxu1 %v6242_v4  ;;  %v4116_v5 = vsel %vm4092_vm3, %v4080_v52, %v4852_v14  ;;  %v4216_v52 = vpop.permute.xlu1 %4215  ;;  %4682 = vperm.xlu1 %6293, %v6780_v62  }
0x1e0e   :  { %v6246_v6 = vpack.c.bf16 %v4117_v28, %v4116_v5  ;;  %v4295_v25 = vadd.f32 %v4294_v21, %v4216_v52 }
0x1e10   :  { %6247 = vmatprep.subr.bf16.mxu1 %v6246_v6  ;;  %6295 = vset.pattern.permute.xlu0 %v6470_v1 }
0x1e11   :  { %6249 = vmatpush3.bf16.msra.mxu1 %v6246_v6  ;;  %v4220_v54 = vpop.permute.xlu1 %4219  ;;  %6294 = vset.pattern.permute.xlu1 %v6470_v1 }
0x1e12   :  { %v4300_v59 = vadd.f32 %v5817_v20, %v4220_v54  ;;  %4692 = vperm.xlu0 %6295, %v6780_v62   ;;  %4688 = vperm.xlu1 %6294, %v6784_v33  }
0x1e14   :  { %5811 = vmatmul.mubr.msk.f32.vlgmr.msra.gmra.mrb[68].mxu1 %vm4130_vm11, %v4119_v29 }
0x1e15   :  { %5836 = vmatprep.mubr.msk.f32.mxu1 %vm4313_vm4, %v4505_v22 }
0x1e8b   :  { %v4679_v33 = vpop.permute.xlu0 %4678 }
0x1e8c   :  { %v4683_v8 = vpop.permute.xlu1 %4682 }
0x1ee7   :  { %v5812_v32 = vpop.f32.mrb[68].mxu1 }
0x1ee8   :  { %v4209_v11 = vadd.f32 %v5812_v32, %v4128_v51  ;;  %v4203_v12 = vpop.f32.mrb[69].mxu1  ;;  %v4693_v32 = vpop.permute.xlu0 %4692 }
0x1ee9   :  { %v4204_v13 = vadd.f32 %v4203_v12, %v4123_v34 }
0x1eeb   :  { %v6250_v16 = vpack.c.bf16 %v4209_v11, %v4204_v13  ;;  %v4689_v11 = vpop.permute.xlu1 %4688 }
0x1eed   :  { %6252 = vmatprep.subr.msk.bf16.mxu0 %vm6805_vm6, %v6250_v16 }
0x1eee   :  { %6255 = vmatpush3.bf16.msk.msra.mxu0 %vm6805_vm6, %v6250_v16 }
0x1eef   :  { %6258 = vmatprep.subr.msk.bf16.mxu0 %vm6805_vm6, %v6250_v16 }
0x1ef1   :  { %5823 = vmatmul.mubr.msk.f32.vlgmr.msra.gmra.mrb[52].mxu0 %vm4313_vm4, %v4304_v17 }
0x1ef2   :  { %6261 = vmatpush3.bf16.msk.msra.mxu0 %vm6805_vm6, %v6250_v16  ;;  %5829 = vmatprep.mubr.msk.f32.mxu0 %vm4313_vm4, %v4398_v18 }
0x1ef5   :  { %5830 = vmatmul.mubr.msk.f32.vlgmr.msra.gmra.mrb[54].mxu0 %vm4313_vm4, %v4399_v19 }
0x1ef6   :  { %5843 = vmatprep.mubr.msk.f32.mxu0 %vm4313_vm4, %v4505_v22 }
0x1fc4   :  { %v5824_v27 = vpop.f32.mrb[52].mxu0 }
0x1fc5   :  { %v4389_v35 = vpop.f32.mrb[53].mxu0  ;;  %v4395_v55 = vadd.f32 %v5824_v27, %v4311_v53 }
0x1fc6   :  { %v4390_v57 = vadd.f32 %v4389_v35, %v4307_v44 }
0x1fc8   :  { %v5831_v37 = vpop.f32.mrb[54].mxu0 }
0x1fc9   :  { %v4486_v38 = vadd.f32 %v5831_v37, %v4406_v36  ;;  %v4480_v39 = vpop.f32.mrb[55].mxu0 }
0x1fca   :  { %v4481_v10 = vadd.f32 %v4480_v39, %v4402_v30 }
0x1fcb   :  { %v4490_v40 = vsub.f32 0.0, %v4486_v38 }
0x1fcc   :  { %v4489_v41 = vsub.f32 0.0, %v4481_v10 }
0x1fcd   :  { %v4493_v42 = vmul.f32 1.442695, %v4490_v40 }
0x1fce   :  { %v4491_v43 = vmul.f32 1.442695, %v4489_v41 }
0x1fcf   :  { %6424 = vpow2.f32 %v4493_v42 }
0x1fd0   :  { %6426 = vpow2.f32 %v4491_v43 }
0x1fd9   :  { %v6425_v45 = vpop.eup %6424 }
0x1fda   :  { %v6427_v46 = vpop.eup %6426  ;;  %v4496_v47 = vadd.f32 1.0, %v6425_v45 }
0x1fdb   :  { %v4495_v49 = vadd.f32 1.0, %v6427_v46 }
0x1fdc   :  { %6428 = vrcp.f32 %v4496_v47 }
0x1fdd   :  { %6430 = vrcp.f32 %v4495_v49 }
0x1fe6   :  { %v6429_v50 = vpop.eup %6428 }
0x1fe7   :  { %v6431_v58 = vpop.eup %6430  ;;  %v4502_v60 = vmul.f32 %v6429_v50, %v4395_v55 }
0x1fe8   :  { %v4501_v26 = vmul.f32 %v6431_v58, %v4390_v57 }
0x1fe9   :  { %v4504_v31 = vadd.f32 %v4502_v60, %v4300_v59 }
0x1fea   :  { %v4503_v56 = vadd.f32 %v4501_v26, %v4295_v25 }
0x1fec   :  { %v6262_v61 = vpack.c.bf16 %v4504_v31, %v4503_v56 }
0x1fee   :  { %6264 = vmatprep.subr.msk.bf16.mxu1 %vm6805_vm6, %v6262_v61 }
0x1fef   :  { %6267 = vmatpush3.bf16.msk.msra.mxu1 %vm6805_vm6, %v6262_v61 }
0x1ff2   :  { %5837 = vmatmul.mubr.msk.f32.vlgmr.msra.gmra.mrb[70].mxu1 %vm4313_vm4, %v4506_v63 }
0x20c5   :  { %v5838_v2 = vpop.f32.mrb[70].mxu1 }
0x20c6   :  { %v4592_v3 = vsub.f32 %v4504_v31, %v5838_v2  ;;  %v4582_v4 = vpop.f32.mrb[71].mxu1 }
0x20c7   :  { %v4591_v14 = vsub.f32 %v4503_v56, %v4582_v4 }
0x20c8   :  { %v4594_v28 = vmul.f32 %v4592_v3, %v4592_v3 }
0x20c9   :  { %v4593_v5 = vmul.f32 %v4591_v14, %v4591_v14 }
0x20cb   :  { %v6268_v6 = vpack.c.bf16 %v4594_v28, %v4593_v5 }
0x20cd   :  { %6270 = vmatprep.subr.msk.bf16.mxu0 %vm6805_vm6, %v6268_v6 }
0x20ce   :  { %6273 = vmatpush3.bf16.msk.msra.mxu0 %vm6805_vm6, %v6268_v6 }
0x20d1   :  { %5844 = vmatmul.mubr.msk.f32.vlgmr.msra.gmra.mrb[56].mxu0 %vm4313_vm4, %v4506_v63 }
0x21a4   :  { %v5845_v29 = vpop.f32.mrb[56].mxu0 }
0x21a5   :  { %v4670_v7 = vadd.f32 1e-05, %v5845_v29  ;;  %v4664_v62 = vpop.f32.mrb[57].mxu0 }
0x21a6   :  { %v4665_v23 = vadd.f32 1e-05, %v4664_v62 }
0x21a7   :  { %6432 = vrsqrt.f32 %v4670_v7 }
0x21a8   :  { %6434 = vrsqrt.f32 %v4665_v23 }
0x21b1   :  { %v6433_v9 = vpop.eup %6432 }
0x21b2   :  { %v6435_v24 = vpop.eup %6434  ;;  %v4676_v48 = vmul.f32 %v6433_v9, %v4592_v3 }
0x21b3   :  { %v4675_v51 = vmul.f32 %v6435_v24, %v4591_v14 }
0x21b4   :  { %v4686_v34 = vmul.f32 %v4683_v8, %v4676_v48 }
0x21b5   :  { %v4685_v12 = vmul.f32 %v4679_v33, %v4675_v51 }
0x21b6   :  { %v4696_v13 = vadd.f32 %v4693_v32, %v4686_v34 }
0x21b7   :  { %v4695_v15 = vadd.f32 %v4689_v11, %v4685_v12 }
0x21b8   :  { %4699 = vst.msk [vmem:[%s6845_s2 + $0x8] sm:$0xf] %vm4698_vm0, %v4696_v13 }
0x21b9   :  { %4697 = vst.msk [vmem:[%s6845_s2] sm:$0xff] %vm132_vm2, %v4695_v15 }
0x21ba   :  { %4704 = vsyncpa [#allocation3], 1 }

</bundles_post_ra>
